<compile_context>
chip_gen: v7x
topology: tpu7x:2x2x1
jax: 0.10.0
libtpu: 0.0.40
codegen_flags: <defaults>
</compile_context>

<pallas_src>
import functools

import jax
import jax.numpy as jnp
import numpy as np
from jax.experimental import pallas as pl
from jax.experimental.pallas import tpu as pltpu


# --------------------------------- kernel ------------------------------------

def _cf_vae2_kernel(
    # inputs
    x_ref, c_ref, a_ref, sel_ref, eps_ref,
    we1_ref, we1c_ref, be1_ref,
    we2_ref, be2_ref,
    we3_ref, be3_ref,
    wd1l_ref, wd1xz_ref, wd1c_ref, bd1_ref,
    wd2_ref, bd2_ref, wd3_ref, bd3_ref,
    # outputs
    enc_out, dec_out,
    *, D, E):
  """One row tile of the flattened (MC*B) decoder slab, encoder fused in."""
  x = x_ref[...]                       # (B, D)
  c = c_ref[...]                       # (B, 1)
  a = a_ref[...]                       # (D, D) = I - adj^T

  # ---------------- encoder (MC-invariant, tiny; recomputed per tile) --------
  # z is only needed as an output; its contribution to the MLPs is folded
  # into we1 / wd1xz at pack time (A folded into the weights).
  z = jnp.dot(x, a, preferred_element_type=jnp.float32)              # (B, D)

  # layer 1 of both heads stacked (N=64); BN and the z-path already folded.
  h1 = jnp.maximum(
      jnp.dot(x, we1_ref[...], preferred_element_type=jnp.float32)
      + c * we1c_ref[...]              # K=1 matmul done as VPU broadcast FMA
      + be1_ref[...], 0.0)                                           # (B, 64)
  # layer 2 (block-diagonal: mean cols 0:16, var cols 16:32)
  h2 = jnp.maximum(
      jnp.dot(h1, we2_ref[...], preferred_element_type=jnp.float32)
      + be2_ref[...], 0.0)                                           # (B, 32)
  # layer 3: ONE block-diagonal (32, 2E) matmul for both heads; lane-slice.
  o3 = jnp.dot(h2, we3_ref[...], preferred_element_type=jnp.float32) + be3_ref[...]
  em = o3[:, :E]                                                     # (B, E)
  ev = 0.5 + jax.nn.sigmoid(o3[:, E:])                               # (B, E)
  sd = jnp.sqrt(ev)                    # hoisted out of the MC axis

  # decoder MC-invariant projection (z-path folded into wd1xz)
  zc_proj = (jnp.dot(x, wd1xz_ref[...], preferred_element_type=jnp.float32)
             + c * wd1c_ref[...] + bd1_ref[...])                     # (B, 16)

  # single lane-dense encoder-side store: [z | em | ev]  -> (B, D+2E)
  enc_out[0] = jnp.concatenate([z, em, ev], axis=1)

  # ---------------- decoder over the MC-flattened row slab -------------------
  # Broadcast the per-batch rows across the MC groups of this tile with ONE
  # 0/1-selection matmul over the lane-concatenated [em | sd | zc_proj] block.
  blk = jnp.concatenate([em, sd, zc_proj], axis=1)                   # (B, 2E+16)
  bcast = jnp.dot(sel_ref[...], blk, preferred_element_type=jnp.float32)  # (TB, 2E+16)
  em_b = bcast[:, :E]
  sd_b = bcast[:, E:2 * E]
  zc_b = bcast[:, 2 * E:]

  z_lat = em_b + sd_b * eps_ref[...]   # sample_latent_code, all MC rows at once
  h = jnp.maximum(
      jnp.dot(z_lat, wd1l_ref[...], preferred_element_type=jnp.float32) + zc_b, 0.0)
  h = jnp.maximum(
      jnp.dot(h, wd2_ref[...], preferred_element_type=jnp.float32) + bd2_ref[...], 0.0)
  x_pred = jax.nn.sigmoid(
      jnp.dot(h, wd3_ref[...], preferred_element_type=jnp.float32) + bd3_ref[...])
  xpc = jnp.dot(x_pred, a, preferred_element_type=jnp.float32)

  # single lane-dense decoder store: [x_pred | x_pred_causal] -> (TB, 2D)
  dec_out[...] = jnp.concatenate([x_pred, xpc], axis=1)


# ---------------------- host-side parameter packing --------------------------

def _fold_bn(w, b, bn, eps=1e-5):
  """Fold eval-mode BatchNorm (after Linear) into the Linear weight/bias."""
  gamma, beta, mean, var = bn
  s = gamma / jnp.sqrt(var + eps)
  return w * s[None, :], (b - mean) * s + beta


def _pack_params(enc_m, enc_v, dec, a, D, E):
  """Fold BN + the causal matrix A into the weights; stack the two encoder heads."""
  w1m, b1m = _fold_bn(enc_m["w1"], enc_m["b1"], enc_m["bn1"])
  w2m, b2m = _fold_bn(enc_m["w2"], enc_m["b2"], enc_m["bn2"])
  w1v, b1v = _fold_bn(enc_v["w1"], enc_v["b1"], enc_v["bn1"])
  w2v, b2v = _fold_bn(enc_v["w2"], enc_v["b2"], enc_v["bn2"])
  w3m, b3m = enc_m["w3"], enc_m["b3"]
  w3v, b3v = enc_v["w3"], enc_v["b3"]

  # layer 1 of both heads stacked column-wise; z-path folded through A.
  w1_stack = jnp.concatenate([w1m, w1v], axis=1)           # (2D+1, 64)
  we1x = w1_stack[:D]                                      # (D, 64)
  we1z = w1_stack[D:2 * D]                                 # (D, 64)
  we1 = we1x + a @ we1z                                    # (D, 64)   A folded
  we1c = w1_stack[2 * D:2 * D + 1]                         # (1, 64)
  be1 = jnp.concatenate([b1m, b1v])[None, :]               # (1, 64)

  # layer 2: block-diagonal (64, 32)
  zmv = jnp.zeros((w2m.shape[0], w2v.shape[1]), jnp.float32)
  zvm = jnp.zeros((w2v.shape[0], w2m.shape[1]), jnp.float32)
  we2 = jnp.concatenate(
      [jnp.concatenate([w2m, zmv], axis=1),
       jnp.concatenate([zvm, w2v], axis=1)], axis=0)       # (64, 32)
  be2 = jnp.concatenate([b2m, b2v])[None, :]               # (1, 32)

  # layer 3: ONE block-diagonal (32, 2E) weight for both heads.
  we3 = jnp.concatenate(
      [jnp.concatenate([w3m, jnp.zeros_like(w3v)], axis=1),
       jnp.concatenate([jnp.zeros_like(w3m), w3v], axis=1)], axis=0)  # (32, 2E)
  be3 = jnp.concatenate([b3m, b3v])[None, :]               # (1, 2E)

  # decoder: fold BN; split layer-1 over [z_latent, z, c]; fold A into z-path.
  wd1, bd1 = _fold_bn(dec["w1"], dec["b1"], dec["bn1"])
  wd2, bd2 = _fold_bn(dec["w2"], dec["b2"], dec["bn2"])
  wd3, bd3 = dec["w3"], dec["b3"]
  wd1l = wd1[:E]                                           # (E, 16)
  wd1xz = a @ wd1[E:E + D]                                 # (D, 16)   A folded
  wd1c = wd1[E + D:E + D + 1]                              # (1, 16)

  return (we1, we1c, be1, we2, be2, we3, be3,
          wd1l, wd1xz, wd1c, bd1[None, :], wd2, bd2[None, :], wd3, bd3[None, :])


# ------------------------------ forward builder --------------------------------

def _default_num_tiles(rows, batch):
  """2 tiles on v7x (2 TensorCores -> megacore sharding), else 1."""
  try:
    kind = jax.devices()[0].device_kind.lower()
  except Exception:
    kind = ""
  want = 2 if "v7" in kind else 1
  tb = rows // want
  if rows % want or tb % batch or tb % 8:
    return 1
  return want


def build_cf_vae2_forward(adj_matrix, enc_mean_p, enc_var_p, dec_p,
                          *, batch, encoded_size, mc_samples=50, num_tiles=None):
  """Packs parameters once and returns a jitted forward(x, c_raw, eps)."""
  D = adj_matrix.shape[0]
  E = encoded_size
  B = batch
  rows = mc_samples * B
  if num_tiles is None:
    num_tiles = _default_num_tiles(rows, B)
  assert rows % num_tiles == 0
  tb = rows // num_tiles
  assert tb % B == 0 and tb % 8 == 0, "tile rows must cover whole MC groups"

  # All of this is built exactly once (eagerly), off the per-call path.
  adj_matrix = adj_matrix.astype(jnp.float32)
  a_forzen = jnp.eye(D, dtype=jnp.float32) - adj_matrix.T        # I - adj^T
  sel = jnp.tile(jnp.eye(B, dtype=jnp.float32), (tb // B, 1))    # (tb, B)
  params = _pack_params(enc_mean_p, enc_var_p, dec_p, a_forzen, D, E)

  def const_spec(shape):
    n = len(shape)
    return pl.BlockSpec(shape, lambda *_, n=n: (0,) * n)

  in_specs = ([const_spec((B, D)), const_spec((B, 1)),
               const_spec((D, D)), const_spec((tb, B)),
               pl.BlockSpec((tb, E), lambda t: (t, 0))]
              + [const_spec(p.shape) for p in params])
  out_shape = (jax.ShapeDtypeStruct((num_tiles, B, D + 2 * E), jnp.float32),
               jax.ShapeDtypeStruct((rows, 2 * D), jnp.float32))
  out_specs = (pl.BlockSpec((1, B, D + 2 * E), lambda t: (t, 0, 0)),
               pl.BlockSpec((tb, 2 * D), lambda t: (t, 0)))

  call = pl.pallas_call(
      functools.partial(_cf_vae2_kernel, D=D, E=E),
      grid=(num_tiles,),
      in_specs=in_specs,
      out_specs=out_specs,
      out_shape=out_shape,
      compiler_params=pltpu.CompilerParams(
          dimension_semantics=("parallel",)),
  )

  @jax.jit
  def _run(x, c_raw, eps):
    c = c_raw.reshape(-1, 1).astype(jnp.float32)
    enc_all, dec = call(x, c, a_forzen, sel, eps, *params)
    enc = enc_all[0]
    z = enc[:, :D]
    em = enc[:, D:D + E]
    ev = enc[:, D + E:D + 2 * E]
    x_pred = dec[:, :D].reshape(mc_samples, B, D)
    xpc = dec[:, D:].reshape(mc_samples, B, D)
    return z, em, ev, x_pred, xpc

  def forward(x, c_raw, eps):
    assert eps.shape == (rows, E)
    z, em, ev, x_pred, xpc = _run(x, c_raw, eps)
    return {
        "em": em, "ev": ev, "z": z,
        "x_pred": x_pred, "x_pred_causal": xpc,
        "mc_samples": mc_samples, "adj_matrix": adj_matrix,
    }

  return forward


# ------------------------- deterministic parameter init -----------------------

def _init_linear(key, n_in, n_out):
  kw, kb = jax.random.split(key)
  w = jax.random.normal(kw, (n_in, n_out), jnp.float32) * 0.1
  b = jax.random.normal(kb, (n_out,), jnp.float32) * 0.01
  return w, b


def _init_bn(key, n):
  kg, kb, km, kv = jax.random.split(key, 4)
  gamma = 1.0 + 0.1 * jax.random.normal(kg, (n,), jnp.float32)
  beta = 0.1 * jax.random.normal(kb, (n,), jnp.float32)
  mean = 0.1 * jax.random.normal(km, (n,), jnp.float32)
  var = 0.5 + jax.random.uniform(kv, (n,), jnp.float32)
  return gamma, beta, mean, var


def _init_mlp(key, n_in, n_h1, n_h2, n_out):
  ks = jax.random.split(key, 5)
  w1, b1 = _init_linear(ks[0], n_in, n_h1)
  bn1 = _init_bn(ks[1], n_h1)
  w2, b2 = _init_linear(ks[2], n_h1, n_h2)
  bn2 = _init_bn(ks[3], n_h2)
  w3, b3 = _init_linear(ks[4], n_h2, n_out)
  return dict(w1=w1, b1=b1, bn1=bn1, w2=w2, b2=b2, bn2=bn2, w3=w3, b3=b3)


# ------------------------------ plain-JAX reference ---------------------------

def _reference_forward(x, c_raw, adj, enc_m, enc_v, dec, eps3):
  D = adj.shape[0]
  c = c_raw.reshape(-1, 1).astype(jnp.float32)
  A = jnp.eye(D, dtype=jnp.float32) - adj.T
  z = x @ A

  def mlp(p, inp, final_sigmoid):
    def bn(h, bnp):
      g, b, m, v = bnp
      return (h - m) / jnp.sqrt(v + 1e-5) * g + b
    h = jax.nn.relu(bn(inp @ p["w1"] + p["b1"], p["bn1"]))
    h = jax.nn.relu(bn(h @ p["w2"] + p["b2"], p["bn2"]))
    h = h @ p["w3"] + p["b3"]
    return jax.nn.sigmoid(h) if final_sigmoid else h

  xzc = jnp.concatenate([x, z, c], axis=1)
  em = mlp(enc_m, xzc, False)
  ev = 0.5 + mlp(enc_v, xzc, True)

  def dec_one(e):
    z_lat = em + jnp.sqrt(ev) * e
    xp = mlp(dec, jnp.concatenate([z_lat, z, c], axis=1), True)
    return xp, xp @ A

  x_pred, x_pred_c = jax.vmap(dec_one)(eps3)
  return z, em, ev, x_pred, x_pred_c


# ----------------------------------- main --------------------------------------

if __name__ == "__main__":
  B = 8            # batch
  D = 16           # data_size (len of ohe encoded feature names)
  E = 8            # encoded_size
  MC = 50          # mc_samples (fixed in the module's forward)

  key = jax.random.PRNGKey(0)
  k_adj, k_x, k_c, k_em, k_ev, k_dec, k_eps = jax.random.split(key, 7)

  # deterministic sparse DAG-ish adjacency (strictly lower-triangular 0/1)
  adj = (jax.random.uniform(k_adj, (D, D)) < 0.3).astype(jnp.float32)
  adj = adj * jnp.tril(jnp.ones((D, D), jnp.float32), k=-1)

  x = jax.random.uniform(k_x, (B, D), jnp.float32)
  c_raw = jax.random.normal(k_c, (B,), jnp.float32)

  enc_mean_p = _init_mlp(k_em, 2 * D + 1, 32, 16, E)
  enc_var_p = _init_mlp(k_ev, 2 * D + 1, 32, 16, E)
  dec_p = _init_mlp(k_dec, E + D + 1, 16, 32, D)

  # MC-major flattened noise: row m*B + b is sample m of batch element b.
  eps = jax.random.normal(k_eps, (MC * B, E), jnp.float32)

  forward = build_cf_vae2_forward(
      adj, enc_mean_p, enc_var_p, dec_p,
      batch=B, encoded_size=E, mc_samples=MC)

  res = forward(x, c_raw, eps)
  jax.block_until_ready(res)

  assert res["em"].shape == (B, E)
  assert res["ev"].shape == (B, E)
  assert res["z"].shape == (B, D)
  assert res["x_pred"].shape == (MC, B, D)
  assert res["x_pred_causal"].shape == (MC, B, D)

  # numerics vs. an unfused plain-JAX implementation of the module's forward
  z_r, em_r, ev_r, xp_r, xpc_r = _reference_forward(
      x, c_raw, adj, enc_mean_p, enc_var_p, dec_p, eps.reshape(MC, B, E))
  assert np.allclose(np.asarray(res["z"]), np.asarray(z_r), atol=1e-4, rtol=1e-3)
  assert np.allclose(np.asarray(res["em"]), np.asarray(em_r), atol=1e-4, rtol=1e-3)
  assert np.allclose(np.asarray(res["ev"]), np.asarray(ev_r), atol=1e-4, rtol=1e-3)
  assert np.allclose(np.asarray(res["x_pred"]), np.asarray(xp_r), atol=1e-4, rtol=1e-3)
  assert np.allclose(np.asarray(res["x_pred_causal"]), np.asarray(xpc_r),
                     atol=1e-4, rtol=1e-3)

  print("KERNEL_OK")
</pallas_src>

<mosaic_0001>
module attributes {stable_mosaic.version = 11 : i64} {
  func.func @_cf_vae2_kernel(%arg0: i32, %arg1: memref<8x16xf32, #tpu.memory_space<vmem>>, %arg2: memref<8x1xf32, #tpu.memory_space<vmem>>, %arg3: memref<16x16xf32, #tpu.memory_space<vmem>>, %arg4: memref<400x8xf32, #tpu.memory_space<vmem>>, %arg5: memref<400x8xf32, #tpu.memory_space<vmem>>, %arg6: memref<16x64xf32, #tpu.memory_space<vmem>>, %arg7: memref<1x64xf32, #tpu.memory_space<vmem>>, %arg8: memref<1x64xf32, #tpu.memory_space<vmem>>, %arg9: memref<64x32xf32, #tpu.memory_space<vmem>>, %arg10: memref<1x32xf32, #tpu.memory_space<vmem>>, %arg11: memref<32x16xf32, #tpu.memory_space<vmem>>, %arg12: memref<1x16xf32, #tpu.memory_space<vmem>>, %arg13: memref<8x16xf32, #tpu.memory_space<vmem>>, %arg14: memref<16x16xf32, #tpu.memory_space<vmem>>, %arg15: memref<1x16xf32, #tpu.memory_space<vmem>>, %arg16: memref<1x16xf32, #tpu.memory_space<vmem>>, %arg17: memref<16x32xf32, #tpu.memory_space<vmem>>, %arg18: memref<1x32xf32, #tpu.memory_space<vmem>>, %arg19: memref<32x16xf32, #tpu.memory_space<vmem>>, %arg20: memref<1x16xf32, #tpu.memory_space<vmem>>, %arg21: memref<1x8x32xf32, #tpu.memory_space<vmem>>, %arg22: memref<400x32xf32, #tpu.memory_space<vmem>>) attributes {dimension_semantics = [#tpu.dimension_semantics<parallel>], iteration_bounds = array<i64: 1>, scalar_prefetch = 0 : i64, scratch_operands = 0 : i64, tpu.core_type = #tpu.core_type<tc>, window_params = [{pipeline_mode = #tpu.pipeline_mode<synchronous>, transform_indices = @transform_0, window_bounds = array<i64: 8, 16>}, {pipeline_mode = #tpu.pipeline_mode<synchronous>, transform_indices = @transform_1, window_bounds = array<i64: 8, 1>}, {pipeline_mode = #tpu.pipeline_mode<synchronous>, transform_indices = @transform_2, window_bounds = array<i64: 16, 16>}, {pipeline_mode = #tpu.pipeline_mode<synchronous>, transform_indices = @transform_3, window_bounds = array<i64: 400, 8>}, {transform_indices = @transform_4, window_bounds = array<i64: 400, 8>}, {pipeline_mode = #tpu.pipeline_mode<synchronous>, transform_indices = @transform_5, window_bounds = array<i64: 16, 64>}, {pipeline_mode = #tpu.pipeline_mode<synchronous>, transform_indices = @transform_6, window_bounds = array<i64: 1, 64>}, {pipeline_mode = #tpu.pipeline_mode<synchronous>, transform_indices = @transform_7, window_bounds = array<i64: 1, 64>}, {pipeline_mode = #tpu.pipeline_mode<synchronous>, transform_indices = @transform_8, window_bounds = array<i64: 64, 32>}, {pipeline_mode = #tpu.pipeline_mode<synchronous>, transform_indices = @transform_9, window_bounds = array<i64: 1, 32>}, {pipeline_mode = #tpu.pipeline_mode<synchronous>, transform_indices = @transform_10, window_bounds = array<i64: 32, 16>}, {pipeline_mode = #tpu.pipeline_mode<synchronous>, transform_indices = @transform_11, window_bounds = array<i64: 1, 16>}, {pipeline_mode = #tpu.pipeline_mode<synchronous>, transform_indices = @transform_12, window_bounds = array<i64: 8, 16>}, {pipeline_mode = #tpu.pipeline_mode<synchronous>, transform_indices = @transform_13, window_bounds = array<i64: 16, 16>}, {pipeline_mode = #tpu.pipeline_mode<synchronous>, transform_indices = @transform_14, window_bounds = array<i64: 1, 16>}, {pipeline_mode = #tpu.pipeline_mode<synchronous>, transform_indices = @transform_15, window_bounds = array<i64: 1, 16>}, {pipeline_mode = #tpu.pipeline_mode<synchronous>, transform_indices = @transform_16, window_bounds = array<i64: 16, 32>}, {pipeline_mode = #tpu.pipeline_mode<synchronous>, transform_indices = @transform_17, window_bounds = array<i64: 1, 32>}, {pipeline_mode = #tpu.pipeline_mode<synchronous>, transform_indices = @transform_18, window_bounds = array<i64: 32, 16>}, {pipeline_mode = #tpu.pipeline_mode<synchronous>, transform_indices = @transform_19, window_bounds = array<i64: 1, 16>}, {transform_indices = @transform_20, window_bounds = array<i64: 1, 8, 32>}, {transform_indices = @transform_21, window_bounds = array<i64: 400, 32>}]} {
    %c0 = arith.constant 0 : index
    %c0_0 = arith.constant 0 : index
    %0 = vector.load %arg1[%c0, %c0_0] : memref<8x16xf32, #tpu.memory_space<vmem>>, vector<8x16xf32>
    %c0_1 = arith.constant 0 : index
    %c0_2 = arith.constant 0 : index
    %1 = vector.load %arg2[%c0_1, %c0_2] : memref<8x1xf32, #tpu.memory_space<vmem>>, vector<8x1xf32>
    %c0_3 = arith.constant 0 : index
    %c0_4 = arith.constant 0 : index
    %2 = vector.load %arg3[%c0_3, %c0_4] : memref<16x16xf32, #tpu.memory_space<vmem>>, vector<16x16xf32>
    %cst = arith.constant dense<0.000000e+00> : vector<8x16xf32>
    %3 = tpu.matmul %0, %2, %cst {dimension_numbers = #tpu.dot_dimension_numbers<[1], [0], [0], [1], [0, 0, 1, 1], [], []>} : vector<8x16xf32>, vector<16x16xf32>, vector<8x16xf32> -> vector<8x16xf32>
    %c0_5 = arith.constant 0 : index
    %c0_6 = arith.constant 0 : index
    %4 = vector.load %arg6[%c0_5, %c0_6] : memref<16x64xf32, #tpu.memory_space<vmem>>, vector<16x64xf32>
    %cst_7 = arith.constant dense<0.000000e+00> : vector<8x64xf32>
    %5 = tpu.matmul %0, %4, %cst_7 {dimension_numbers = #tpu.dot_dimension_numbers<[1], [0], [0], [1], [0, 0, 1, 1], [], []>} : vector<8x16xf32>, vector<16x64xf32>, vector<8x64xf32> -> vector<8x64xf32>
    %c0_8 = arith.constant 0 : index
    %c0_9 = arith.constant 0 : index
    %6 = vector.load %arg7[%c0_8, %c0_9] : memref<1x64xf32, #tpu.memory_space<vmem>>, vector<1x64xf32>
    %7 = vector.broadcast %1 : vector<8x1xf32> to vector<8x64xf32>
    %8 = vector.broadcast %6 : vector<1x64xf32> to vector<8x64xf32>
    %9 = arith.mulf %7, %8 : vector<8x64xf32>
    %10 = arith.addf %5, %9 : vector<8x64xf32>
    %c0_10 = arith.constant 0 : index
    %c0_11 = arith.constant 0 : index
    %11 = vector.load %arg8[%c0_10, %c0_11] : memref<1x64xf32, #tpu.memory_space<vmem>>, vector<1x64xf32>
    %12 = vector.broadcast %11 : vector<1x64xf32> to vector<8x64xf32>
    %13 = arith.addf %10, %12 : vector<8x64xf32>
    %cst_12 = arith.constant 0.000000e+00 : f32
    %14 = vector.broadcast %cst_12 : f32 to vector<8x64xf32>
    %15 = arith.maximumf %13, %14 : vector<8x64xf32>
    %c0_13 = arith.constant 0 : index
    %c0_14 = arith.constant 0 : index
    %16 = vector.load %arg9[%c0_13, %c0_14] : memref<64x32xf32, #tpu.memory_space<vmem>>, vector<64x32xf32>
    %cst_15 = arith.constant dense<0.000000e+00> : vector<8x32xf32>
    %17 = tpu.matmul %15, %16, %cst_15 {dimension_numbers = #tpu.dot_dimension_numbers<[1], [0], [0], [1], [0, 0, 1, 1], [], []>} : vector<8x64xf32>, vector<64x32xf32>, vector<8x32xf32> -> vector<8x32xf32>
    %c0_16 = arith.constant 0 : index
    %c0_17 = arith.constant 0 : index
    %18 = vector.load %arg10[%c0_16, %c0_17] : memref<1x32xf32, #tpu.memory_space<vmem>>, vector<1x32xf32>
    %19 = vector.broadcast %18 : vector<1x32xf32> to vector<8x32xf32>
    %20 = arith.addf %17, %19 : vector<8x32xf32>
    %cst_18 = arith.constant 0.000000e+00 : f32
    %21 = vector.broadcast %cst_18 : f32 to vector<8x32xf32>
    %22 = arith.maximumf %20, %21 : vector<8x32xf32>
    %c0_19 = arith.constant 0 : index
    %c0_20 = arith.constant 0 : index
    %23 = vector.load %arg11[%c0_19, %c0_20] : memref<32x16xf32, #tpu.memory_space<vmem>>, vector<32x16xf32>
    %cst_21 = arith.constant dense<0.000000e+00> : vector<8x16xf32>
    %24 = tpu.matmul %22, %23, %cst_21 {dimension_numbers = #tpu.dot_dimension_numbers<[1], [0], [0], [1], [0, 0, 1, 1], [], []>} : vector<8x32xf32>, vector<32x16xf32>, vector<8x16xf32> -> vector<8x16xf32>
    %c0_22 = arith.constant 0 : index
    %c0_23 = arith.constant 0 : index
    %25 = vector.load %arg12[%c0_22, %c0_23] : memref<1x16xf32, #tpu.memory_space<vmem>>, vector<1x16xf32>
    %26 = vector.broadcast %25 : vector<1x16xf32> to vector<8x16xf32>
    %27 = arith.addf %24, %26 : vector<8x16xf32>
    %28 = vector.extract_strided_slice %27 {offsets = [0, 0], sizes = [8, 8], strides = [1, 1]} : vector<8x16xf32> to vector<8x8xf32>
    %29 = vector.extract_strided_slice %27 {offsets = [0, 8], sizes = [8, 8], strides = [1, 1]} : vector<8x16xf32> to vector<8x8xf32>
    %30 = arith.negf %29 : vector<8x8xf32>
    %31 = math.exp %30 : vector<8x8xf32>
    %cst_24 = arith.constant 1.000000e+00 : f32
    %32 = vector.broadcast %cst_24 : f32 to vector<8x8xf32>
    %33 = arith.addf %32, %31 : vector<8x8xf32>
    %34 = arith.divf %32, %33 : vector<8x8xf32>
    %cst_25 = arith.constant 5.000000e-01 : f32
    %35 = vector.broadcast %cst_25 : f32 to vector<8x8xf32>
    %36 = arith.addf %35, %34 : vector<8x8xf32>
    %37 = math.sqrt %36 : vector<8x8xf32>
    %c0_26 = arith.constant 0 : index
    %c0_27 = arith.constant 0 : index
    %38 = vector.load %arg14[%c0_26, %c0_27] : memref<16x16xf32, #tpu.memory_space<vmem>>, vector<16x16xf32>
    %cst_28 = arith.constant dense<0.000000e+00> : vector<8x16xf32>
    %39 = tpu.matmul %0, %38, %cst_28 {dimension_numbers = #tpu.dot_dimension_numbers<[1], [0], [0], [1], [0, 0, 1, 1], [], []>} : vector<8x16xf32>, vector<16x16xf32>, vector<8x16xf32> -> vector<8x16xf32>
    %c0_29 = arith.constant 0 : index
    %c0_30 = arith.constant 0 : index
    %40 = vector.load %arg15[%c0_29, %c0_30] : memref<1x16xf32, #tpu.memory_space<vmem>>, vector<1x16xf32>
    %41 = vector.broadcast %1 : vector<8x1xf32> to vector<8x16xf32>
    %42 = vector.broadcast %40 : vector<1x16xf32> to vector<8x16xf32>
    %43 = arith.mulf %41, %42 : vector<8x16xf32>
    %44 = arith.addf %39, %43 : vector<8x16xf32>
    %c0_31 = arith.constant 0 : index
    %c0_32 = arith.constant 0 : index
    %45 = vector.load %arg16[%c0_31, %c0_32] : memref<1x16xf32, #tpu.memory_space<vmem>>, vector<1x16xf32>
    %46 = vector.broadcast %45 : vector<1x16xf32> to vector<8x16xf32>
    %47 = arith.addf %44, %46 : vector<8x16xf32>
    %48 = tpu.concatenate %3, %28, %36 in 1 : vector<8x16xf32>, vector<8x8xf32>, vector<8x8xf32> -> vector<8x32xf32>
    %c0_33 = arith.constant 0 : index
    %c0_34 = arith.constant 0 : index
    %c0_35 = arith.constant 0 : index
    %49 = vector.load %arg21[%c0_33, %c0_34, %c0_35] : memref<1x8x32xf32, #tpu.memory_space<vmem>>, vector<1x8x32xf32>
    %50 = vector.shape_cast %49 : vector<1x8x32xf32> to vector<8x32xf32>
    %51 = vector.shape_cast %48 : vector<8x32xf32> to vector<1x8x32xf32>
    tpu.vector_store %arg21[%c0_33, %c0_34, %c0_35], %51 {strides = array<i32>} : memref<1x8x32xf32, #tpu.memory_space<vmem>>, vector<1x8x32xf32>,
    %52 = tpu.concatenate %28, %37, %47 in 1 : vector<8x8xf32>, vector<8x8xf32>, vector<8x16xf32> -> vector<8x32xf32>
    %c0_36 = arith.constant 0 : index
    %c0_37 = arith.constant 0 : index
    %53 = vector.load %arg4[%c0_36, %c0_37] : memref<400x8xf32, #tpu.memory_space<vmem>>, vector<400x8xf32>
    %cst_38 = arith.constant dense<0.000000e+00> : vector<400x32xf32>
    %54 = tpu.matmul %53, %52, %cst_38 {dimension_numbers = #tpu.dot_dimension_numbers<[1], [0], [0], [1], [0, 0, 1, 1], [], []>} : vector<400x8xf32>, vector<8x32xf32>, vector<400x32xf32> -> vector<400x32xf32>
    %55 = vector.extract_strided_slice %54 {offsets = [0, 0], sizes = [400, 8], strides = [1, 1]} : vector<400x32xf32> to vector<400x8xf32>
    %56 = vector.extract_strided_slice %54 {offsets = [0, 8], sizes = [400, 8], strides = [1, 1]} : vector<400x32xf32> to vector<400x8xf32>
    %57 = vector.extract_strided_slice %54 {offsets = [0, 16], sizes = [400, 16], strides = [1, 1]} : vector<400x32xf32> to vector<400x16xf32>
    %c0_39 = arith.constant 0 : index
    %c0_40 = arith.constant 0 : index
    %58 = vector.load %arg5[%c0_39, %c0_40] : memref<400x8xf32, #tpu.memory_space<vmem>>, vector<400x8xf32>
    %59 = arith.mulf %56, %58 : vector<400x8xf32>
    %60 = arith.addf %55, %59 : vector<400x8xf32>
    %c0_41 = arith.constant 0 : index
    %c0_42 = arith.constant 0 : index
    %61 = vector.load %arg13[%c0_41, %c0_42] : memref<8x16xf32, #tpu.memory_space<vmem>>, vector<8x16xf32>
    %cst_43 = arith.constant dense<0.000000e+00> : vector<400x16xf32>
    %62 = tpu.matmul %60, %61, %cst_43 {dimension_numbers = #tpu.dot_dimension_numbers<[1], [0], [0], [1], [0, 0, 1, 1], [], []>} : vector<400x8xf32>, vector<8x16xf32>, vector<400x16xf32> -> vector<400x16xf32>
    %63 = arith.addf %62, %57 : vector<400x16xf32>
    %cst_44 = arith.constant 0.000000e+00 : f32
    %64 = vector.broadcast %cst_44 : f32 to vector<400x16xf32>
    %65 = arith.maximumf %63, %64 : vector<400x16xf32>
    %c0_45 = arith.constant 0 : index
    %c0_46 = arith.constant 0 : index
    %66 = vector.load %arg17[%c0_45, %c0_46] : memref<16x32xf32, #tpu.memory_space<vmem>>, vector<16x32xf32>
    %cst_47 = arith.constant dense<0.000000e+00> : vector<400x32xf32>
    %67 = tpu.matmul %65, %66, %cst_47 {dimension_numbers = #tpu.dot_dimension_numbers<[1], [0], [0], [1], [0, 0, 1, 1], [], []>} : vector<400x16xf32>, vector<16x32xf32>, vector<400x32xf32> -> vector<400x32xf32>
    %c0_48 = arith.constant 0 : index
    %c0_49 = arith.constant 0 : index
    %68 = vector.load %arg18[%c0_48, %c0_49] : memref<1x32xf32, #tpu.memory_space<vmem>>, vector<1x32xf32>
    %69 = vector.broadcast %68 : vector<1x32xf32> to vector<400x32xf32>
    %70 = arith.addf %67, %69 : vector<400x32xf32>
    %cst_50 = arith.constant 0.000000e+00 : f32
    %71 = vector.broadcast %cst_50 : f32 to vector<400x32xf32>
    %72 = arith.maximumf %70, %71 : vector<400x32xf32>
    %c0_51 = arith.constant 0 : index
    %c0_52 = arith.constant 0 : index
    %73 = vector.load %arg19[%c0_51, %c0_52] : memref<32x16xf32, #tpu.memory_space<vmem>>, vector<32x16xf32>
    %cst_53 = arith.constant dense<0.000000e+00> : vector<400x16xf32>
    %74 = tpu.matmul %72, %73, %cst_53 {dimension_numbers = #tpu.dot_dimension_numbers<[1], [0], [0], [1], [0, 0, 1, 1], [], []>} : vector<400x32xf32>, vector<32x16xf32>, vector<400x16xf32> -> vector<400x16xf32>
    %c0_54 = arith.constant 0 : index
    %c0_55 = arith.constant 0 : index
    %75 = vector.load %arg20[%c0_54, %c0_55] : memref<1x16xf32, #tpu.memory_space<vmem>>, vector<1x16xf32>
    %76 = vector.broadcast %75 : vector<1x16xf32> to vector<400x16xf32>
    %77 = arith.addf %74, %76 : vector<400x16xf32>
    %78 = arith.negf %77 : vector<400x16xf32>
    %79 = math.exp %78 : vector<400x16xf32>
    %cst_56 = arith.constant 1.000000e+00 : f32
    %80 = vector.broadcast %cst_56 : f32 to vector<400x16xf32>
    %81 = arith.addf %80, %79 : vector<400x16xf32>
    %82 = arith.divf %80, %81 : vector<400x16xf32>
    %cst_57 = arith.constant dense<0.000000e+00> : vector<400x16xf32>
    %83 = tpu.matmul %82, %2, %cst_57 {dimension_numbers = #tpu.dot_dimension_numbers<[1], [0], [0], [1], [0, 0, 1, 1], [], []>} : vector<400x16xf32>, vector<16x16xf32>, vector<400x16xf32> -> vector<400x16xf32>
    %84 = tpu.concatenate %82, %83 in 1 : vector<400x16xf32>, vector<400x16xf32> -> vector<400x32xf32>
    %c0_58 = arith.constant 0 : index
    %c0_59 = arith.constant 0 : index
    %85 = vector.load %arg22[%c0_58, %c0_59] : memref<400x32xf32, #tpu.memory_space<vmem>>, vector<400x32xf32>
    tpu.vector_store %arg22[%c0_58, %c0_59], %84 {strides = array<i32>} : memref<400x32xf32, #tpu.memory_space<vmem>>, vector<400x32xf32>,
    return
  }
  func.func @transform_0(%arg0: i32) -> (i32, i32) {
    %c0_i32 = arith.constant 0 : i32
    %c0_i32_0 = arith.constant 0 : i32
    %c0_i32_1 = arith.constant 0 : i32
    return %c0_i32, %c0_i32_0 : i32, i32
  }
  func.func @transform_1(%arg0: i32) -> (i32, i32) {
    %c0_i32 = arith.constant 0 : i32
    %c0_i32_0 = arith.constant 0 : i32
    %c0_i32_1 = arith.constant 0 : i32
    return %c0_i32, %c0_i32_0 : i32, i32
  }
  func.func @transform_2(%arg0: i32) -> (i32, i32) {
    %c0_i32 = arith.constant 0 : i32
    %c0_i32_0 = arith.constant 0 : i32
    %c0_i32_1 = arith.constant 0 : i32
    return %c0_i32, %c0_i32_0 : i32, i32
  }
  func.func @transform_3(%arg0: i32) -> (i32, i32) {
    %c0_i32 = arith.constant 0 : i32
    %c0_i32_0 = arith.constant 0 : i32
    %c0_i32_1 = arith.constant 0 : i32
    return %c0_i32, %c0_i32_0 : i32, i32
  }
  func.func @transform_4(%arg0: i32) -> (i32, i32) {
    %c0_i32 = arith.constant 0 : i32
    %c0_i32_0 = arith.constant 0 : i32
    return %arg0, %c0_i32 : i32, i32
  }
  func.func @transform_5(%arg0: i32) -> (i32, i32) {
    %c0_i32 = arith.constant 0 : i32
    %c0_i32_0 = arith.constant 0 : i32
    %c0_i32_1 = arith.constant 0 : i32
    return %c0_i32, %c0_i32_0 : i32, i32
  }
  func.func @transform_6(%arg0: i32) -> (i32, i32) {
    %c0_i32 = arith.constant 0 : i32
    %c0_i32_0 = arith.constant 0 : i32
    %c0_i32_1 = arith.constant 0 : i32
    return %c0_i32, %c0_i32_0 : i32, i32
  }
  func.func @transform_7(%arg0: i32) -> (i32, i32) {
    %c0_i32 = arith.constant 0 : i32
    %c0_i32_0 = arith.constant 0 : i32
    %c0_i32_1 = arith.constant 0 : i32
    return %c0_i32, %c0_i32_0 : i32, i32
  }
  func.func @transform_8(%arg0: i32) -> (i32, i32) {
    %c0_i32 = arith.constant 0 : i32
    %c0_i32_0 = arith.constant 0 : i32
    %c0_i32_1 = arith.constant 0 : i32
    return %c0_i32, %c0_i32_0 : i32, i32
  }
  func.func @transform_9(%arg0: i32) -> (i32, i32) {
    %c0_i32 = arith.constant 0 : i32
    %c0_i32_0 = arith.constant 0 : i32
    %c0_i32_1 = arith.constant 0 : i32
    return %c0_i32, %c0_i32_0 : i32, i32
  }
  func.func @transform_10(%arg0: i32) -> (i32, i32) {
    %c0_i32 = arith.constant 0 : i32
    %c0_i32_0 = arith.constant 0 : i32
    %c0_i32_1 = arith.constant 0 : i32
    return %c0_i32, %c0_i32_0 : i32, i32
  }
  func.func @transform_11(%arg0: i32) -> (i32, i32) {
    %c0_i32 = arith.constant 0 : i32
    %c0_i32_0 = arith.constant 0 : i32
    %c0_i32_1 = arith.constant 0 : i32
    return %c0_i32, %c0_i32_0 : i32, i32
  }
  func.func @transform_12(%arg0: i32) -> (i32, i32) {
    %c0_i32 = arith.constant 0 : i32
    %c0_i32_0 = arith.constant 0 : i32
    %c0_i32_1 = arith.constant 0 : i32
    return %c0_i32, %c0_i32_0 : i32, i32
  }
  func.func @transform_13(%arg0: i32) -> (i32, i32) {
    %c0_i32 = arith.constant 0 : i32
    %c0_i32_0 = arith.constant 0 : i32
    %c0_i32_1 = arith.constant 0 : i32
    return %c0_i32, %c0_i32_0 : i32, i32
  }
  func.func @transform_14(%arg0: i32) -> (i32, i32) {
    %c0_i32 = arith.constant 0 : i32
    %c0_i32_0 = arith.constant 0 : i32
    %c0_i32_1 = arith.constant 0 : i32
    return %c0_i32, %c0_i32_0 : i32, i32
  }
  func.func @transform_15(%arg0: i32) -> (i32, i32) {
    %c0_i32 = arith.constant 0 : i32
    %c0_i32_0 = arith.constant 0 : i32
    %c0_i32_1 = arith.constant 0 : i32
    return %c0_i32, %c0_i32_0 : i32, i32
  }
  func.func @transform_16(%arg0: i32) -> (i32, i32) {
    %c0_i32 = arith.constant 0 : i32
    %c0_i32_0 = arith.constant 0 : i32
    %c0_i32_1 = arith.constant 0 : i32
    return %c0_i32, %c0_i32_0 : i32, i32
  }
  func.func @transform_17(%arg0: i32) -> (i32, i32) {
    %c0_i32 = arith.constant 0 : i32
    %c0_i32_0 = arith.constant 0 : i32
    %c0_i32_1 = arith.constant 0 : i32
    return %c0_i32, %c0_i32_0 : i32, i32
  }
  func.func @transform_18(%arg0: i32) -> (i32, i32) {
    %c0_i32 = arith.constant 0 : i32
    %c0_i32_0 = arith.constant 0 : i32
    %c0_i32_1 = arith.constant 0 : i32
    return %c0_i32, %c0_i32_0 : i32, i32
  }
  func.func @transform_19(%arg0: i32) -> (i32, i32) {
    %c0_i32 = arith.constant 0 : i32
    %c0_i32_0 = arith.constant 0 : i32
    %c0_i32_1 = arith.constant 0 : i32
    return %c0_i32, %c0_i32_0 : i32, i32
  }
  func.func @transform_20(%arg0: i32) -> (i32, i32, i32) {
    %c0_i32 = arith.constant 0 : i32
    %c0_i32_0 = arith.constant 0 : i32
    %c0_i32_1 = arith.constant 0 : i32
    return %arg0, %c0_i32, %c0_i32_0 : i32, i32, i32
  }
  func.func @transform_21(%arg0: i32) -> (i32, i32) {
    %c0_i32 = arith.constant 0 : i32
    %c0_i32_0 = arith.constant 0 : i32
    return %arg0, %c0_i32 : i32, i32
  }
}

</mosaic_0001>

<bundles_post_ra>
// kernel: _run.1
= control target key start
LH: loop header
LB: loop body
LE: loop exit
PB: predicated region body
PF: predicated region fallthrough
CT: control target
= control target key end

     0   :  { %s8246_s0 = inlined_call_operand.hbm [shape: f32[8,16], index: 0, kind: input, shape index: {}]   ;;  %s8247_s1 = inlined_call_operand.vmem [shape: f32[8,1], index: 1, kind: input, shape index: {}]   ;;  %s8248_s2 = inlined_call_operand.hbm [shape: f32[16,16], index: 2, kind: input, shape index: {}]   ;;  %s8249_s3 = inlined_call_operand.vmem [shape: f32[400,8], index: 3, kind: input, shape index: {}]   ;;  %s8250_s4 = inlined_call_operand.vmem [shape: f32[400,8], index: 4, kind: input, shape index: {}]   ;;  %s8251_s5 = inlined_call_operand.hbm [shape: f32[16,64], index: 5, kind: input, shape index: {}]   ;;  %s8252_s6 = inlined_call_operand.hbm [shape: f32[1,64], index: 6, kind: input, shape index: {}]   ;;  %s8253_s7 = inlined_call_operand.hbm [shape: f32[1,64], index: 7, kind: input, shape index: {}]   ;;  %s8254_s8 = inlined_call_operand.vmem [shape: f32[64,32], index: 8, kind: input, shape index: {}]   ;;  %s8255_s9 = inlined_call_operand.hbm [shape: f32[1,32], index: 9, kind: input, shape index: {}]   ;;  %s8256_s10 = inlined_call_operand.hbm [shape: f32[32,16], index: 10, kind: input, shape index: {}]   ;;  %s8257_s11 = inlined_call_operand.vmem [shape: f32[1,16], index: 11, kind: input, shape index: {}]   ;;  %s8258_s12 = inlined_call_operand.hbm [shape: f32[8,16], index: 12, kind: input, shape index: {}]   ;;  %s8259_s13 = inlined_call_operand.hbm [shape: f32[16,16], index: 13, kind: input, shape index: {}]   ;;  %s8260_s14 = inlined_call_operand.vmem [shape: f32[1,16], index: 14, kind: input, shape index: {}]   ;;  %s8261_s15 = inlined_call_operand.vmem [shape: f32[1,16], index: 15, kind: input, shape index: {}]   ;;  %s8262_s16 = inlined_call_operand.hbm [shape: f32[16,32], index: 16, kind: input, shape index: {}]   ;;  %s8263_s17 = inlined_call_operand.vmem [shape: f32[1,32], index: 17, kind: input, shape index: {}]   ;;  %s8264_s18 = inlined_call_operand.vmem [shape: f32[32,16], index: 18, kind: input, shape index: {}]   ;;  %s8265_s19 = inlined_call_operand.vmem [shape: f32[1,16], index: 19, kind: input, shape index: {}]   ;;  %s8266_s20 = inlined_call_operand.vmem [shape: f32[1,8,32], index: 20, kind: output, shape index: {0}]   ;;  %s8267_s21 = inlined_call_operand.vmem [shape: f32[400,32], index: 21, kind: output, shape index: {1}]  }
   0x1   :  { %8296 = sst [smem:[#allocation39_spill]] %s8246_s0 }
   0x2   :  { %8297 = sst [smem:[#allocation40_spill]] %s8247_s1 }
   0x3   :  { %8298 = sst [smem:[#allocation41_spill]] %s8248_s2 }
   0x4   :  { %8299 = sst [smem:[#allocation42_spill]] %s8249_s3 }
   0x5   :  { %8300 = sst [smem:[#allocation43_spill]] %s8250_s4 }
   0x6   :  { %8301 = sst [smem:[#allocation44_spill]] %s8251_s5 }
   0x7   :  { %8302 = sst [smem:[#allocation45_spill]] %s8265_s19 }
   0x8   :  { %8303 = sst [smem:[#allocation46_spill]] %s8267_s21 }
   0x9   :  { %27 = vsyncpa [#allocation3], 0 }
   0xa   :  { %28 = vsyncpa [#allocation5], 0 }
   0xb   :  { %29 = vsyncpa [#allocation8], 0 }
   0xc   :  { %30 = vsyncpa [#allocation11], 0 }
   0xd   :  { %31 = vsyncpa [#allocation14], 0 }
   0xe   :  { %32 = vsyncpa [#allocation17], 0  ;;  %s6067_s2 = smov [#allocation4]   ;;  %s8304_s3 = sld [smem:[#allocation41_spill]] }
   0xf   :  { %s50_s25 = sshll.u32 %s6067_s2, 4  ;;  %s51_s25 = int_to_ptr.vmem [resolvable:$true] %s50_s25 }
  0x14   :  { %s5835_s28 = scalar_lea.hbm %s8304_s3, 256 }
  0x15   :  { %p5836_p0 = scmp.ne.s32.totalorder %s8304_s3, %s5835_s28  ;;  %p5839_p1 = scmp.lt.u32.totalorder %s5835_s28, %s8304_s3 }
  0x17   :  { %p5841_p2 = pnand %p5839_p1, %p5836_p0 }
  0x19   :  { %5844 = shalt.err (!%p5841_p2)
}
  0x1a   :  { %s5845_s5 = scalar_lea.vmem %s51_s25, 256  ;;  %p5850_p4 = scmp.lt.s32.totalorder %s51_s25, %s51_s25 }
  0x1b   :  { %p5846_p3 = scmp.ne.s32.totalorder %s51_s25, %s5845_s5  ;;  %p5851_p5 = scmp.lt.s32.totalorder %s5845_s5, %s5845_s5 }
  0x1d   :  { %p5852_p6 = por %p5851_p5, %p5850_p4 }
  0x1f   :  { %p5853_p7 = pnand %p5852_p6, %p5846_p3 }
  0x21   :  { %5856 = shalt.err (!%p5853_p7)
}
  0x22   :  { %s6068_s22 = smov 128   ;;  %s6069_s23 = smov 8  }
  0x23   :  { %56 = dma.hbm_to_vmem [thread:$0]  %s8304_s3, 256, %s51_s25, [#allocation5], %s6068_s22, %s6068_s22, %s6069_s23  }
  0x24   :  { %s6070_s2 = smov [#allocation7]   ;;  %s6071_s27 = smov [#allocation10]  }
  0x25   :  { %s79_s26 = sshll.u32 %s6070_s2, 4  ;;  %s101_s28 = sshll.u32 %s6071_s27, 4  ;;  %s80_s26 = int_to_ptr.vmem [resolvable:$true] %s79_s26  ;;  %s102_s28 = int_to_ptr.vmem [resolvable:$true] %s101_s28 }
  0x26   :  { %s5857_s4 = scalar_lea.hbm %s8252_s6, 16 }
  0x27   :  { %p5858_p8 = scmp.ne.s32.totalorder %s8252_s6, %s5857_s4  ;;  %p5861_p9 = scmp.lt.u32.totalorder %s5857_s4, %s8252_s6 }
  0x29   :  { %p5863_p10 = pnand %p5861_p9, %p5858_p8 }
  0x2b   :  { %5866 = shalt.err (!%p5863_p10)
}
  0x2c   :  { %s5867_s25 = scalar_lea.vmem %s80_s26, 16  ;;  %s5871_s3 = scalar_lea.vmem %s80_s26, 32 }
  0x2d   :  { %p5868_p11 = scmp.ne.s32.totalorder %s80_s26, %s5867_s25  ;;  %p5872_p12 = scmp.lt.s32.totalorder %s80_s26, %s80_s26 }
  0x2e   :  { %p5873_p13 = scmp.lt.s32.totalorder %s5871_s3, %s5867_s25 }
  0x30   :  { %p5874_p0 = por %p5873_p13, %p5872_p12 }
  0x32   :  { %p5875_p1 = pnand %p5874_p0, %p5868_p11 }
  0x34   :  { %5878 = shalt.err (!%p5875_p1)
}
  0x35   :  { %82 = dma.hbm_to_vmem [thread:$0]  %s8252_s6, 16, %s80_s26, [#allocation8]  }
  0x36   :  { %s5879_s19 = scalar_lea.hbm %s8255_s9, 16 }
  0x37   :  { %p5880_p2 = scmp.ne.s32.totalorder %s8255_s9, %s5879_s19  ;;  %p5883_p3 = scmp.lt.u32.totalorder %s5879_s19, %s8255_s9 }
  0x39   :  { %p5885_p4 = pnand %p5883_p3, %p5880_p2 }
  0x3b   :  { %5888 = shalt.err (!%p5885_p4)
}
  0x3c   :  { %s5889_s30 = scalar_lea.vmem %s102_s28, 16  ;;  %s5893_s5 = scalar_lea.vmem %s102_s28, 32 }
  0x3d   :  { %p5890_p5 = scmp.ne.s32.totalorder %s102_s28, %s5889_s30  ;;  %p5894_p6 = scmp.lt.s32.totalorder %s102_s28, %s102_s28 }
  0x3e   :  { %p5895_p7 = scmp.lt.s32.totalorder %s5893_s5, %s5889_s30 }
  0x40   :  { %p5896_p8 = por %p5895_p7, %p5894_p6 }
  0x42   :  { %p5897_p9 = pnand %p5896_p8, %p5890_p5 }
  0x44   :  { %5900 = shalt.err (!%p5897_p9)
}
  0x45   :  { %104 = dma.hbm_to_vmem [thread:$0]  %s8255_s9, 16, %s102_s28, [#allocation11]  }
  0x46   :  { %s6072_s25 = smov [#allocation13]   ;;  %s6073_s1 = smov [#allocation2]  }
  0x47   :  { %s125_s3 = sshll.u32 %s6072_s25, 4  ;;  %s39_s24 = sshll.u32 %s6073_s1, 4  ;;  %s126_s3 = int_to_ptr.vmem [resolvable:$true] %s125_s3  ;;  %s40_s24 = int_to_ptr.vmem [resolvable:$true] %s39_s24 }
  0x48   :  { %s5901_s19 = scalar_lea.hbm %s8258_s12, 128 }
  0x49   :  { %p5902_p10 = scmp.ne.s32.totalorder %s8258_s12, %s5901_s19  ;;  %p5905_p11 = scmp.lt.u32.totalorder %s5901_s19, %s8258_s12 }
  0x4b   :  { %p5907_p12 = pnand %p5905_p11, %p5902_p10 }
  0x4d   :  { %5910 = shalt.err (!%p5907_p12)
}
  0x4e   :  { %s5911_s9 = scalar_lea.vmem %s126_s3, 128  ;;  %p5916_p0 = scmp.lt.s32.totalorder %s126_s3, %s126_s3 }
  0x4f   :  { %p5912_p13 = scmp.ne.s32.totalorder %s126_s3, %s5911_s9  ;;  %p5917_p1 = scmp.lt.s32.totalorder %s5911_s9, %s5911_s9 }
  0x51   :  { %p5918_p2 = por %p5917_p1, %p5916_p0 }
  0x53   :  { %p5919_p3 = pnand %p5918_p2, %p5912_p13 }
  0x55   :  { %5922 = shalt.err (!%p5919_p3)
}
  0x56   :  { %128 = dma.hbm_to_vmem [thread:$0]  %s8258_s12, 128, %s126_s3, [#allocation14]  }
  0x57   :  { %s8305_s26 = sld [smem:[#allocation39_spill]] }
  0x5d   :  { %s5923_s25 = scalar_lea.hbm %s8305_s26, 128 }
  0x5e   :  { %p5924_p4 = scmp.ne.s32.totalorder %s8305_s26, %s5923_s25  ;;  %p5927_p5 = scmp.lt.u32.totalorder %s5923_s25, %s8305_s26 }
  0x60   :  { %p5929_p6 = pnand %p5927_p5, %p5924_p4 }
  0x62   :  { %5932 = shalt.err (!%p5929_p6)
}
  0x63   :  { %s5933_s21 = scalar_lea.vmem %s40_s24, 128  ;;  %p5938_p8 = scmp.lt.s32.totalorder %s40_s24, %s40_s24 }
  0x64   :  { %p5934_p7 = scmp.ne.s32.totalorder %s40_s24, %s5933_s21  ;;  %p5939_p9 = scmp.lt.s32.totalorder %s5933_s21, %s5933_s21 }
  0x66   :  { %p5940_p10 = por %p5939_p9, %p5938_p8 }
  0x68   :  { %p5941_p11 = pnand %p5940_p10, %p5934_p7 }
  0x6a   :  { %5944 = shalt.err (!%p5941_p11)
}
  0x6b   :  { %42 = dma.hbm_to_vmem [thread:$0]  %s8305_s26, 128, %s40_s24, [#allocation3]  }
  0x6c   :  { %s6074_s29 = smov [#allocation6]   ;;  %s6075_s4 = smov [#allocation9]  }
  0x6d   :  { %s66_s0 = sshll.u32 %s6074_s29, 4  ;;  %s89_s9 = sshll.u32 %s6075_s4, 4  ;;  %s67_s0 = int_to_ptr.vmem [resolvable:$true] %s66_s0  ;;  %s90_s9 = int_to_ptr.vmem [resolvable:$true] %s89_s9 }
  0x6e   :  { %s8306_s5 = sld [smem:[#allocation44_spill]] }
  0x74   :  { %s5945_s6 = scalar_lea.hbm %s8306_s5, 256 }
  0x75   :  { %p5946_p12 = scmp.ne.s32.totalorder %s8306_s5, %s5945_s6  ;;  %p5949_p13 = scmp.lt.u32.totalorder %s5945_s6, %s8306_s5 }
  0x77   :  { %p5951_p0 = pnand %p5949_p13, %p5946_p12 }
  0x79   :  { %5954 = shalt.err (!%p5951_p0)
}
  0x7a   :  { %s5955_s24 = scalar_lea.vmem %s67_s0, 256  ;;  %p5960_p2 = scmp.lt.s32.totalorder %s67_s0, %s67_s0 }
  0x7b   :  { %p5956_p1 = scmp.ne.s32.totalorder %s67_s0, %s5955_s24  ;;  %p5961_p3 = scmp.lt.s32.totalorder %s5955_s24, %s5955_s24 }
  0x7d   :  { %p5962_p4 = por %p5961_p3, %p5960_p2 }
  0x7f   :  { %p5963_p5 = pnand %p5962_p4, %p5956_p1 }
  0x81   :  { %5966 = shalt.err (!%p5963_p5)
}
  0x82   :  { %72 = dma.hbm_to_vmem [thread:$0]  %s8306_s5, 256, %s67_s0, [#allocation5], %s6068_s22, %s6068_s22, %s6069_s23  }
  0x83   :  { %s5967_s3 = scalar_lea.hbm %s8253_s7, 16 }
  0x84   :  { %p5968_p6 = scmp.ne.s32.totalorder %s8253_s7, %s5967_s3  ;;  %p5971_p7 = scmp.lt.u32.totalorder %s5967_s3, %s8253_s7 }
  0x86   :  { %p5973_p8 = pnand %p5971_p7, %p5968_p6 }
  0x88   :  { %5976 = shalt.err (!%p5973_p8)
}
  0x89   :  { %s5977_s6 = scalar_lea.vmem %s90_s9, 16  ;;  %s5981_s25 = scalar_lea.vmem %s90_s9, 32 }
  0x8a   :  { %p5978_p9 = scmp.ne.s32.totalorder %s90_s9, %s5977_s6  ;;  %p5982_p10 = scmp.lt.s32.totalorder %s90_s9, %s90_s9 }
  0x8b   :  { %p5983_p11 = scmp.lt.s32.totalorder %s5981_s25, %s5977_s6 }
  0x8d   :  { %p5984_p12 = por %p5983_p11, %p5982_p10 }
  0x8f   :  { %p5985_p13 = pnand %p5984_p12, %p5978_p9 }
  0x91   :  { %5988 = shalt.err (!%p5985_p13)
}
  0x92   :  { %92 = dma.hbm_to_vmem [thread:$0]  %s8253_s7, 16, %s90_s9, [#allocation8]  }
  0x93   :  { %s6076_s1 = smov [#allocation12]   ;;  %s6077_s27 = smov [#allocation15]  }
  0x94   :  { %s110_s2 = sshll.u32 %s6076_s1, 4  ;;  %s134_s24 = sshll.u32 %s6077_s27, 4  ;;  %s111_s2 = int_to_ptr.vmem [resolvable:$true] %s110_s2  ;;  %s135_s24 = int_to_ptr.vmem [resolvable:$true] %s134_s24 }
  0x95   :  { %s5989_s21 = scalar_lea.hbm %s8256_s10, 512 }
  0x96   :  { %p5990_p0 = scmp.ne.s32.totalorder %s8256_s10, %s5989_s21  ;;  %p5993_p1 = scmp.lt.u32.totalorder %s5989_s21, %s8256_s10 }
  0x98   :  { %p5995_p2 = pnand %p5993_p1, %p5990_p0 }
  0x9a   :  { %5998 = shalt.err (!%p5995_p2)
}
  0x9b   :  { %s5999_s7 = scalar_lea.vmem %s111_s2, 512  ;;  %p6004_p4 = scmp.lt.s32.totalorder %s111_s2, %s111_s2 }
  0x9c   :  { %p6000_p3 = scmp.ne.s32.totalorder %s111_s2, %s5999_s7  ;;  %p6005_p5 = scmp.lt.s32.totalorder %s5999_s7, %s5999_s7 }
  0x9e   :  { %p6006_p6 = por %p6005_p5, %p6004_p4 }
  0xa0   :  { %p6007_p7 = pnand %p6006_p6, %p6000_p3 }
  0xa2   :  { %6010 = shalt.err (!%p6007_p7)
}
  0xa3   :  { %116 = dma.hbm_to_vmem [thread:$0]  %s8256_s10, 512, %s111_s2, [#allocation11], %s6068_s22, %s6068_s22, %s6069_s23  }
  0xa4   :  { %s6011_s25 = scalar_lea.hbm %s8259_s13, 256 }
  0xa5   :  { %p6012_p8 = scmp.ne.s32.totalorder %s8259_s13, %s6011_s25  ;;  %p6015_p9 = scmp.lt.u32.totalorder %s6011_s25, %s8259_s13 }
  0xa7   :  { %p6017_p10 = pnand %p6015_p9, %p6012_p8 }
  0xa9   :  { %6020 = shalt.err (!%p6017_p10)
}
  0xaa   :  { %s6021_s26 = scalar_lea.vmem %s135_s24, 256  ;;  %p6026_p12 = scmp.lt.s32.totalorder %s135_s24, %s135_s24 }
  0xab   :  { %p6022_p11 = scmp.ne.s32.totalorder %s135_s24, %s6021_s26  ;;  %p6027_p13 = scmp.lt.s32.totalorder %s6021_s26, %s6021_s26 }
  0xad   :  { %p6028_p0 = por %p6027_p13, %p6026_p12 }
  0xaf   :  { %p6029_p1 = pnand %p6028_p0, %p6022_p11 }
  0xb1   :  { %6032 = shalt.err (!%p6029_p1)
}
  0xb2   :  { %140 = dma.hbm_to_vmem [thread:$0]  %s8259_s13, 256, %s135_s24, [#allocation14], %s6068_s22, %s6068_s22, %s6069_s23  }
  0xb3   :  { %s6078_s19 = smov [#allocation16]   ;;  %s6033_s29 = scalar_lea.hbm %s8262_s16, 256 }
  0xb4   :  { %s150_s21 = sshll.u32 %s6078_s19, 4  ;;  %p6034_p2 = scmp.ne.s32.totalorder %s8262_s16, %s6033_s29  ;;  %s151_s21 = int_to_ptr.vmem [resolvable:$true] %s150_s21 }
  0xb5   :  { %p6037_p3 = scmp.lt.u32.totalorder %s6033_s29, %s8262_s16 }
  0xb7   :  { %p6039_p4 = pnand %p6037_p3, %p6034_p2 }
  0xb9   :  { %6042 = shalt.err (!%p6039_p4)
}
  0xba   :  { %s6043_s30 = scalar_lea.vmem %s151_s21, 256  ;;  %p6048_p6 = scmp.lt.s32.totalorder %s151_s21, %s151_s21 }
  0xbb   :  { %p6044_p5 = scmp.ne.s32.totalorder %s151_s21, %s6043_s30  ;;  %p6049_p7 = scmp.lt.s32.totalorder %s6043_s30, %s6043_s30 }
  0xbd   :  { %p6050_p8 = por %p6049_p7, %p6048_p6 }
  0xbf   :  { %p6051_p9 = pnand %p6050_p8, %p6044_p5 }
  0xc1   :  { %6054 = shalt.err (!%p6051_p9)
}
  0xc2   :  { %156 = dma.hbm_to_vmem [thread:$0]  %s8262_s16, 256, %s151_s21, [#allocation17], %s6068_s22, %s6068_s22, %s6069_s23  }
  0xc3   :  { %6055 = dma.done.wait [#allocation3], 128  }
  0xc4   :  { %6056 = vsyncadd [#allocation3], 4294967168 }
  0xc5   :  { %6057 = dma.done.wait [#allocation5], 512  }
  0xc6   :  { %6058 = vsyncadd [#allocation5], 4294966784 }
  0xc7   :  { %6059 = dma.done.wait [#allocation8], 32  }
  0xc8   :  { %6060 = vsyncadd [#allocation8], 4294967264 }
  0xc9   :  { %6061 = dma.done.wait [#allocation11], 528  }
  0xca   :  { %6062 = vsyncadd [#allocation11], 4294966768 }
  0xcb   :  { %6063 = dma.done.wait [#allocation14], 384  }
  0xcc   :  { %6064 = vsyncadd [#allocation14], 4294966912 }
  0xcd   :  { %6065 = dma.done.wait [#allocation17], 256  }
  0xce   :  { %6066 = vsyncadd [#allocation17], 4294967040  ;;  %v6079_v0 = vmov 0.0|0.0   ;;  %vm6080_vm0 = vmmov 0   ;;  %v6081_v1 = vmov 0.0   ;;  %v6082_v2 = vmov 0  }
  0xcf   :  { %5567 = vmatprep.subr.bf16.mxu1 %v6079_v0  ;;  %5129 = vmatprep.mubr.msk.f32.mxu1 %vm6080_vm0, %v6081_v1  ;;  %v271_v3 = vld [vmem:[#allocation6] sm:$0xff]  ;;  %v272_v4 = vld [vmem:[#allocation6 + $0x8] sm:$0xff]  ;;  %s8307_s6 = sld [smem:[#allocation40_spill]]  ;;  %v195_v7 = vld [vmem:[#allocation4] sm:$0xff]  ;;  %vm197_vm1 = vcmask 130048   ;;  %vm380_vm2 = vcmask 523264  }
  0xd0   :  { %5628 = vset.pattern.permute.xlu0 %v6082_v2  ;;  %5564 = vmatprep.subr.bf16.mxu0 %v6079_v0  ;;  %v5568_v5 = vpack.c.bf16 %v272_v4, %v271_v3  ;;  %v196_v8 = vld [vmem:[#allocation4 + $0x8] sm:$0xff]  ;;  %v365_v10 = vld [vmem:[%s8254_s8] sm:$0xff]  ;;  %v366_v11 = vld [vmem:[%s8254_s8 + $0x8] sm:$0xff]  ;;  %vm466_vm3 = vcmask 261120   ;;  %vm658_vm4 = vcmask 64512   ;;  %s8310_s30 = sld [smem:[#allocation42_spill]] }
  0xd1   :  { %5122 = vmatprep.mubr.msk.f32.mxu0 %vm6080_vm0, %v6081_v1  ;;  %v6340_v9 = vpack.c.bf16 %v196_v8, %v195_v7  ;;  %v193_v12 = vld [vmem:[#allocation2] sm:$0xff]  ;;  %v5571_v13 = vpack.c.bf16 %v366_v11, %v365_v10  ;;  %v367_v14 = vld [vmem:[%s8254_s8 + $0x10] sm:$0xff]  ;;  %v368_v15 = vld [vmem:[%s8254_s8 + $0x18] sm:$0xff]  ;;  %s8311_s1 = sld [smem:[#allocation43_spill]]  ;;  %vm651_vm7 = vcmask 195584   ;;  %s8341_s24 = sld [smem:[#allocation46_spill]] }
  0xd2   :  { %5569 = vmatpush3.bf16.msra.mxu1 %v5568_v5  ;;  %v5574_v16 = vpack.c.bf16 %v368_v15, %v367_v14  ;;  %v369_v17 = vld [vmem:[%s8254_s8 + $0x20] sm:$0xff]  ;;  %v370_v18 = vld [vmem:[%s8254_s8 + $0x28] sm:$0xff]  ;;  %v371_v20 = vld [vmem:[%s8254_s8 + $0x30] sm:$0xff] }
  0xd3   :  { %8308 = vst [vmem:[#allocation24_spill] sm:$0xff] %v6340_v9  ;;  %5566 = vmatpush3.bf16.msra.mxu0 %v6340_v9  ;;  %5582 = vmatprep.subr.bf16.mxu1 %v6079_v0  ;;  %v5577_v19 = vpack.c.bf16 %v370_v18, %v369_v17  ;;  %v372_v21 = vld [vmem:[%s8254_s8 + $0x38] sm:$0xff]  ;;  %v455_v23 = vld [vmem:[#allocation12] sm:$0xff]  ;;  %v4522_v27 = vld [vmem:[#allocation7] ss:$0 sm:$0xff] }
  0xd4   :  { %5570 = vmatprep.subr.bf16.mxu0 %v6079_v0  ;;  %v5580_v22 = vpack.c.bf16 %v372_v21, %v371_v20  ;;  %v456_v24 = vld [vmem:[#allocation12 + $0x8] sm:$0xff]  ;;  %v4524_v30 = vld [vmem:[#allocation9] ss:$0 sm:$0xff]  ;;  %v457_v37 = vld [vmem:[#allocation12 + $0x10] sm:$0xff] }
  0xd5   :  { %v194_v6 = vld [vmem:[%s8307_s6] sm:$0xff]  ;;  %5130 = vmatmul.mubr.msk.f32.vlgmr.msra.gmra.mrb[0].mxu1 %vm197_vm1, %v193_v12  ;;  %v5583_v25 = vpack.c.bf16 %v456_v24, %v455_v23  ;;  %v4525_v40 = vld [vmem:[#allocation10] ss:$0 sm:$0xff]  ;;  %v554_v41 = vld [vmem:[#allocation15] sm:$0xff]  ;;  %s6083_s6 = smov 16  }
  0xd6   :  { %276 = vperm.xlu0 %5628, %v194_v6   ;;  %5123 = vmatmul.mubr.msk.f32.vlgmr.msra.gmra.mrb[0].mxu0 %vm197_vm1, %v193_v12  ;;  %v458_v38 = vld [vmem:[#allocation12 + $0x18] sm:$0xff]  ;;  %v555_v42 = vld [vmem:[#allocation15 + $0x8] sm:$0xff] }
  0xd7   :  { %5159 = vmatprep.mubr.msk.f32.mxu1 %vm6080_vm0, %v6081_v1  ;;  %5572 = vmatpush3.bf16.msra.mxu0 %v5571_v13  ;;  %v5586_v39 = vpack.c.bf16 %v458_v38, %v457_v37  ;;  %v5589_v46 = vpack.c.bf16 %v555_v42, %v554_v41  ;;  %v661_v48 = vld [vmem:[%s8310_s30] sm:$0xff]  ;;  %v1178_v59 = vld [vmem:[%s8311_s1 + $0x10] sm:$0xff]  ;;  %v1179_v3 = vld [vmem:[%s8311_s1 + $0x18] sm:$0xff] }
  0xd8   :  { %5148 = vmatprep.mubr.msk.f32.mxu0 %vm6080_vm0, %v6081_v1  ;;  %5573 = vmatprep.subr.bf16.mxu0 %v6079_v0  ;;  %v4530_v50 = vld [vmem:[%s8260_s14] ss:$0 sm:$0xff]  ;;  %v1182_v61 = vld [vmem:[%s8311_s1 + $0x30] sm:$0xff]  ;;  %v1181_v6 = vld [vmem:[%s8311_s1 + $0x28] sm:$0xff] }
  0xd9   :  { %5584 = vmatpush3.bf16.msra.mxu1 %v5583_v25  ;;  %v4532_v54 = vld [vmem:[%s8261_s15] ss:$0 sm:$0xff]  ;;  %v1186_v4 = vld [vmem:[%s8311_s1 + $0x50] sm:$0xff]  ;;  %v1183_v8 = vld [vmem:[%s8311_s1 + $0x38] sm:$0xff] }
  0xda   :  { %5585 = vmatprep.subr.bf16.mxu1 %v6079_v0  ;;  %v685_v58 = vld [vmem:[%s8310_s30 + $0xc0] sm:$0xff]  ;;  %v1190_v10 = vld [vmem:[%s8311_s1 + $0x70] sm:$0xff]  ;;  %v1185_v11 = vld [vmem:[%s8311_s1 + $0x48] sm:$0xff] }
  0xdb   :  { %5575 = vmatpush3.bf16.msra.mxu0 %v5574_v16  ;;  %v1180_v60 = vld [vmem:[%s8311_s1 + $0x20] sm:$0xff]  ;;  %v1187_v13 = vld [vmem:[%s8311_s1 + $0x58] sm:$0xff]  ;;  %v1194_v15 = vld [vmem:[%s8311_s1 + $0x90] sm:$0xff] }
  0xdc   :  { %5576 = vmatprep.subr.bf16.mxu0 %v6079_v0  ;;  %v1176_v62 = vld [vmem:[%s8311_s1] sm:$0xff]  ;;  %v1189_v17 = vld [vmem:[%s8311_s1 + $0x68] sm:$0xff]  ;;  %v1198_v20 = vld [vmem:[%s8311_s1 + $0xb0] sm:$0xff] }
  0xdd   :  { %5587 = vmatpush3.bf16.msra.mxu1 %v5586_v39  ;;  %1276 = vrot.lane.b32.xlu1 %v1176_v62, %s6069_s23  ;;  %v4527_v63 = vld [vmem:[%s8257_s11] ss:$0 sm:$0xff]  ;;  %v1193_v21 = vld [vmem:[%s8311_s1 + $0x88] sm:$0xff]  ;;  %v1195_v23 = vld [vmem:[%s8311_s1 + $0x98] sm:$0xff]  ;;  %s8340_s11 = sld [smem:[#allocation45_spill]] }
  0xde   :  { %5588 = vmatprep.subr.bf16.mxu1 %v6079_v0  ;;  %v1188_v7 = vld [vmem:[%s8311_s1 + $0x60] sm:$0xff]  ;;  %v1202_v24 = vld [vmem:[%s8311_s1 + $0xd0] sm:$0xff]  ;;  %v1205_v37 = vld [vmem:[%s8311_s1 + $0xe8] sm:$0xff] }
  0xdf   :  { %5578 = vmatpush3.bf16.msra.mxu0 %v5577_v19  ;;  %v1196_v18 = vld [vmem:[%s8311_s1 + $0xa0] sm:$0xff]  ;;  %v1191_v19 = vld [vmem:[%s8311_s1 + $0x78] sm:$0xff]  ;;  %v1209_v38 = vld [vmem:[%s8311_s1 + $0x108] sm:$0xff] }
  0xe0   :  { %5579 = vmatprep.subr.bf16.mxu0 %v6079_v0  ;;  %v1177_v0 = vld [vmem:[%s8311_s1 + $0x8] sm:$0xff]  ;;  %v1214_v62 = vld [vmem:[%s8311_s1 + $0x130] sm:$0xff] }
  0xe1   :  { %1278 = vrot.lane.b32.xlu1 %v1177_v0, %s6069_s23  ;;  %v692_v0 = vld [vmem:[%s8310_s30 + $0xf8] sm:$0xff] }
  0xe3   :  { %5581 = vmatpush3.bf16.msra.mxu0 %v5580_v22  ;;  %v1200_v22 = vld [vmem:[%s8311_s1 + $0xc0] sm:$0xff] }
  0xe5   :  { %1282 = vrot.lane.b32.xlu1 %v1179_v3, %s6069_s23  ;;  %v693_v3 = vld [vmem:[%s8310_s30 + $0x100] sm:$0xff] }
  0xe9   :  { %1286 = vrot.lane.b32.xlu1 %v1181_v6, %s6069_s23  ;;  %v694_v6 = vld [vmem:[%s8310_s30 + $0x108] sm:$0xff] }
  0xed   :  { %1290 = vrot.lane.b32.xlu1 %v1183_v8, %s6069_s23  ;;  %v695_v8 = vld [vmem:[%s8310_s30 + $0x110] sm:$0xff] }
  0xf1   :  { %1294 = vrot.lane.b32.xlu1 %v1185_v11, %s6069_s23  ;;  %v672_v11 = vld [vmem:[%s8310_s30 + $0x58] sm:$0xff] }
  0xf5   :  { %1298 = vrot.lane.b32.xlu1 %v1187_v13, %s6069_s23  ;;  %v673_v13 = vld [vmem:[%s8310_s30 + $0x60] sm:$0xff] }
  0xf9   :  { %1302 = vrot.lane.b32.xlu1 %v1189_v17, %s6069_s23  ;;  %v698_v17 = vld [vmem:[%s8310_s30 + $0x128] sm:$0xff] }
  0xfd   :  { %1306 = vrot.lane.b32.xlu1 %v1191_v19, %s6069_s23  ;;  %v699_v19 = vld [vmem:[%s8310_s30 + $0x130] sm:$0xff] }
 0x101   :  { %1310 = vrot.lane.b32.xlu1 %v1193_v21, %s6069_s23  ;;  %v676_v21 = vld [vmem:[%s8310_s30 + $0x78] sm:$0xff] }
 0x105   :  { %1314 = vrot.lane.b32.xlu1 %v1195_v23, %s6069_s23  ;;  %v677_v23 = vld [vmem:[%s8310_s30 + $0x80] sm:$0xff] }
 0x155   :  { %v277_v26 = vpop.permute.xlu0 %276 }
 0x156   :  { %v285_v28 = vmul.f32 %v4522_v27, %v277_v26  ;;  %v563_v52 = vmul.f32 %v4530_v50, %v277_v26  ;;  %v1197_v26 = vld [vmem:[%s8311_s1 + $0xa8] sm:$0xff]  ;;  %v663_v50 = vld [vmem:[%s8310_s30 + $0x10] sm:$0xff] }
 0x157   :  { %1318 = vrot.lane.b32.xlu1 %v1197_v26, %s6069_s23  ;;  %v678_v26 = vld [vmem:[%s8310_s30 + $0x88] sm:$0xff] }
 0x1a8   :  { %v352_v29 = vpop.f32.mrb[0].mxu1 }
 0x1a9   :  { %v353_v31 = vadd.f32 %v352_v29, %v285_v28  ;;  %v5131_v32 = vpop.f32.mrb[1].mxu1  ;;  %v6379_v33 = vpop.f32.mrb[0].mxu0  ;;  %v1204_v28 = vld [vmem:[%s8311_s1 + $0xe0] sm:$0xff]  ;;  %v1199_v29 = vld [vmem:[%s8311_s1 + $0xb8] sm:$0xff] }
 0x1aa   :  { %8309 = vst [vmem:[#allocation25_spill] sm:$0xff] %v6379_v33  ;;  %v5124_v34 = vpop.f32.mrb[1].mxu0  ;;  %1322 = vrot.lane.b32.xlu1 %v1199_v29, %s6069_s23  ;;  %v1207_v32 = vld [vmem:[%s8311_s1 + $0xf8] sm:$0xff]  ;;  %v679_v29 = vld [vmem:[%s8310_s30 + $0x90] sm:$0xff] }
 0x1ab   :  { %v363_v35 = vadd.f32 %v4524_v30, %v353_v31  ;;  %v1206_v30 = vld [vmem:[%s8311_s1 + $0xf0] sm:$0xff]  ;;  %v1201_v31 = vld [vmem:[%s8311_s1 + $0xc8] sm:$0xff]  ;;  %v1203_v34 = vld [vmem:[%s8311_s1 + $0xd8] sm:$0xff] }
 0x1ad   :  { %v364_v36 = vmax.f32 %v363_v35, 0.0  ;;  %v1208_v35 = vld [vmem:[%s8311_s1 + $0x100] sm:$0xff] }
 0x1ae   :  { %1326 = vrot.lane.b32.xlu1 %v1201_v31, %s6069_s23  ;;  %v1220_v31 = vld [vmem:[%s8311_s1 + $0x160] sm:$0xff] }
 0x1af   :  { %5149 = vmatmul.mubr.msk.f32.vlgmr.msra.gmra.mrb[2].mxu0 %vm380_vm2, %v364_v36 }
 0x1b0   :  { %5171 = vmatprep.mubr.msk.f32.mxu0 %vm658_vm4, %v661_v48  ;;  %v662_v48 = vld [vmem:[%s8310_s30 + $0x8] sm:$0xff] }
 0x1b2   :  { %1330 = vrot.lane.b32.xlu1 %v1203_v34, %s6069_s23  ;;  %v704_v34 = vld [vmem:[%s8310_s30 + $0x158] sm:$0xff] }
 0x1b6   :  { %1334 = vrot.lane.b32.xlu1 %v1205_v37, %s6069_s23  ;;  %v1221_v37 = vld [vmem:[%s8311_s1 + $0x168] sm:$0xff] }
 0x282   :  { %v450_v43 = vpop.f32.mrb[2].mxu0 }
 0x283   :  { %v451_v44 = vadd.f32 %v4525_v40, %v450_v43  ;;  %v5150_v45 = vpop.f32.mrb[3].mxu0  ;;  %v1210_v40 = vld [vmem:[%s8311_s1 + $0x110] sm:$0xff] }
 0x285   :  { %v454_v47 = vmax.f32 %v451_v44, 0.0  ;;  %v1211_v44 = vld [vmem:[%s8311_s1 + $0x118] sm:$0xff] }
 0x287   :  { %5160 = vmatmul.mubr.msk.f32.vlgmr.msra.gmra.mrb[2].mxu1 %vm466_vm3, %v454_v47 }
 0x288   :  { %5590 = vmatpush3.bf16.msra.mxu1 %v5589_v46  ;;  %5166 = vmatprep.mubr.msk.f32.mxu1 %vm6080_vm0, %v6081_v1  ;;  %v1184_v1 = vld [vmem:[%s8311_s1 + $0x40] sm:$0xff] }
 0x28b   :  { %5167 = vmatmul.mubr.msk.f32.vlgmr.msra.gmra.mrb[4].mxu1 %vm197_vm1, %v193_v12  ;;  %v1192_v12 = vld [vmem:[%s8311_s1 + $0x80] sm:$0xff] }
 0x28c   :  { %5207 = vmatprep.mubr.msk.f32.mxu1 %vm658_vm4, %v685_v58  ;;  %v666_v58 = vld [vmem:[%s8310_s30 + $0x28] sm:$0xff] }
 0x35a   :  { %v536_v49 = vpop.f32.mrb[2].mxu1 }
 0x35b   :  { %v5161_v51 = vpop.f32.mrb[3].mxu1  ;;  %v6426_v2 = vadd.f32 %v4527_v63, %v536_v49  ;;  %v686_v49 = vld [vmem:[%s8310_s30 + $0xc8] sm:$0xff]  ;;  %v668_v63 = vld [vmem:[%s8310_s30 + $0x38] sm:$0xff] }
 0x35c   :  { %v687_v51 = vld [vmem:[%s8310_s30 + $0xd0] sm:$0xff] }
 0x35d   :  { %8312 = vst [vmem:[#allocation26_spill] sm:$0xff] %v6426_v2  ;;  %v4529_v5 = vmul.f32 -1.442695, %v6426_v2 }
 0x35e   :  { %v630_v53 = vpop.f32.mrb[4].mxu1 }
 0x35f   :  { %v631_v55 = vadd.f32 %v630_v53, %v563_v52  ;;  %v5168_v56 = vpop.f32.mrb[5].mxu1  ;;  %5629 = vpow2.f32 %v4529_v5  ;;  %v1212_v52 = vld [vmem:[%s8311_s1 + $0x120] sm:$0xff]  ;;  %v664_v53 = vld [vmem:[%s8310_s30 + $0x18] sm:$0xff]  ;;  %v670_v5 = vld [vmem:[%s8310_s30 + $0x48] sm:$0xff] }
 0x360   :  { %v689_v56 = vld [vmem:[%s8310_s30 + $0xe0] sm:$0xff] }
 0x361   :  { %v641_v57 = vadd.f32 %v4532_v54, %v631_v55  ;;  %v688_v54 = vld [vmem:[%s8310_s30 + $0xd8] sm:$0xff]  ;;  %v665_v55 = vld [vmem:[%s8310_s30 + $0x20] sm:$0xff] }
 0x363   :  { %655 = vrot.lane.b32.xlu0 %v641_v57, %s6083_s6  ;;  %v1213_v57 = vld [vmem:[%s8311_s1 + $0x128] sm:$0xff] }
 0x367   :  { %1280 = vrot.lane.b32.xlu0 %v1178_v59, %s6069_s23  ;;  %v690_v59 = vld [vmem:[%s8310_s30 + $0xe8] sm:$0xff] }
 0x369   :  { %v5630_v14 = vpop.eup %5629 }
 0x36a   :  { %v543_v16 = vadd.f32 1.0, %v5630_v14  ;;  %v697_v14 = vld [vmem:[%s8310_s30 + $0x120] sm:$0xff] }
 0x36b   :  { %1284 = vrot.lane.b32.xlu0 %v1180_v60, %s6069_s23  ;;  %v667_v60 = vld [vmem:[%s8310_s30 + $0x30] sm:$0xff] }
 0x36c   :  { %5631 = vrcp.f32 %v543_v16  ;;  %v674_v16 = vld [vmem:[%s8310_s30 + $0x68] sm:$0xff] }
 0x36f   :  { %1288 = vrot.lane.b32.xlu0 %v1182_v61, %s6069_s23  ;;  %v691_v61 = vld [vmem:[%s8310_s30 + $0xf0] sm:$0xff] }
 0x373   :  { %1292 = vrot.lane.b32.xlu0 %v1184_v1, %s6069_s23  ;;  %v669_v1 = vld [vmem:[%s8310_s30 + $0x40] sm:$0xff] }
 0x376   :  { %v5632_v25 = vpop.eup %5631 }
 0x377   :  { %1296 = vrot.lane.b32.xlu0 %v1186_v4, %s6069_s23  ;;  %v6506_v27 = vadd.f32 0.5, %v5632_v25  ;;  %v1215_v4 = vld [vmem:[%s8311_s1 + $0x138] sm:$0xff] }
 0x378   :  { %v1219_v25 = vld [vmem:[%s8311_s1 + $0x158] sm:$0xff] }
 0x379   :  { %8313 = vst [vmem:[#allocation27_spill] sm:$0xff] %v6506_v27  ;;  %5633 = vrsqrt.f32 %v6506_v27  ;;  %vm549_vm5 = vcmp.eq.f32.partialorder %v6506_v27, inf  ;;  %v552_v42 = vand.u32 2147483648, %v6506_v27  ;;  %vm551_vm6 = vcmp.eq.f32.partialorder %v6506_v27, 0.0 }
 0x37b   :  { %1300 = vrot.lane.b32.xlu0 %v1188_v7, %s6069_s23  ;;  %v671_v7 = vld [vmem:[%s8310_s30 + $0x50] sm:$0xff] }
 0x37f   :  { %1304 = vrot.lane.b32.xlu0 %v1190_v10, %s6069_s23  ;;  %v1216_v10 = vld [vmem:[%s8311_s1 + $0x140] sm:$0xff] }
 0x383   :  { %1308 = vrot.lane.b32.xlu0 %v1192_v12, %s6069_s23  ;;  %v5634_v36 = vpop.eup %5633  ;;  %v696_v12 = vld [vmem:[%s8310_s30 + $0x118] sm:$0xff] }
 0x384   :  { %v548_v39 = vmul.f32 %v5634_v36, %v6506_v27  ;;  %v705_v36 = vld [vmem:[%s8310_s30 + $0x160] sm:$0xff] }
 0x386   :  { %v550_v41 = vsel %vm549_vm5, %v6506_v27, %v548_v39  ;;  %v706_v39 = vld [vmem:[%s8310_s30 + $0x168] sm:$0xff] }
 0x387   :  { %1312 = vrot.lane.b32.xlu0 %v1194_v15, %s6069_s23  ;;  %v553_v43 = vsel %vm551_vm6, %v552_v42, %v550_v41  ;;  %v1217_v15 = vld [vmem:[%s8311_s1 + $0x148] sm:$0xff]  ;;  %v707_v41 = vld [vmem:[%s8310_s30 + $0x170] sm:$0xff] }
 0x388   :  { %v659_v45 = vsel %vm658_vm4, %v6426_v2, %v553_v43  ;;  %v1222_v42 = vld [vmem:[%s8311_s1 + $0x170] sm:$0xff]  ;;  %v684_v43 = vld [vmem:[%s8310_s30 + $0xb8] sm:$0xff] }
 0x38b   :  { %1316 = vrot.lane.b32.xlu0 %v1196_v18, %s6069_s23  ;;  %v675_v18 = vld [vmem:[%s8310_s30 + $0x70] sm:$0xff] }
 0x38f   :  { %1320 = vrot.lane.b32.xlu0 %v1198_v20, %s6069_s23  ;;  %v1218_v20 = vld [vmem:[%s8311_s1 + $0x150] sm:$0xff] }
 0x393   :  { %1324 = vrot.lane.b32.xlu0 %v1200_v22, %s6069_s23  ;;  %v700_v22 = vld [vmem:[%s8310_s30 + $0x138] sm:$0xff] }
 0x397   :  { %1328 = vrot.lane.b32.xlu0 %v1202_v24, %s6069_s23  ;;  %v701_v24 = vld [vmem:[%s8310_s30 + $0x140] sm:$0xff] }
 0x39b   :  { %1332 = vrot.lane.b32.xlu0 %v1204_v28, %s6069_s23  ;;  %v702_v28 = vld [vmem:[%s8310_s30 + $0x148] sm:$0xff] }
 0x39f   :  { %1336 = vrot.lane.b32.xlu0 %v1206_v30, %s6069_s23  ;;  %v703_v30 = vld [vmem:[%s8310_s30 + $0x150] sm:$0xff] }
 0x3a3   :  { %1338 = vrot.lane.b32.xlu0 %v1207_v32, %s6069_s23  ;;  %v680_v32 = vld [vmem:[%s8310_s30 + $0x98] sm:$0xff] }
 0x3a7   :  { %1340 = vrot.lane.b32.xlu0 %v1208_v35, %s6069_s23  ;;  %v681_v35 = vld [vmem:[%s8310_s30 + $0xa0] sm:$0xff] }
 0x3ab   :  { %1342 = vrot.lane.b32.xlu0 %v1209_v38, %s6069_s23  ;;  %v682_v38 = vld [vmem:[%s8310_s30 + $0xa8] sm:$0xff] }
 0x3af   :  { %1344 = vrot.lane.b32.xlu0 %v1210_v40, %s6069_s23  ;;  %v683_v40 = vld [vmem:[%s8310_s30 + $0xb0] sm:$0xff] }
 0x3b3   :  { %1346 = vrot.lane.b32.xlu0 %v1211_v44, %s6069_s23  ;;  %v708_v44 = vld [vmem:[%s8310_s30 + $0x178] sm:$0xff] }
 0x3b7   :  { %1348 = vrot.lane.b32.xlu0 %v1212_v52, %s6069_s23 }
 0x3bb   :  { %1350 = vrot.lane.b32.xlu0 %v1213_v57, %s6069_s23 }
 0x3bf   :  { %1352 = vrot.lane.b32.xlu0 %v1214_v62, %s6069_s23 }
 0x3c3   :  { %1354 = vrot.lane.b32.xlu0 %v1215_v4, %s6069_s23 }
 0x3c7   :  { %1356 = vrot.lane.b32.xlu0 %v1216_v10, %s6069_s23 }
 0x3cb   :  { %1358 = vrot.lane.b32.xlu0 %v1217_v15, %s6069_s23 }
 0x3cf   :  { %1360 = vrot.lane.b32.xlu0 %v1218_v20, %s6069_s23 }
 0x3d3   :  { %1362 = vrot.lane.b32.xlu0 %v1219_v25, %s6069_s23 }
 0x3d5   :  { %v656_v46 = vpop.permute.xlu0 %655 }
 0x3d6   :  { %v660_v47 = vsel %vm197_vm1, %v659_v45, %v656_v46  ;;  %v709_v45 = vld [vmem:[%s8310_s30 + $0x180] sm:$0xff]  ;;  %v1223_v46 = vld [vmem:[%s8311_s1 + $0x178] sm:$0xff] }
 0x3d7   :  { %5169 = vmatprep.subr.mxu0 %v660_v47  ;;  %5607 = vmatprep.subr.mxu1 %v660_v47 }
 0x3d8   :  { %5170 = vmatpush3.msra.mxu0 %v660_v47  ;;  %5608 = vmatpush3.msra.mxu1 %v660_v47  ;;  %v710_v47 = vld [vmem:[%s8310_s30 + $0x188] sm:$0xff]  ;;  %s6085_s30 = smov 112  }
 0x3d9   :  { %5172 = vmatmul.mubr.msk.f32.vlgmr.msra.gmra.mrb[4].mxu0 %vm658_vm4, %v662_v48  ;;  %5208 = vmatmul.mubr.msk.f32.vlgmr.msra.gmra.mrb[6].mxu1 %vm658_vm4, %v686_v49  ;;  %v1224_v48 = vld [vmem:[%s8311_s1 + $0x180] sm:$0xff]  ;;  %v1281_v49 = vpop.permute.xlu0 %1280 }
 0x3da   :  { %5174 = vmatprep.mubr.msk.f32.mxu0 %vm658_vm4, %v663_v50  ;;  %5210 = vmatprep.mubr.msk.f32.mxu1 %vm658_vm4, %v687_v51  ;;  %v1225_v50 = vld [vmem:[%s8311_s1 + $0x188] sm:$0xff] }
 0x3db   :  { %1364 = vrot.lane.b32.xlu0 %v1220_v31, %s6069_s23 }
 0x3dd   :  { %5175 = vmatmul.mubr.msk.f32.gmra.mrb[6].mxu0 %vm658_vm4, %v664_v53  ;;  %5211 = vmatmul.mubr.msk.f32.gmra.mrb[8].mxu1 %vm658_vm4, %v688_v54  ;;  %v1285_v51 = vpop.permute.xlu0 %1284 }
 0x3de   :  { %5177 = vmatprep.mubr.msk.f32.mxu0 %vm658_vm4, %v665_v55  ;;  %5213 = vmatprep.mubr.msk.f32.mxu1 %vm658_vm4, %v689_v56 }
 0x3df   :  { %1366 = vrot.lane.b32.xlu0 %v1221_v37, %s6069_s23 }
 0x3e1   :  { %5178 = vmatmul.mubr.msk.f32.gmra.mrb[8].mxu0 %vm658_vm4, %v666_v58  ;;  %5214 = vmatmul.mubr.msk.f32.gmra.mrb[10].mxu1 %vm658_vm4, %v690_v59  ;;  %v6810_v52 = vpop.permute.xlu0 %1288 }
 0x3e2   :  { %5180 = vmatprep.mubr.msk.f32.mxu0 %vm658_vm4, %v667_v60  ;;  %5216 = vmatprep.mubr.msk.f32.mxu1 %vm658_vm4, %v691_v61 }
 0x3e3   :  { %1368 = vrot.lane.b32.xlu0 %v1222_v42, %s6069_s23 }
 0x3e5   :  { %5181 = vmatmul.mubr.msk.f32.gmra.mrb[10].mxu0 %vm658_vm4, %v668_v63  ;;  %5217 = vmatmul.mubr.msk.f32.gmra.mrb[12].mxu1 %vm658_vm4, %v692_v0  ;;  %v6812_v53 = vpop.permute.xlu0 %1292 }
 0x3e6   :  { %5183 = vmatprep.mubr.msk.f32.mxu0 %vm658_vm4, %v669_v1  ;;  %5219 = vmatprep.mubr.msk.f32.mxu1 %vm658_vm4, %v693_v3  ;;  %v1726_v3 = vld [vmem:[#allocation13] sm:$0xff] }
 0x3e7   :  { %1370 = vrot.lane.b32.xlu0 %v1223_v46, %s6069_s23  ;;  %5246 = vmatprep.subr.mxu0 %v1726_v3 }
 0x3e8   :  { %5247 = vmatpush3.msra.mxu0 %v1726_v3 }
 0x3e9   :  { %5184 = vmatmul.mubr.msk.f32.gmra.mrb[12].mxu0 %vm658_vm4, %v670_v5  ;;  %5220 = vmatmul.mubr.msk.f32.gmra.mrb[14].mxu1 %vm658_vm4, %v694_v6  ;;  %v6814_v54 = vpop.permute.xlu0 %1296  ;;  %v1277_v6 = vpop.permute.xlu1 %1276 }
 0x3ea   :  { %5186 = vmatprep.mubr.msk.f32.mxu0 %vm658_vm4, %v671_v7  ;;  %5222 = vmatprep.mubr.msk.f32.mxu1 %vm658_vm4, %v695_v8 }
 0x3eb   :  { %1372 = vrot.lane.b32.xlu0 %v1224_v48, %s6069_s23 }
 0x3ed   :  { %5187 = vmatmul.mubr.msk.f32.gmra.mrb[14].mxu0 %vm658_vm4, %v672_v11  ;;  %5223 = vmatmul.mubr.msk.f32.gmra.mrb[16].mxu1 %vm658_vm4, %v696_v12  ;;  %v6816_v55 = vpop.permute.xlu0 %1300  ;;  %v1279_v8 = vpop.permute.xlu1 %1278 }
 0x3ee   :  { %5189 = vmatprep.mubr.msk.f32.mxu0 %vm658_vm4, %v673_v13  ;;  %5225 = vmatprep.mubr.msk.f32.mxu1 %vm658_vm4, %v697_v14 }
 0x3ef   :  { %1374 = vrot.lane.b32.xlu0 %v1225_v50, %s6069_s23  ;;  %s6084_s23 = smov 120  }
 0x3f1   :  { %5190 = vmatmul.mubr.msk.f32.gmra.mrb[16].mxu0 %vm658_vm4, %v674_v16  ;;  %5226 = vmatmul.mubr.msk.f32.gmra.mrb[18].mxu1 %vm658_vm4, %v698_v17  ;;  %v6818_v56 = vpop.permute.xlu0 %1304  ;;  %v1283_v15 = vpop.permute.xlu1 %1282 }
 0x3f2   :  { %5192 = vmatprep.mubr.msk.f32.mxu0 %vm658_vm4, %v675_v18  ;;  %5228 = vmatprep.mubr.msk.f32.mxu1 %vm658_vm4, %v699_v19 }
 0x3f5   :  { %5193 = vmatmul.mubr.msk.f32.gmra.mrb[18].mxu0 %vm658_vm4, %v676_v21  ;;  %5229 = vmatmul.mubr.msk.f32.gmra.mrb[20].mxu1 %vm658_vm4, %v700_v22  ;;  %v6820_v57 = vpop.permute.xlu0 %1308 }
 0x3f6   :  { %5195 = vmatprep.mubr.msk.f32.mxu0 %vm658_vm4, %v677_v23  ;;  %5231 = vmatprep.mubr.msk.f32.mxu1 %vm658_vm4, %v701_v24 }
 0x3f9   :  { %5196 = vmatmul.mubr.msk.f32.gmra.mrb[20].mxu0 %vm658_vm4, %v678_v26  ;;  %5232 = vmatmul.mubr.msk.f32.gmra.mrb[22].mxu1 %vm658_vm4, %v702_v28  ;;  %v6822_v58 = vpop.permute.xlu0 %1312  ;;  %v1287_v28 = vpop.permute.xlu1 %1286 }
 0x3fa   :  { %5198 = vmatprep.mubr.msk.f32.mxu0 %vm658_vm4, %v679_v29  ;;  %5234 = vmatprep.mubr.msk.f32.mxu1 %vm658_vm4, %v703_v30 }
 0x3fd   :  { %5199 = vmatmul.mubr.msk.f32.gmra.mrb[22].mxu0 %vm658_vm4, %v680_v32  ;;  %5235 = vmatmul.mubr.msk.f32.gmra.mrb[24].mxu1 %vm658_vm4, %v704_v34  ;;  %v6824_v59 = vpop.permute.xlu0 %1316 }
 0x3fe   :  { %5201 = vmatprep.mubr.msk.f32.mxu0 %vm658_vm4, %v681_v35  ;;  %5237 = vmatprep.mubr.msk.f32.mxu1 %vm658_vm4, %v705_v36 }
 0x401   :  { %5202 = vmatmul.mubr.msk.f32.gmra.mrb[24].mxu0 %vm658_vm4, %v682_v38  ;;  %5238 = vmatmul.mubr.msk.f32.gmra.mrb[26].mxu1 %vm658_vm4, %v706_v39  ;;  %v6826_v60 = vpop.permute.xlu0 %1320 }
 0x402   :  { %5204 = vmatprep.mubr.msk.f32.mxu0 %vm658_vm4, %v683_v40  ;;  %5240 = vmatprep.mubr.msk.f32.mxu1 %vm658_vm4, %v707_v41  ;;  %v1291_v41 = vpop.permute.xlu1 %1290 }
 0x405   :  { %5205 = vmatmul.mubr.msk.f32.gmra.mrb[26].mxu0 %vm658_vm4, %v684_v43  ;;  %5241 = vmatmul.mubr.msk.f32.gmra.mrb[28].mxu1 %vm658_vm4, %v708_v44  ;;  %v6828_v61 = vpop.permute.xlu0 %1324 }
 0x406   :  { %5243 = vmatprep.mubr.msk.f32.mxu1 %vm658_vm4, %v709_v45 }
 0x409   :  { %5244 = vmatmul.mubr.msk.f32.gmra.mrb[30].mxu1 %vm658_vm4, %v710_v47  ;;  %v6830_v62 = vpop.permute.xlu0 %1328 }
 0x40d   :  { %v6832_v63 = vpop.permute.xlu0 %1332 }
 0x411   :  { %v6834_v0 = vpop.permute.xlu0 %1336 }
 0x415   :  { %v6836_v1 = vpop.permute.xlu0 %1338 }
 0x419   :  { %v6838_v4 = vpop.permute.xlu0 %1340 }
 0x41d   :  { %v6840_v5 = vpop.permute.xlu0 %1342 }
 0x421   :  { %v6842_v7 = vpop.permute.xlu0 %1344 }
 0x425   :  { %v6854_v16 = vpop.permute.xlu0 %1346 }
 0x429   :  { %v6876_v29 = vpop.permute.xlu0 %1348 }
 0x42d   :  { %v6898_v42 = vpop.permute.xlu0 %1350 }
 0x4ac   :  { %v6844_v10 = vpop.f32.mrb[4].mxu0  ;;  %v6846_v11 = vpop.f32.mrb[6].mxu1 }
 0x4ad   :  { %8314 = vst [vmem:[#allocation28_spill] sm:$0xff] %v6844_v10  ;;  %v1427_v12 = vmul.f32 %v6844_v10, %v1279_v8  ;;  %v6849_v13 = vpop.f32.mrb[5].mxu0  ;;  %v6851_v14 = vpop.f32.mrb[7].mxu1 }
 0x4ae   :  { %v1426_v19 = vmul.f32 %v1277_v6, %v6849_v13  ;;  %v1295_v8 = vpop.permute.xlu1 %1294 }
 0x4af   :  { %1528 = vrot.lane.b32.xlu1 %v1427_v12, %s6084_s23 }
 0x4b0   :  { %v6856_v17 = vpop.f32.mrb[6].mxu0  ;;  %v6858_v18 = vpop.f32.mrb[8].mxu1 }
 0x4b1   :  { %8315 = vst [vmem:[#allocation29_spill] sm:$0xff] %v6856_v17  ;;  %v6861_v20 = vpop.f32.mrb[7].mxu0  ;;  %v6863_v21 = vpop.f32.mrb[9].mxu1  ;;  %v1429_v22 = vmul.f32 %v6856_v17, %v1283_v15 }
 0x4b2   :  { %v1428_v32 = vmul.f32 %v1281_v49, %v6861_v20  ;;  %v1299_v33 = vpop.permute.xlu1 %1298 }
 0x4b3   :  { %1526 = vrot.lane.b32.xlu1 %v1426_v19, %s6084_s23 }
 0x4b4   :  { %v6867_v23 = vpop.f32.mrb[8].mxu0  ;;  %v6869_v24 = vpop.f32.mrb[10].mxu1 }
 0x4b5   :  { %8316 = vst [vmem:[#allocation30_spill] sm:$0xff] %v6867_v23  ;;  %v6871_v25 = vpop.f32.mrb[9].mxu0  ;;  %v6873_v26 = vpop.f32.mrb[11].mxu1  ;;  %v1431_v36 = vmul.f32 %v6867_v23, %v1287_v28 }
 0x4b6   :  { %v1430_v45 = vmul.f32 %v1285_v51, %v6871_v25  ;;  %v6920_v51 = vpop.permute.xlu0 %1352 }
 0x4b7   :  { %1532 = vrot.lane.b32.xlu1 %v1429_v22, %s6084_s23 }
 0x4b8   :  { %v6878_v30 = vpop.f32.mrb[10].mxu0  ;;  %v6880_v31 = vpop.f32.mrb[12].mxu1 }
 0x4b9   :  { %8317 = vst [vmem:[#allocation31_spill] sm:$0xff] %v6878_v30  ;;  %v6883_v34 = vpop.f32.mrb[11].mxu0  ;;  %v6885_v35 = vpop.f32.mrb[13].mxu1  ;;  %v1433_v48 = vmul.f32 %v6878_v30, %v1291_v41 }
 0x4ba   :  { %v1432_v19 = vmul.f32 %v6810_v52, %v6883_v34  ;;  %v6943_v52 = vpop.permute.xlu0 %1354 }
 0x4bb   :  { %1530 = vrot.lane.b32.xlu1 %v1428_v32, %s6084_s23 }
 0x4bc   :  { %v6889_v37 = vpop.f32.mrb[12].mxu0  ;;  %v6891_v38 = vpop.f32.mrb[14].mxu1 }
 0x4bd   :  { %8318 = vst [vmem:[#allocation32_spill] sm:$0xff] %v6889_v37  ;;  %v6893_v39 = vpop.f32.mrb[13].mxu0  ;;  %v6895_v40 = vpop.f32.mrb[15].mxu1  ;;  %v1435_v32 = vmul.f32 %v6889_v37, %v1295_v8 }
 0x4be   :  { %v1434_v8 = vmul.f32 %v6812_v53, %v6893_v39  ;;  %v1303_v53 = vpop.permute.xlu1 %1302  ;;  %v1357_v10 = vpop.permute.xlu0 %1356 }
 0x4bf   :  { %1536 = vrot.lane.b32.xlu1 %v1431_v36, %s6084_s23 }
 0x4c0   :  { %v6900_v43 = vpop.f32.mrb[14].mxu0  ;;  %v6902_v44 = vpop.f32.mrb[16].mxu1 }
 0x4c1   :  { %8319 = vst [vmem:[#allocation33_spill] sm:$0xff] %v6900_v43  ;;  %v6905_v46 = vpop.f32.mrb[15].mxu0  ;;  %v6907_v47 = vpop.f32.mrb[17].mxu1  ;;  %v1437_v37 = vmul.f32 %v6900_v43, %v1299_v33 }
 0x4c2   :  { %v1436_v43 = vmul.f32 %v6814_v54, %v6905_v46  ;;  %v6991_v54 = vpop.permute.xlu0 %1358 }
 0x4c3   :  { %1534 = vrot.lane.b32.xlu1 %v1430_v45, %s6084_s23 }
 0x4c4   :  { %v6911_v49 = vpop.f32.mrb[16].mxu0  ;;  %v6913_v50 = vpop.f32.mrb[18].mxu1 }
 0x4c5   :  { %v6915_v3 = vpop.f32.mrb[17].mxu0  ;;  %v6917_v6 = vpop.f32.mrb[19].mxu1 }
 0x4c7   :  { %1540 = vrot.lane.b32.xlu1 %v1433_v48, %s6084_s23 }
 0x4c8   :  { %v6922_v12 = vpop.f32.mrb[18].mxu0  ;;  %v6924_v15 = vpop.f32.mrb[20].mxu1 }
 0x4c9   :  { %v6928_v22 = vpop.f32.mrb[19].mxu0  ;;  %v6930_v28 = vpop.f32.mrb[21].mxu1 }
 0x4cb   :  { %1538 = vrot.lane.b32.xlu1 %v1432_v19, %s6084_s23 }
 0x4cc   :  { %v6934_v36 = vpop.f32.mrb[20].mxu0  ;;  %v6936_v41 = vpop.f32.mrb[22].mxu1 }
 0x4cd   :  { %8320 = vst [vmem:[#allocation34_spill] sm:$0xff] %v6936_v41  ;;  %v6938_v45 = vpop.f32.mrb[21].mxu0  ;;  %v6940_v48 = vpop.f32.mrb[23].mxu1 }
 0x4cf   :  { %1544 = vrot.lane.b32.xlu1 %v1435_v32, %s6084_s23 }
 0x4d0   :  { %v6945_v27 = vpop.f32.mrb[22].mxu0  ;;  %v6947_v2 = vpop.f32.mrb[24].mxu1 }
 0x4d1   :  { %8321 = vst [vmem:[#allocation35_spill] sm:$0xff] %v6947_v2  ;;  %v6951_v19 = vpop.f32.mrb[23].mxu0  ;;  %v6953_v9 = vpop.f32.mrb[25].mxu1 }
 0x4d3   :  { %1542 = vrot.lane.b32.xlu1 %v1434_v8, %s6084_s23 }
 0x4d4   :  { %v6957_v30 = vpop.f32.mrb[24].mxu0  ;;  %v6959_v32 = vpop.f32.mrb[26].mxu1 }
 0x4d5   :  { %8322 = vst [vmem:[#allocation36_spill] sm:$0xff] %v6959_v32  ;;  %v6961_v23 = vpop.f32.mrb[25].mxu0  ;;  %v6963_v17 = vpop.f32.mrb[27].mxu1 }
 0x4d6   :  { %8323 = vst [vmem:[#allocation37_spill] sm:$0xff] %v6961_v23  ;;  %v1446_v2 = vmul.f32 %v6824_v59, %v6961_v23 }
 0x4d7   :  { %1548 = vrot.lane.b32.xlu1 %v1437_v37, %s6084_s23  ;;  %v1439_v37 = vmul.f32 %v6911_v49, %v1303_v53  ;;  %v1438_v53 = vmul.f32 %v6816_v55, %v6915_v3  ;;  %v1440_v55 = vmul.f32 %v6818_v56, %v6928_v22  ;;  %v1442_v56 = vmul.f32 %v6820_v57, %v6938_v45 }
 0x4d8   :  { %1566 = vrot.lane.b32.xlu0 %v1446_v2, %s6084_s23  ;;  %v6969_v8 = vpop.f32.mrb[26].mxu0  ;;  %v6971_v33 = vpop.f32.mrb[28].mxu1  ;;  %v1450_v2 = vmul.f32 %v6828_v61, %v6851_v14  ;;  %v1464_v57 = vmul.f32 %v6920_v51, %v6930_v28 }
 0x4d9   :  { %8324 = vst [vmem:[#allocation38_spill] sm:$0xff] %v6971_v33  ;;  %v6975_v32 = vpop.f32.mrb[27].mxu0  ;;  %v6977_v41 = vpop.f32.mrb[29].mxu1 }
 0x4da   :  { %v1448_v59 = vmul.f32 %v6826_v60, %v6975_v32  ;;  %v1452_v60 = vmul.f32 %v6830_v62, %v6863_v21  ;;  %v1456_v62 = vmul.f32 %v6834_v0, %v6885_v35  ;;  %v1460_v0 = vmul.f32 %v6842_v7, %v6907_v47 }
 0x4db   :  { %1546 = vrot.lane.b32.xlu1 %v1436_v43, %s6084_s23  ;;  %v1307_v43 = vpop.permute.xlu1 %1306 }
 0x4dc   :  { %1570 = vrot.lane.b32.xlu0 %v1448_v59, %s6084_s23  ;;  %v6986_v23 = vpop.f32.mrb[30].mxu1  ;;  %v1441_v61 = vmul.f32 %v6922_v12, %v1307_v43  ;;  %v1454_v59 = vmul.f32 %v6832_v63, %v6873_v26  ;;  %v1458_v63 = vmul.f32 %v6838_v4, %v6895_v40  ;;  %v1462_v4 = vmul.f32 %v6876_v29, %v6917_v6 }
 0x4dd   :  { %v6988_v33 = vpop.f32.mrb[31].mxu1  ;;  %v1466_v29 = vmul.f32 %v1357_v10, %v6940_v48 }
 0x4df   :  { %1552 = vrot.lane.b32.xlu1 %v1439_v37, %s6084_s23  ;;  %v1361_v37 = vpop.permute.xlu0 %1360 }
 0x4e0   :  { %1574 = vrot.lane.b32.xlu0 %v1450_v2, %s6084_s23  ;;  %v1311_v2 = vpop.permute.xlu1 %1310 }
 0x4e1   :  { %v1443_v43 = vmul.f32 %v6934_v36, %v1311_v2 }
 0x4e3   :  { %1550 = vrot.lane.b32.xlu1 %v1438_v53, %s6084_s23 }
 0x4e4   :  { %1578 = vrot.lane.b32.xlu0 %v1452_v60, %s6084_s23  ;;  %v7011_v60 = vpop.permute.xlu0 %1362  ;;  %v1315_v53 = vpop.permute.xlu1 %1314 }
 0x4e7   :  { %1556 = vrot.lane.b32.xlu1 %v1441_v61, %s6084_s23 }
 0x4e8   :  { %1582 = vrot.lane.b32.xlu0 %v1454_v59, %s6084_s23  ;;  %v1365_v61 = vpop.permute.xlu0 %1364  ;;  %v1319_v59 = vpop.permute.xlu1 %1318 }
 0x4eb   :  { %1554 = vrot.lane.b32.xlu1 %v1440_v55, %s6084_s23  ;;  %v1445_v55 = vmul.f32 %v6945_v27, %v1315_v53 }
 0x4ec   :  { %1586 = vrot.lane.b32.xlu0 %v1456_v62, %s6084_s23  ;;  %v1444_v62 = vmul.f32 %v6822_v58, %v6951_v19  ;;  %v1367_v2 = vpop.permute.xlu0 %1366  ;;  %v1323_v7 = vpop.permute.xlu1 %1322 }
 0x4ed   :  { %v1449_v51 = vmul.f32 %v6969_v8, %v1323_v7 }
 0x4ef   :  { %1560 = vrot.lane.b32.xlu1 %v1443_v43, %s6084_s23  ;;  %v1447_v43 = vmul.f32 %v6957_v30, %v1319_v59 }
 0x4f0   :  { %1590 = vrot.lane.b32.xlu0 %v1458_v63, %s6084_s23  ;;  %v1369_v58 = vpop.permute.xlu0 %1368  ;;  %v1327_v63 = vpop.permute.xlu1 %1326 }
 0x4f1   :  { %v1451_v59 = vmul.f32 %v6846_v11, %v1327_v63 }
 0x4f3   :  { %1558 = vrot.lane.b32.xlu1 %v1442_v56, %s6084_s23  ;;  %v1470_v56 = vmul.f32 %v1365_v61, %v6963_v17 }
 0x4f4   :  { %1594 = vrot.lane.b32.xlu0 %v1460_v0, %s6084_s23  ;;  %v1468_v0 = vmul.f32 %v1361_v37, %v6953_v9  ;;  %v1371_v53 = vpop.permute.xlu0 %1370  ;;  %v1331_v10 = vpop.permute.xlu1 %1330 }
 0x4f5   :  { %v1453_v37 = vmul.f32 %v6858_v18, %v1331_v10 }
 0x4f7   :  { %1562 = vrot.lane.b32.xlu1 %v1444_v62, %s6084_s23 }
 0x4f8   :  { %1598 = vrot.lane.b32.xlu0 %v1462_v4, %s6084_s23  ;;  %v1472_v4 = vmul.f32 %v1369_v58, %v6977_v41  ;;  %v1373_v62 = vpop.permute.xlu0 %1372 }
 0x4f9   :  { %v1474_v7 = vmul.f32 %v1373_v62, %v6988_v33  ;;  %v8329_v62 = vld [vmem:[#allocation29_spill] sm:$0xff] }
 0x4fb   :  { %1564 = vrot.lane.b32.xlu1 %v1445_v55, %s6084_s23  ;;  %v1457_v55 = vmul.f32 %v6880_v31, %v6836_v1  ;;  %v1463_v1 = vmul.f32 %v6913_v50, %v6898_v42 }
 0x4fc   :  { %1602 = vrot.lane.b32.xlu0 %v1464_v57, %s6084_s23  ;;  %v1335_v57 = vpop.permute.xlu1 %1334 }
 0x4fd   :  { %v1455_v61 = vmul.f32 %v6869_v24, %v1335_v57 }
 0x4ff   :  { %1568 = vrot.lane.b32.xlu1 %v1447_v43, %s6084_s23  ;;  %v1461_v43 = vmul.f32 %v6902_v44, %v6854_v16  ;;  %v8325_v16 = vld [vmem:[#allocation34_spill] sm:$0xff] }
 0x500   :  { %1606 = vrot.lane.b32.xlu0 %v1466_v29, %s6084_s23  ;;  %v1459_v29 = vmul.f32 %v6891_v38, %v6840_v5  ;;  %v1465_v5 = vmul.f32 %v6924_v15, %v6943_v52  ;;  %v1467_v63 = vmul.f32 %v8325_v16, %v6991_v54  ;;  %v8327_v52 = vld [vmem:[#allocation35_spill] sm:$0xff] }
 0x501   :  { %v1469_v10 = vmul.f32 %v8327_v52, %v7011_v60  ;;  %v8330_v60 = vld [vmem:[#allocation38_spill] sm:$0xff] }
 0x503   :  { %1572 = vrot.lane.b32.xlu1 %v1449_v51, %s6084_s23  ;;  %v8326_v51 = vld [vmem:[#allocation28_spill] sm:$0xff] }
 0x504   :  { %1610 = vrot.lane.b32.xlu0 %v1468_v0, %s6084_s23 }
 0x507   :  { %1576 = vrot.lane.b32.xlu1 %v1451_v59, %s6084_s23 }
 0x508   :  { %1614 = vrot.lane.b32.xlu0 %v1470_v56, %s6084_s23 }
 0x50b   :  { %1580 = vrot.lane.b32.xlu1 %v1453_v37, %s6084_s23 }
 0x50c   :  { %1618 = vrot.lane.b32.xlu0 %v1472_v4, %s6084_s23 }
 0x50f   :  { %1584 = vrot.lane.b32.xlu1 %v1455_v61, %s6084_s23 }
 0x510   :  { %1622 = vrot.lane.b32.xlu0 %v1474_v7, %s6084_s23  ;;  %v1473_v7 = vmul.f32 %v8330_v60, %v1371_v53 }
 0x513   :  { %1588 = vrot.lane.b32.xlu1 %v1457_v55, %s6084_s23  ;;  %v1375_v55 = vpop.permute.xlu0 %1374 }
 0x514   :  { %1777 = vrot.lane.b32.xlu0 %v6849_v13, %s6085_s30 }
 0x517   :  { %1592 = vrot.lane.b32.xlu1 %v1459_v29, %s6084_s23 }
 0x518   :  { %1781 = vrot.lane.b32.xlu0 %v6861_v20, %s6085_s30 }
 0x51b   :  { %1596 = vrot.lane.b32.xlu1 %v1461_v43, %s6084_s23  ;;  %v8331_v43 = vld [vmem:[#allocation30_spill] sm:$0xff] }
 0x51c   :  { %1785 = vrot.lane.b32.xlu0 %v6871_v25, %s6085_s30 }
 0x51f   :  { %1600 = vrot.lane.b32.xlu1 %v1463_v1, %s6084_s23 }
 0x520   :  { %1789 = vrot.lane.b32.xlu0 %v6883_v34, %s6085_s30 }
 0x521   :  { %v1529_v58 = vpop.permute.xlu1 %1528 }
 0x522   :  { %v1677_v56 = vadd.f32 %v8326_v51, %v1529_v58 }
 0x523   :  { %1604 = vrot.lane.b32.xlu1 %v1465_v5, %s6084_s23  ;;  %v8332_v5 = vld [vmem:[#allocation37_spill] sm:$0xff] }
 0x524   :  { %1793 = vrot.lane.b32.xlu0 %v6893_v39, %s6085_s30 }
 0x525   :  { %v1527_v0 = vpop.permute.xlu1 %1526 }
 0x526   :  { %v1676_v42 = vadd.f32 %v1527_v0, %v6849_v13  ;;  %v8328_v13 = vld [vmem:[#allocation36_spill] sm:$0xff] }
 0x527   :  { %1608 = vrot.lane.b32.xlu1 %v1467_v63, %s6084_s23  ;;  %v1471_v54 = vmul.f32 %v8328_v13, %v1367_v2  ;;  %v8333_v63 = vld [vmem:[#allocation31_spill] sm:$0xff] }
 0x528   :  { %5248 = vmatprep.mubr.msk.f32.mxu0 %vm658_vm4, %v1676_v42  ;;  %1797 = vrot.lane.b32.xlu0 %v6905_v46, %s6085_s30 }
 0x529   :  { %5249 = vmatmul.mubr.msk.f32.vlgmr.msra.gmra.mrb[28].mxu0 %vm658_vm4, %v1677_v56  ;;  %v1533_v59 = vpop.permute.xlu1 %1532  ;;  %v8334_v56 = vld [vmem:[#allocation32_spill] sm:$0xff] }
 0x52a   :  { %v1679_v57 = vadd.f32 %v8329_v62, %v1533_v59 }
 0x52b   :  { %1612 = vrot.lane.b32.xlu1 %v1469_v10, %s6084_s23 }
 0x52c   :  { %1801 = vrot.lane.b32.xlu0 %v6915_v3, %s6085_s30 }
 0x52d   :  { %v1531_v4 = vpop.permute.xlu1 %1530 }
 0x52e   :  { %v1678_v37 = vadd.f32 %v1531_v4, %v6861_v20  ;;  %v1475_v20 = vmul.f32 %v6986_v23, %v1375_v55 }
 0x52f   :  { %1616 = vrot.lane.b32.xlu1 %v1471_v54, %s6084_s23 }
 0x530   :  { %5251 = vmatprep.mubr.msk.f32.mxu0 %vm658_vm4, %v1678_v37  ;;  %1805 = vrot.lane.b32.xlu0 %v6928_v22, %s6085_s30 }
 0x531   :  { %5252 = vmatmul.mubr.msk.f32.gmra.mrb[30].mxu0 %vm658_vm4, %v1679_v57  ;;  %v1537_v61 = vpop.permute.xlu1 %1536 }
 0x532   :  { %v1681_v1 = vadd.f32 %v8331_v43, %v1537_v61 }
 0x533   :  { %1620 = vrot.lane.b32.xlu1 %v1473_v7, %s6084_s23 }
 0x534   :  { %1809 = vrot.lane.b32.xlu0 %v6938_v45, %s6085_s30 }
 0x535   :  { %v1535_v2 = vpop.permute.xlu1 %1534 }
 0x536   :  { %v1680_v29 = vadd.f32 %v1535_v2, %v6871_v25 }
 0x537   :  { %1624 = vrot.lane.b32.xlu1 %v1475_v20, %s6084_s23 }
 0x538   :  { %5254 = vmatprep.mubr.msk.f32.mxu0 %vm658_vm4, %v1680_v29  ;;  %1813 = vrot.lane.b32.xlu0 %v6951_v19, %s6085_s30 }
 0x539   :  { %5255 = vmatmul.mubr.msk.f32.gmra.mrb[32].mxu0 %vm658_vm4, %v1681_v1  ;;  %v1541_v53 = vpop.permute.xlu1 %1540 }
 0x53a   :  { %v1683_v0 = vadd.f32 %v8333_v63, %v1541_v53 }
 0x53b   :  { %1779 = vrot.lane.b32.xlu1 %v8326_v51, %s6085_s30 }
 0x53c   :  { %1817 = vrot.lane.b32.xlu0 %v8332_v5, %s6085_s30 }
 0x53d   :  { %v1539_v58 = vpop.permute.xlu1 %1538 }
 0x53e   :  { %v1682_v25 = vadd.f32 %v1539_v58, %v6883_v34 }
 0x53f   :  { %1783 = vrot.lane.b32.xlu1 %v8329_v62, %s6085_s30  ;;  %v8335_v62 = vld [vmem:[#allocation33_spill] sm:$0xff] }
 0x540   :  { %5257 = vmatprep.mubr.msk.f32.mxu0 %vm658_vm4, %v1682_v25  ;;  %1821 = vrot.lane.b32.xlu0 %v6975_v32, %s6085_s30 }
 0x541   :  { %5258 = vmatmul.mubr.msk.f32.gmra.mrb[34].mxu0 %vm658_vm4, %v1683_v0  ;;  %v1545_v42 = vpop.permute.xlu1 %1544 }
 0x542   :  { %v1685_v10 = vadd.f32 %v8334_v56, %v1545_v42 }
 0x543   :  { %1787 = vrot.lane.b32.xlu1 %v8331_v43, %s6085_s30 }
 0x544   :  { %1825 = vrot.lane.b32.xlu0 %v6851_v14, %s6085_s30 }
 0x545   :  { %v1543_v34 = vpop.permute.xlu1 %1542 }
 0x546   :  { %v1684_v51 = vadd.f32 %v1543_v34, %v6893_v39 }
 0x547   :  { %1791 = vrot.lane.b32.xlu1 %v8333_v63, %s6085_s30 }
 0x548   :  { %5260 = vmatprep.mubr.msk.f32.mxu0 %vm658_vm4, %v1684_v51  ;;  %1829 = vrot.lane.b32.xlu0 %v6863_v21, %s6085_s30 }
 0x549   :  { %5261 = vmatmul.mubr.msk.f32.gmra.mrb[36].mxu0 %vm658_vm4, %v1685_v10  ;;  %v1549_v59 = vpop.permute.xlu1 %1548 }
 0x54a   :  { %v1567_v54 = vpop.permute.xlu0 %1566  ;;  %v1687_v57 = vadd.f32 %v8335_v62, %v1549_v59  ;;  %v2442_v59 = vld [vmem:[#allocation16] sm:$0xff] }
 0x54b   :  { %1795 = vrot.lane.b32.xlu1 %v8334_v56, %s6085_s30  ;;  %v1696_v10 = vadd.f32 %v1567_v54, %v8332_v5 }
 0x54c   :  { %1833 = vrot.lane.b32.xlu0 %v6873_v26, %s6085_s30 }
 0x54d   :  { %v1547_v39 = vpop.permute.xlu1 %1546 }
 0x54e   :  { %v1686_v4 = vadd.f32 %v1547_v39, %v6905_v46  ;;  %v1571_v37 = vpop.permute.xlu0 %1570  ;;  %v2443_v39 = vld [vmem:[#allocation16 + $0x8] sm:$0xff] }
 0x54f   :  { %1799 = vrot.lane.b32.xlu1 %v8335_v62, %s6085_s30  ;;  %v5591_v62 = vpack.c.bf16 %v2443_v39, %v2442_v59  ;;  %v1698_v5 = vadd.f32 %v1571_v37, %v6975_v32  ;;  %v8336_v37 = vld [vmem:[#allocation24_spill] sm:$0xff] }
 0x550   :  { %5263 = vmatprep.mubr.msk.f32.mxu0 %vm658_vm4, %v1686_v4  ;;  %1837 = vrot.lane.b32.xlu0 %v6885_v35, %s6085_s30 }
 0x551   :  { %5264 = vmatmul.mubr.msk.f32.gmra.mrb[38].mxu0 %vm658_vm4, %v1687_v57  ;;  %v1553_v7 = vpop.permute.xlu1 %1552  ;;  %5592 = vmatprep.subr.bf16.mxu1 %v5591_v62 }
 0x552   :  { %v7150_v61 = vpop.permute.xlu0 %1574  ;;  %v1689_v2 = vadd.f32 %v6911_v49, %v1553_v7  ;;  %5594 = vmatpush3.bf16.msra.mxu1 %v5591_v62  ;;  %v8337_v7 = vld [vmem:[#allocation26_spill] sm:$0xff] }
 0x553   :  { %1803 = vrot.lane.b32.xlu1 %v6911_v49, %s6085_s30  ;;  %v1700_v32 = vadd.f32 %v7150_v61, %v6851_v14  ;;  %5604 = vmatprep.subr.bf16.mxu1 %v8336_v37 }
 0x554   :  { %1841 = vrot.lane.b32.xlu0 %v6895_v40, %s6085_s30 }
 0x555   :  { %v1551_v46 = vpop.permute.xlu1 %1550 }
 0x556   :  { %v1688_v55 = vadd.f32 %v1551_v46, %v6915_v3  ;;  %v7157_v20 = vpop.permute.xlu0 %1578 }
 0x557   :  { %1807 = vrot.lane.b32.xlu1 %v6922_v12, %s6085_s30  ;;  %v1702_v14 = vadd.f32 %v7157_v20, %v6863_v21 }
 0x558   :  { %5266 = vmatprep.mubr.msk.f32.mxu0 %vm658_vm4, %v1688_v55  ;;  %1845 = vrot.lane.b32.xlu0 %v6907_v47, %s6085_s30 }
 0x559   :  { %5267 = vmatmul.mubr.msk.f32.gmra.mrb[40].mxu0 %vm658_vm4, %v1689_v2  ;;  %v1557_v29 = vpop.permute.xlu1 %1556 }
 0x55a   :  { %v7166_v43 = vpop.permute.xlu0 %1582  ;;  %v1691_v53 = vadd.f32 %v6922_v12, %v1557_v29 }
 0x55b   :  { %1811 = vrot.lane.b32.xlu1 %v6934_v36, %s6085_s30 }
 0x55c   :  { %1849 = vrot.lane.b32.xlu0 %v6917_v6, %s6085_s30 }
 0x55d   :  { %v1555_v49 = vpop.permute.xlu1 %1554 }
 0x55e   :  { %v1690_v3 = vadd.f32 %v1555_v49, %v6928_v22  ;;  %v7173_v1 = vpop.permute.xlu0 %1586 }
 0x55f   :  { %1815 = vrot.lane.b32.xlu1 %v6945_v27, %s6085_s30 }
 0x560   :  { %5269 = vmatprep.mubr.msk.f32.mxu0 %vm658_vm4, %v1690_v3  ;;  %1853 = vrot.lane.b32.xlu0 %v6930_v28, %s6085_s30  ;;  %v1706_v3 = vadd.f32 %v7173_v1, %v6885_v35 }
 0x561   :  { %5270 = vmatmul.mubr.msk.f32.gmra.mrb[42].mxu0 %vm658_vm4, %v1691_v53  ;;  %v1561_v58 = vpop.permute.xlu1 %1560 }
 0x562   :  { %v7182_v25 = vpop.permute.xlu0 %1590  ;;  %v1693_v0 = vadd.f32 %v6934_v36, %v1561_v58 }
 0x563   :  { %1819 = vrot.lane.b32.xlu1 %v6957_v30, %s6085_s30  ;;  %v1708_v53 = vadd.f32 %v7182_v25, %v6895_v40 }
 0x564   :  { %1857 = vrot.lane.b32.xlu0 %v6940_v48, %s6085_s30 }
 0x565   :  { %v1559_v12 = vpop.permute.xlu1 %1558 }
 0x566   :  { %v1692_v22 = vadd.f32 %v1559_v12, %v6938_v45  ;;  %v7189_v63 = vpop.permute.xlu0 %1594 }
 0x567   :  { %1823 = vrot.lane.b32.xlu1 %v6969_v8, %s6085_s30 }
 0x568   :  { %5272 = vmatprep.mubr.msk.f32.mxu0 %vm658_vm4, %v1692_v22  ;;  %1861 = vrot.lane.b32.xlu0 %v6953_v9, %s6085_s30 }
 0x569   :  { %5273 = vmatmul.mubr.msk.f32.gmra.mrb[44].mxu0 %vm658_vm4, %v1693_v0  ;;  %v1563_v42 = vpop.permute.xlu1 %1562 }
 0x56a   :  { %v1694_v34 = vadd.f32 %v1563_v42, %v6951_v19  ;;  %v7199_v51 = vpop.permute.xlu0 %1598 }
 0x56b   :  { %1827 = vrot.lane.b32.xlu1 %v6846_v11, %s6085_s30 }
 0x56c   :  { %5275 = vmatprep.mubr.msk.f32.mxu0 %vm658_vm4, %v1694_v34  ;;  %1865 = vrot.lane.b32.xlu0 %v6963_v17, %s6085_s30 }
 0x56d   :  { %v1565_v36 = vpop.permute.xlu1 %1564 }
 0x56e   :  { %v1695_v45 = vadd.f32 %v6945_v27, %v1565_v36  ;;  %v7207_v56 = vpop.permute.xlu0 %1602 }
 0x56f   :  { %1831 = vrot.lane.b32.xlu1 %v6858_v18, %s6085_s30 }
 0x570   :  { %5276 = vmatmul.mubr.msk.f32.gmra.mrb[46].mxu0 %vm658_vm4, %v1695_v45  ;;  %1869 = vrot.lane.b32.xlu0 %v6977_v41, %s6085_s30  ;;  %v8338_v45 = vld [vmem:[#allocation27_spill] sm:$0xff] }
 0x571   :  { %v1569_v19 = vpop.permute.xlu1 %1568  ;;  %5278 = vmatprep.mubr.msk.f32.mxu0 %vm658_vm4, %v1696_v10 }
 0x572   :  { %v1697_v4 = vadd.f32 %v6957_v30, %v1569_v19  ;;  %v7217_v27 = vpop.permute.xlu0 %1606 }
 0x573   :  { %1835 = vrot.lane.b32.xlu1 %v6869_v24, %s6085_s30 }
 0x574   :  { %5279 = vmatmul.mubr.msk.f32.gmra.mrb[48].mxu0 %vm658_vm4, %v1697_v4  ;;  %1873 = vrot.lane.b32.xlu0 %v6988_v33, %s6085_s30 }
 0x575   :  { %v1573_v54 = vpop.permute.xlu1 %1572  ;;  %5281 = vmatprep.mubr.msk.f32.mxu0 %vm658_vm4, %v1698_v5 }
 0x576   :  { %v1699_v57 = vadd.f32 %v6969_v8, %v1573_v54  ;;  %v7227_v30 = vpop.permute.xlu0 %1610 }
 0x577   :  { %1839 = vrot.lane.b32.xlu1 %v6880_v31, %s6085_s30 }
 0x578   :  { %643 = vrot.lane.b32.xlu0 %v8337_v7, %s6083_s6  ;;  %5282 = vmatmul.mubr.msk.f32.gmra.mrb[50].mxu0 %vm658_vm4, %v1699_v57 }
 0x579   :  { %v1577_v46 = vpop.permute.xlu1 %1576  ;;  %5284 = vmatprep.mubr.msk.f32.mxu0 %vm658_vm4, %v1700_v32 }
 0x57a   :  { %v1701_v8 = vadd.f32 %v6846_v11, %v1577_v46  ;;  %v7239_v55 = vpop.permute.xlu0 %1614  ;;  %v1704_v11 = vadd.f32 %v7166_v43, %v6873_v26 }
 0x57b   :  { %1843 = vrot.lane.b32.xlu1 %v6891_v38, %s6085_s30 }
 0x57c   :  { %5285 = vmatmul.mubr.msk.f32.gmra.mrb[52].mxu0 %vm658_vm4, %v1701_v8 }
 0x57d   :  { %v1581_v61 = vpop.permute.xlu1 %1580  ;;  %5287 = vmatprep.mubr.msk.f32.mxu0 %vm658_vm4, %v1702_v14 }
 0x57e   :  { %v1703_v2 = vadd.f32 %v6858_v18, %v1581_v61  ;;  %v7248_v29 = vpop.permute.xlu0 %1618 }
 0x57f   :  { %1847 = vrot.lane.b32.xlu1 %v6902_v44, %s6085_s30 }
 0x580   :  { %5288 = vmatmul.mubr.msk.f32.gmra.mrb[54].mxu0 %vm658_vm4, %v1703_v2 }
 0x581   :  { %v1585_v21 = vpop.permute.xlu1 %1584  ;;  %5290 = vmatprep.mubr.msk.f32.mxu0 %vm658_vm4, %v1704_v11 }
 0x582   :  { %v1705_v20 = vadd.f32 %v6869_v24, %v1585_v21  ;;  %v1623_v49 = vpop.permute.xlu0 %1622 }
 0x583   :  { %1851 = vrot.lane.b32.xlu1 %v6913_v50, %s6085_s30  ;;  %v1724_v59 = vadd.f32 %v1623_v49, %v6988_v33 }
 0x584   :  { %5291 = vmatmul.mubr.msk.f32.gmra.mrb[56].mxu0 %vm658_vm4, %v1705_v20 }
 0x585   :  { %v1589_v18 = vpop.permute.xlu1 %1588  ;;  %5293 = vmatprep.mubr.msk.f32.mxu0 %vm658_vm4, %v1706_v3 }
 0x586   :  { %v1707_v26 = vadd.f32 %v6880_v31, %v1589_v18  ;;  %v7264_v43 = vpop.permute.xlu0 %1777  ;;  %v1710_v31 = vadd.f32 %v7189_v63, %v6907_v47 }
 0x587   :  { %1855 = vrot.lane.b32.xlu1 %v6924_v15, %s6085_s30 }
 0x588   :  { %5294 = vmatmul.mubr.msk.f32.gmra.mrb[58].mxu0 %vm658_vm4, %v1707_v26 }
 0x589   :  { %v1593_v24 = vpop.permute.xlu1 %1592  ;;  %5296 = vmatprep.mubr.msk.f32.mxu0 %vm658_vm4, %v1708_v53 }
 0x58a   :  { %v1709_v35 = vadd.f32 %v6891_v38, %v1593_v24  ;;  %v7273_v1 = vpop.permute.xlu0 %1781  ;;  %v1712_v38 = vadd.f32 %v7199_v51, %v6917_v6 }
 0x58b   :  { %1859 = vrot.lane.b32.xlu1 %v8325_v16, %s6085_s30 }
 0x58c   :  { %5297 = vmatmul.mubr.msk.f32.gmra.mrb[60].mxu0 %vm658_vm4, %v1709_v35 }
 0x58d   :  { %v1597_v40 = vpop.permute.xlu1 %1596  ;;  %5299 = vmatprep.mubr.msk.f32.mxu0 %vm658_vm4, %v1710_v31 }
 0x58e   :  { %v1711_v58 = vadd.f32 %v6902_v44, %v1597_v40  ;;  %v7282_v25 = vpop.permute.xlu0 %1785  ;;  %v1714_v44 = vadd.f32 %v7207_v56, %v6930_v28 }
 0x58f   :  { %1863 = vrot.lane.b32.xlu1 %v8327_v52, %s6085_s30 }
 0x590   :  { %5300 = vmatmul.mubr.msk.f32.gmra.mrb[62].mxu0 %vm658_vm4, %v1711_v58 }
 0x591   :  { %v1601_v47 = vpop.permute.xlu1 %1600  ;;  %5302 = vmatprep.mubr.msk.f32.mxu0 %vm658_vm4, %v1712_v38 }
 0x592   :  { %v1713_v12 = vadd.f32 %v6913_v50, %v1601_v47  ;;  %v7291_v22 = vpop.permute.xlu0 %1789  ;;  %v1716_v50 = vadd.f32 %v7217_v27, %v6940_v48 }
 0x593   :  { %1867 = vrot.lane.b32.xlu1 %v8328_v13, %s6085_s30 }
 0x594   :  { %5303 = vmatmul.mubr.msk.f32.gmra.mrb[64].mxu0 %vm658_vm4, %v1713_v12 }
 0x595   :  { %v1605_v6 = vpop.permute.xlu1 %1604  ;;  %5305 = vmatprep.mubr.msk.f32.mxu0 %vm658_vm4, %v1714_v44 }
 0x596   :  { %v1715_v63 = vadd.f32 %v6924_v15, %v1605_v6  ;;  %v7300_v0 = vpop.permute.xlu0 %1793  ;;  %v1718_v15 = vadd.f32 %v7227_v30, %v6953_v9 }
 0x597   :  { %1871 = vrot.lane.b32.xlu1 %v8330_v60, %s6085_s30 }
 0x598   :  { %5306 = vmatmul.mubr.msk.f32.gmra.mrb[66].mxu0 %vm658_vm4, %v1715_v63 }
 0x599   :  { %v1609_v28 = vpop.permute.xlu1 %1608  ;;  %5308 = vmatprep.mubr.msk.f32.mxu0 %vm658_vm4, %v1716_v50 }
 0x59a   :  { %v1717_v42 = vadd.f32 %v8325_v16, %v1609_v28  ;;  %v7309_v34 = vpop.permute.xlu0 %1797  ;;  %v1720_v16 = vadd.f32 %v7239_v55, %v6963_v17 }
 0x59b   :  { %1875 = vrot.lane.b32.xlu1 %v6986_v23, %s6085_s30 }
 0x59c   :  { %5309 = vmatmul.mubr.msk.f32.gmra.mrb[68].mxu0 %vm658_vm4, %v1717_v42 }
 0x59d   :  { %v1613_v48 = vpop.permute.xlu1 %1612  ;;  %5311 = vmatprep.mubr.msk.f32.mxu0 %vm658_vm4, %v1718_v15 }
 0x59e   :  { %v1719_v51 = vadd.f32 %v8327_v52, %v1613_v48  ;;  %v7318_v36 = vpop.permute.xlu0 %1801  ;;  %v1722_v52 = vadd.f32 %v7248_v29, %v6977_v41 }
 0x59f   :  { %647 = vrot.lane.b32.xlu1 %v8338_v45, %s6083_s6 }
 0x5a0   :  { %5312 = vmatmul.mubr.msk.f32.gmra.mrb[70].mxu0 %vm658_vm4, %v1719_v51 }
 0x5a1   :  { %v1617_v9 = vpop.permute.xlu1 %1616  ;;  %5314 = vmatprep.mubr.msk.f32.mxu0 %vm658_vm4, %v1720_v16 }
 0x5a2   :  { %v1721_v56 = vadd.f32 %v8328_v13, %v1617_v9  ;;  %v7327_v10 = vpop.permute.xlu0 %1805 }
 0x5a4   :  { %5315 = vmatmul.mubr.msk.f32.gmra.mrb[72].mxu0 %vm658_vm4, %v1721_v56 }
 0x5a5   :  { %v1621_v19 = vpop.permute.xlu1 %1620  ;;  %5317 = vmatprep.mubr.msk.f32.mxu0 %vm658_vm4, %v1722_v52  ;;  %v2967_v52 = vld [vmem:[%s8264_s18 + $0x8] sm:$0xff] }
 0x5a6   :  { %v1723_v17 = vadd.f32 %v8330_v60, %v1621_v19  ;;  %v7335_v39 = vpop.permute.xlu0 %1809  ;;  %v2968_v19 = vld [vmem:[%s8264_s18 + $0x10] sm:$0xff] }
 0x5a8   :  { %5318 = vmatmul.mubr.msk.f32.gmra.mrb[74].mxu0 %vm658_vm4, %v1723_v17 }
 0x5a9   :  { %v1625_v4 = vpop.permute.xlu1 %1624  ;;  %5320 = vmatprep.mubr.msk.f32.mxu0 %vm658_vm4, %v1724_v59 }
 0x5aa   :  { %v1725_v13 = vadd.f32 %v6986_v23, %v1625_v4  ;;  %v7341_v27 = vpop.permute.xlu0 %1813 }
 0x5ac   :  { %5321 = vmatmul.mubr.msk.f32.gmra.mrb[76].mxu0 %vm658_vm4, %v1725_v13 }
 0x5ad   :  { %v1780_v41 = vpop.permute.xlu1 %1779 }
 0x5ae   :  { %v7343_v5 = vpop.permute.xlu0 %1817 }
 0x5b1   :  { %v1784_v62 = vpop.permute.xlu1 %1783 }
 0x5b2   :  { %v7349_v54 = vpop.permute.xlu0 %1821 }
 0x5b5   :  { %v7345_v60 = vpop.permute.xlu1 %1787 }
 0x5b6   :  { %v7353_v30 = vpop.permute.xlu0 %1825 }
 0x5b9   :  { %v7347_v33 = vpop.permute.xlu1 %1791 }
 0x5ba   :  { %v7359_v7 = vpop.permute.xlu0 %1829 }
 0x5bd   :  { %v7351_v57 = vpop.permute.xlu1 %1795 }
 0x5be   :  { %v7363_v8 = vpop.permute.xlu0 %1833 }
 0x5c1   :  { %v7355_v32 = vpop.permute.xlu1 %1799 }
 0x5c2   :  { %v7369_v61 = vpop.permute.xlu0 %1837 }
 0x5c5   :  { %v7357_v23 = vpop.permute.xlu1 %1803 }
 0x5c6   :  { %v7373_v29 = vpop.permute.xlu0 %1841 }
 0x5c9   :  { %v7361_v46 = vpop.permute.xlu1 %1807 }
 0x5ca   :  { %v7379_v20 = vpop.permute.xlu0 %1845 }
 0x5cd   :  { %v7365_v55 = vpop.permute.xlu1 %1811 }
 0x5ce   :  { %v7383_v3 = vpop.permute.xlu0 %1849 }
 0x5d1   :  { %v7367_v14 = vpop.permute.xlu1 %1815 }
 0x5d2   :  { %v7389_v53 = vpop.permute.xlu0 %1853 }
 0x5d5   :  { %v7371_v2 = vpop.permute.xlu1 %1819 }
 0x5d6   :  { %v7393_v35 = vpop.permute.xlu0 %1857 }
 0x5d9   :  { %v7375_v11 = vpop.permute.xlu1 %1823 }
 0x5da   :  { %v7399_v58 = vpop.permute.xlu0 %1861 }
 0x5dd   :  { %v7377_v21 = vpop.permute.xlu1 %1827 }
 0x5de   :  { %v7403_v47 = vpop.permute.xlu0 %1865 }
 0x5e1   :  { %v7381_v49 = vpop.permute.xlu1 %1831 }
 0x5e2   :  { %v7410_v48 = vpop.permute.xlu0 %1869 }
 0x5e5   :  { %v7385_v18 = vpop.permute.xlu1 %1835 }
 0x5e6   :  { %v7430_v59 = vpop.permute.xlu0 %1873 }
 0x5e9   :  { %v7387_v26 = vpop.permute.xlu1 %1839 }
 0x5ed   :  { %v7391_v24 = vpop.permute.xlu1 %1843 }
 0x5f1   :  { %v7395_v31 = vpop.permute.xlu1 %1847 }
 0x5f5   :  { %v7397_v40 = vpop.permute.xlu1 %1851 }
 0x5f9   :  { %v7401_v38 = vpop.permute.xlu1 %1855 }
 0x5fc   :  { %v5250_v12 = vpop.f32.mrb[28].mxu0 }
 0x5fd   :  { %v2149_v44 = vadd.f32 %v5250_v12, %v1780_v41  ;;  %v7405_v6 = vpop.permute.xlu1 %1859  ;;  %v2143_v63 = vpop.f32.mrb[29].mxu0 }
 0x5fe   :  { %v2144_v50 = vadd.f32 %v2143_v63, %v7264_v43  ;;  %v2966_v43 = vld [vmem:[%s8264_s18] sm:$0xff] }
 0x5ff   :  { %v2393_v42 = vmax.f32 %v2149_v44, 0.0  ;;  %v5595_v17 = vpack.c.bf16 %v2967_v52, %v2966_v43 }
 0x600   :  { %v2392_v28 = vmax.f32 %v2144_v50, 0.0  ;;  %v644_v50 = vpop.permute.xlu0 %643 }
 0x601   :  { %v7408_v15 = vpop.permute.xlu1 %1863  ;;  %5596 = vmatprep.subr.bf16.mxu0 %v5595_v17 }
 0x602   :  { %5327 = vmatprep.mubr.msk.f32.mxu1 %vm197_vm1, %v2392_v28  ;;  %5598 = vmatpush3.bf16.msra.mxu0 %v5595_v17 }
 0x603   :  { %5328 = vmatmul.mubr.msk.f32.vlgmr.msra.gmra.mrb[32].mxu1 %vm197_vm1, %v2393_v42 }
 0x604   :  { %v5253_v51 = vpop.f32.mrb[30].mxu0  ;;  %5606 = vmatpush3.bf16.msra.mxu1 %v8336_v37  ;;  %v2969_v37 = vld [vmem:[%s8264_s18 + $0x18] sm:$0xff] }
 0x605   :  { %v2159_v16 = vadd.f32 %v5253_v51, %v1784_v62  ;;  %v7415_v45 = vpop.permute.xlu1 %1867  ;;  %v2153_v9 = vpop.f32.mrb[31].mxu0  ;;  %v5599_v4 = vpack.c.bf16 %v2969_v37, %v2968_v19  ;;  %v8339_v51 = vld [vmem:[#allocation25_spill] sm:$0xff] }
 0x606   :  { %v2154_v56 = vadd.f32 %v2153_v9, %v7273_v1 }
 0x607   :  { %v2395_v13 = vmax.f32 %v2159_v16, 0.0  ;;  %5600 = vmatprep.subr.bf16.mxu0 %v5599_v4  ;;  %v650_v16 = vsel %vm197_vm1, %v8339_v51, %v644_v50 }
 0x608   :  { %v2394_v1 = vmax.f32 %v2154_v56, 0.0  ;;  %5602 = vmatpush3.bf16.msra.mxu0 %v5599_v4 }
 0x609   :  { %v7432_v41 = vpop.permute.xlu1 %1871 }
 0x60a   :  { %5330 = vmatprep.mubr.msk.f32.mxu1 %vm197_vm1, %v2394_v1 }
 0x60b   :  { %5331 = vmatmul.mubr.msk.f32.gmra.mrb[34].mxu1 %vm197_vm1, %v2395_v13 }
 0x60c   :  { %v5256_v62 = vpop.f32.mrb[32].mxu0 }
 0x60d   :  { %v2169_v12 = vadd.f32 %v5256_v62, %v7345_v60  ;;  %v7437_v44 = vpop.permute.xlu1 %1875  ;;  %v2163_v63 = vpop.f32.mrb[33].mxu0 }
 0x60e   :  { %v2164_v28 = vadd.f32 %v2163_v63, %v7282_v25 }
 0x60f   :  { %v2397_v9 = vmax.f32 %v2169_v12, 0.0 }
 0x610   :  { %v2396_v42 = vmax.f32 %v2164_v28, 0.0 }
 0x611   :  { %v648_v56 = vpop.permute.xlu1 %647 }
 0x612   :  { %v652_v43 = vsel %vm651_vm7, %v650_v16, %v648_v56  ;;  %5333 = vmatprep.mubr.msk.f32.mxu1 %vm197_vm1, %v2396_v42 }
 0x613   :  { %653 = vst.msk [vmem:[%s8266_s20] sm:$0xff] %vm466_vm3, %v652_v43  ;;  %5334 = vmatmul.mubr.msk.f32.gmra.mrb[36].mxu1 %vm197_vm1, %v2397_v9 }
 0x614   :  { %v5259_v60 = vpop.f32.mrb[34].mxu0 }
 0x615   :  { %v2179_v25 = vadd.f32 %v5259_v60, %v7347_v33  ;;  %v2173_v52 = vpop.f32.mrb[35].mxu0 }
 0x616   :  { %v2174_v19 = vadd.f32 %v2173_v52, %v7291_v22 }
 0x617   :  { %v2399_v37 = vmax.f32 %v2179_v25, 0.0 }
 0x618   :  { %v2398_v17 = vmax.f32 %v2174_v19, 0.0 }
 0x61a   :  { %5336 = vmatprep.mubr.msk.f32.mxu1 %vm197_vm1, %v2398_v17 }
 0x61b   :  { %5337 = vmatmul.mubr.msk.f32.gmra.mrb[38].mxu1 %vm197_vm1, %v2399_v37 }
 0x61c   :  { %v5262_v1 = vpop.f32.mrb[36].mxu0 }
 0x61d   :  { %v2189_v4 = vadd.f32 %v5262_v1, %v7351_v57  ;;  %v2183_v13 = vpop.f32.mrb[37].mxu0 }
 0x61e   :  { %v2184_v62 = vadd.f32 %v2183_v13, %v7300_v0 }
 0x61f   :  { %v2401_v63 = vmax.f32 %v2189_v4, 0.0 }
 0x620   :  { %v2400_v12 = vmax.f32 %v2184_v62, 0.0 }
 0x622   :  { %5339 = vmatprep.mubr.msk.f32.mxu1 %vm197_vm1, %v2400_v12 }
 0x623   :  { %5340 = vmatmul.mubr.msk.f32.gmra.mrb[40].mxu1 %vm197_vm1, %v2401_v63 }
 0x624   :  { %v5265_v33 = vpop.f32.mrb[38].mxu0 }
 0x625   :  { %v2199_v22 = vadd.f32 %v5265_v33, %v7355_v32  ;;  %v2193_v50 = vpop.f32.mrb[39].mxu0 }
 0x626   :  { %v2194_v28 = vadd.f32 %v2193_v50, %v7309_v34 }
 0x627   :  { %v2403_v51 = vmax.f32 %v2199_v22, 0.0 }
 0x628   :  { %v2402_v42 = vmax.f32 %v2194_v28, 0.0 }
 0x62a   :  { %5342 = vmatprep.mubr.msk.f32.mxu1 %vm197_vm1, %v2402_v42 }
 0x62b   :  { %5343 = vmatmul.mubr.msk.f32.gmra.mrb[42].mxu1 %vm197_vm1, %v2403_v51 }
 0x62c   :  { %v5268_v57 = vpop.f32.mrb[40].mxu0 }
 0x62d   :  { %v2209_v0 = vadd.f32 %v5268_v57, %v7357_v23  ;;  %v2203_v16 = vpop.f32.mrb[41].mxu0 }
 0x62e   :  { %v2204_v9 = vadd.f32 %v2203_v16, %v7318_v36 }
 0x62f   :  { %v2405_v43 = vmax.f32 %v2209_v0, 0.0 }
 0x630   :  { %v2404_v56 = vmax.f32 %v2204_v9, 0.0 }
 0x632   :  { %5345 = vmatprep.mubr.msk.f32.mxu1 %vm197_vm1, %v2404_v56 }
 0x633   :  { %5346 = vmatmul.mubr.msk.f32.gmra.mrb[44].mxu1 %vm197_vm1, %v2405_v43 }
 0x634   :  { %v5271_v32 = vpop.f32.mrb[42].mxu0 }
 0x635   :  { %v2219_v34 = vadd.f32 %v5271_v32, %v7361_v46  ;;  %v2213_v60 = vpop.f32.mrb[43].mxu0 }
 0x636   :  { %v2214_v25 = vadd.f32 %v2213_v60, %v7327_v10 }
 0x637   :  { %v2407_v19 = vmax.f32 %v2219_v34, 0.0 }
 0x638   :  { %v2406_v52 = vmax.f32 %v2214_v25, 0.0 }
 0x63a   :  { %5348 = vmatprep.mubr.msk.f32.mxu1 %vm197_vm1, %v2406_v52 }
 0x63b   :  { %5349 = vmatmul.mubr.msk.f32.gmra.mrb[46].mxu1 %vm197_vm1, %v2407_v19 }
 0x63c   :  { %v5274_v23 = vpop.f32.mrb[44].mxu0 }
 0x63d   :  { %v2229_v36 = vadd.f32 %v5274_v23, %v7365_v55  ;;  %v2223_v17 = vpop.f32.mrb[45].mxu0 }
 0x63e   :  { %v2224_v37 = vadd.f32 %v2223_v17, %v7335_v39 }
 0x63f   :  { %v2409_v4 = vmax.f32 %v2229_v36, 0.0 }
 0x640   :  { %v2408_v1 = vmax.f32 %v2224_v37, 0.0 }
 0x642   :  { %5351 = vmatprep.mubr.msk.f32.mxu1 %vm197_vm1, %v2408_v1 }
 0x643   :  { %v5277_v46 = vpop.f32.mrb[46].mxu0  ;;  %5352 = vmatmul.mubr.msk.f32.gmra.mrb[48].mxu1 %vm197_vm1, %v2409_v4 }
 0x644   :  { %v2239_v10 = vadd.f32 %v5277_v46, %v7367_v14  ;;  %v2233_v13 = vpop.f32.mrb[47].mxu0 }
 0x645   :  { %v2234_v62 = vadd.f32 %v2233_v13, %v7341_v27 }
 0x646   :  { %v2411_v33 = vmax.f32 %v2239_v10, 0.0 }
 0x647   :  { %v2410_v12 = vmax.f32 %v2234_v62, 0.0  ;;  %v5280_v63 = vpop.f32.mrb[48].mxu0 }
 0x648   :  { %v2249_v55 = vadd.f32 %v5280_v63, %v7371_v2  ;;  %v2243_v22 = vpop.f32.mrb[49].mxu0 }
 0x649   :  { %v2244_v39 = vadd.f32 %v2243_v22, %v7343_v5  ;;  %5354 = vmatprep.mubr.msk.f32.mxu1 %vm197_vm1, %v2410_v12 }
 0x64a   :  { %5355 = vmatmul.mubr.msk.f32.gmra.mrb[50].mxu1 %vm197_vm1, %v2411_v33  ;;  %v2413_v42 = vmax.f32 %v2249_v55, 0.0 }
 0x64b   :  { %v2412_v50 = vmax.f32 %v2244_v39, 0.0  ;;  %v5283_v28 = vpop.f32.mrb[50].mxu0 }
 0x64c   :  { %v2259_v14 = vadd.f32 %v5283_v28, %v7375_v11  ;;  %v2253_v51 = vpop.f32.mrb[51].mxu0 }
 0x64d   :  { %v2254_v27 = vadd.f32 %v2253_v51, %v7349_v54  ;;  %5357 = vmatprep.mubr.msk.f32.mxu1 %vm197_vm1, %v2412_v50 }
 0x64e   :  { %5358 = vmatmul.mubr.msk.f32.gmra.mrb[52].mxu1 %vm197_vm1, %v2413_v42  ;;  %v2415_v0 = vmax.f32 %v2259_v14, 0.0 }
 0x64f   :  { %v2414_v2 = vmax.f32 %v2254_v27, 0.0  ;;  %v5286_v57 = vpop.f32.mrb[52].mxu0 }
 0x650   :  { %v2269_v5 = vadd.f32 %v5286_v57, %v7377_v21  ;;  %v2263_v16 = vpop.f32.mrb[53].mxu0 }
 0x651   :  { %v2264_v9 = vadd.f32 %v2263_v16, %v7353_v30  ;;  %5360 = vmatprep.mubr.msk.f32.mxu1 %vm197_vm1, %v2414_v2 }
 0x652   :  { %5361 = vmatmul.mubr.msk.f32.gmra.mrb[54].mxu1 %vm197_vm1, %v2415_v0  ;;  %v2417_v43 = vmax.f32 %v2269_v5, 0.0 }
 0x653   :  { %v2416_v11 = vmax.f32 %v2264_v9, 0.0  ;;  %v5289_v56 = vpop.f32.mrb[54].mxu0 }
 0x654   :  { %v2279_v54 = vadd.f32 %v5289_v56, %v7381_v49  ;;  %v2273_v32 = vpop.f32.mrb[55].mxu0 }
 0x655   :  { %v2274_v34 = vadd.f32 %v2273_v32, %v7359_v7  ;;  %5363 = vmatprep.mubr.msk.f32.mxu1 %vm197_vm1, %v2416_v11 }
 0x656   :  { %5364 = vmatmul.mubr.msk.f32.gmra.mrb[56].mxu1 %vm197_vm1, %v2417_v43  ;;  %v2419_v25 = vmax.f32 %v2279_v54, 0.0 }
 0x657   :  { %v2418_v21 = vmax.f32 %v2274_v34, 0.0  ;;  %v5292_v60 = vpop.f32.mrb[56].mxu0 }
 0x658   :  { %v2289_v30 = vadd.f32 %v5292_v60, %v7385_v18  ;;  %v2283_v52 = vpop.f32.mrb[57].mxu0 }
 0x659   :  { %v2284_v19 = vadd.f32 %v2283_v52, %v7363_v8  ;;  %5366 = vmatprep.mubr.msk.f32.mxu1 %vm197_vm1, %v2418_v21 }
 0x65a   :  { %5367 = vmatmul.mubr.msk.f32.gmra.mrb[58].mxu1 %vm197_vm1, %v2419_v25  ;;  %v2421_v36 = vmax.f32 %v2289_v30, 0.0 }
 0x65b   :  { %v2420_v49 = vmax.f32 %v2284_v19, 0.0  ;;  %v5295_v23 = vpop.f32.mrb[58].mxu0 }
 0x65c   :  { %v2299_v7 = vadd.f32 %v5295_v23, %v7387_v26  ;;  %v2293_v17 = vpop.f32.mrb[59].mxu0 }
 0x65d   :  { %v2294_v37 = vadd.f32 %v2293_v17, %v7369_v61  ;;  %5369 = vmatprep.mubr.msk.f32.mxu1 %vm197_vm1, %v2420_v49 }
 0x65e   :  { %5370 = vmatmul.mubr.msk.f32.gmra.mrb[60].mxu1 %vm197_vm1, %v2421_v36  ;;  %v2423_v4 = vmax.f32 %v2299_v7, 0.0 }
 0x65f   :  { %v2422_v18 = vmax.f32 %v2294_v37, 0.0  ;;  %v5298_v1 = vpop.f32.mrb[60].mxu0 }
 0x660   :  { %v2309_v8 = vadd.f32 %v5298_v1, %v7391_v24  ;;  %v2303_v46 = vpop.f32.mrb[61].mxu0 }
 0x661   :  { %v2304_v10 = vadd.f32 %v2303_v46, %v7373_v29  ;;  %5372 = vmatprep.mubr.msk.f32.mxu1 %vm197_vm1, %v2422_v18 }
 0x662   :  { %5373 = vmatmul.mubr.msk.f32.gmra.mrb[62].mxu1 %vm197_vm1, %v2423_v4  ;;  %v2425_v62 = vmax.f32 %v2309_v8, 0.0 }
 0x663   :  { %v2424_v26 = vmax.f32 %v2304_v10, 0.0  ;;  %v5301_v13 = vpop.f32.mrb[62].mxu0 }
 0x664   :  { %v2319_v61 = vadd.f32 %v5301_v13, %v7395_v31  ;;  %v2313_v12 = vpop.f32.mrb[63].mxu0 }
 0x665   :  { %v2314_v63 = vadd.f32 %v2313_v12, %v7379_v20  ;;  %5375 = vmatprep.mubr.msk.f32.mxu1 %vm197_vm1, %v2424_v26 }
 0x666   :  { %5376 = vmatmul.mubr.msk.f32.gmra.mrb[64].mxu1 %vm197_vm1, %v2425_v62  ;;  %v2427_v55 = vmax.f32 %v2319_v61, 0.0 }
 0x667   :  { %v2426_v24 = vmax.f32 %v2314_v63, 0.0  ;;  %v5304_v33 = vpop.f32.mrb[64].mxu0 }
 0x668   :  { %v2329_v29 = vadd.f32 %v5304_v33, %v7397_v40  ;;  %v2323_v22 = vpop.f32.mrb[65].mxu0 }
 0x669   :  { %v2324_v39 = vadd.f32 %v2323_v22, %v7383_v3  ;;  %5378 = vmatprep.mubr.msk.f32.mxu1 %vm197_vm1, %v2426_v24 }
 0x66a   :  { %5379 = vmatmul.mubr.msk.f32.gmra.mrb[66].mxu1 %vm197_vm1, %v2427_v55  ;;  %v2429_v28 = vmax.f32 %v2329_v29, 0.0 }
 0x66b   :  { %v2428_v31 = vmax.f32 %v2324_v39, 0.0  ;;  %v5307_v50 = vpop.f32.mrb[66].mxu0 }
 0x66c   :  { %v2339_v20 = vadd.f32 %v5307_v50, %v7401_v38  ;;  %v2333_v42 = vpop.f32.mrb[67].mxu0 }
 0x66d   :  { %v2334_v14 = vadd.f32 %v2333_v42, %v7389_v53  ;;  %5381 = vmatprep.mubr.msk.f32.mxu1 %vm197_vm1, %v2428_v31 }
 0x66e   :  { %5382 = vmatmul.mubr.msk.f32.gmra.mrb[68].mxu1 %vm197_vm1, %v2429_v28  ;;  %v2431_v27 = vmax.f32 %v2339_v20, 0.0 }
 0x66f   :  { %v2430_v40 = vmax.f32 %v2334_v14, 0.0  ;;  %v5310_v51 = vpop.f32.mrb[68].mxu0 }
 0x670   :  { %v2349_v3 = vadd.f32 %v5310_v51, %v7405_v6  ;;  %v2343_v2 = vpop.f32.mrb[69].mxu0 }
 0x671   :  { %v2344_v57 = vadd.f32 %v2343_v2, %v7393_v35  ;;  %5384 = vmatprep.mubr.msk.f32.mxu1 %vm197_vm1, %v2430_v40 }
 0x672   :  { %5385 = vmatmul.mubr.msk.f32.gmra.mrb[70].mxu1 %vm197_vm1, %v2431_v27  ;;  %v2433_v5 = vmax.f32 %v2349_v3, 0.0 }
 0x673   :  { %v2432_v38 = vmax.f32 %v2344_v57, 0.0  ;;  %v5313_v0 = vpop.f32.mrb[70].mxu0 }
 0x674   :  { %v2359_v53 = vadd.f32 %v5313_v0, %v7408_v15  ;;  %v2353_v16 = vpop.f32.mrb[71].mxu0 }
 0x675   :  { %v2354_v9 = vadd.f32 %v2353_v16, %v7399_v58  ;;  %5387 = vmatprep.mubr.msk.f32.mxu1 %vm197_vm1, %v2432_v38 }
 0x676   :  { %5388 = vmatmul.mubr.msk.f32.gmra.mrb[72].mxu1 %vm197_vm1, %v2433_v5  ;;  %v2435_v56 = vmax.f32 %v2359_v53, 0.0 }
 0x677   :  { %v2434_v6 = vmax.f32 %v2354_v9, 0.0  ;;  %v5316_v11 = vpop.f32.mrb[72].mxu0 }
 0x678   :  { %v2369_v35 = vadd.f32 %v5316_v11, %v7415_v45  ;;  %v2363_v43 = vpop.f32.mrb[73].mxu0 }
 0x679   :  { %v2364_v54 = vadd.f32 %v2363_v43, %v7403_v47  ;;  %5390 = vmatprep.mubr.msk.f32.mxu1 %vm197_vm1, %v2434_v6 }
 0x67a   :  { %5391 = vmatmul.mubr.msk.f32.gmra.mrb[74].mxu1 %vm197_vm1, %v2435_v56  ;;  %v2437_v34 = vmax.f32 %v2369_v35, 0.0 }
 0x67b   :  { %v2436_v15 = vmax.f32 %v2364_v54, 0.0  ;;  %v5319_v32 = vpop.f32.mrb[74].mxu0 }
 0x67c   :  { %v2379_v58 = vadd.f32 %v5319_v32, %v7432_v41  ;;  %v2373_v21 = vpop.f32.mrb[75].mxu0 }
 0x67d   :  { %v2374_v60 = vadd.f32 %v2373_v21, %v7410_v48  ;;  %5393 = vmatprep.mubr.msk.f32.mxu1 %vm197_vm1, %v2436_v15  ;;  %v7539_v48 = vld [vmem:[%s8263_s17] ss:$0 sm:$0xff] }
 0x67e   :  { %5394 = vmatmul.mubr.msk.f32.gmra.mrb[76].mxu1 %vm197_vm1, %v2437_v34  ;;  %v2439_v30 = vmax.f32 %v2379_v58, 0.0 }
 0x67f   :  { %v2438_v45 = vmax.f32 %v2374_v60, 0.0  ;;  %v5322_v25 = vpop.f32.mrb[76].mxu0 }
 0x680   :  { %v2389_v47 = vadd.f32 %v5322_v25, %v7437_v44  ;;  %v2383_v52 = vpop.f32.mrb[77].mxu0 }
 0x681   :  { %v2384_v19 = vadd.f32 %v2383_v52, %v7430_v59  ;;  %5396 = vmatprep.mubr.msk.f32.mxu1 %vm197_vm1, %v2438_v45 }
 0x682   :  { %5397 = vmatmul.mubr.msk.f32.gmra.mrb[78].mxu1 %vm197_vm1, %v2439_v30  ;;  %v2441_v49 = vmax.f32 %v2389_v47, 0.0 }
 0x683   :  { %v2440_v41 = vmax.f32 %v2384_v19, 0.0 }
 0x685   :  { %5399 = vmatprep.mubr.msk.f32.mxu1 %vm197_vm1, %v2440_v41 }
 0x686   :  { %5400 = vmatmul.mubr.msk.f32.gmra.mrb[80].mxu1 %vm197_vm1, %v2441_v49 }
 0x6d6   :  { %v5329_v23 = vpop.f32.mrb[32].mxu1 }
 0x6d7   :  { %v2673_v44 = vadd.f32 %v5329_v23, %v7539_v48  ;;  %v2667_v36 = vpop.f32.mrb[33].mxu1 }
 0x6d8   :  { %v2668_v59 = vadd.f32 %v7539_v48, %v2667_v36 }
 0x6d9   :  { %v2917_v17 = vmax.f32 %v2673_v44, 0.0 }
 0x6da   :  { %v2916_v7 = vmax.f32 %v2668_v59, 0.0 }
 0x6dc   :  { %5410 = vmatprep.mubr.msk.f32.mxu0 %vm466_vm3, %v2916_v7 }
 0x6dd   :  { %5411 = vmatmul.mubr.msk.f32.vlgmr.msra.gmra.mrb[78].mxu0 %vm466_vm3, %v2917_v17 }
 0x6de   :  { %v5332_v37 = vpop.f32.mrb[34].mxu1 }
 0x6df   :  { %v2683_v18 = vadd.f32 %v5332_v37, %v7539_v48  ;;  %v2677_v1 = vpop.f32.mrb[35].mxu1 }
 0x6e0   :  { %v2678_v4 = vadd.f32 %v7539_v48, %v2677_v1 }
 0x6e1   :  { %v2919_v46 = vmax.f32 %v2683_v18, 0.0 }
 0x6e2   :  { %v2918_v8 = vmax.f32 %v2678_v4, 0.0 }
 0x6e4   :  { %5413 = vmatprep.mubr.msk.f32.mxu0 %vm466_vm3, %v2918_v8 }
 0x6e5   :  { %5414 = vmatmul.mubr.msk.f32.gmra.mrb[80].mxu0 %vm466_vm3, %v2919_v46 }
 0x6e6   :  { %v5335_v10 = vpop.f32.mrb[36].mxu1 }
 0x6e7   :  { %v2693_v26 = vadd.f32 %v5335_v10, %v7539_v48  ;;  %v2687_v13 = vpop.f32.mrb[37].mxu1 }
 0x6e8   :  { %v2688_v62 = vadd.f32 %v7539_v48, %v2687_v13 }
 0x6e9   :  { %v2921_v12 = vmax.f32 %v2693_v26, 0.0 }
 0x6ea   :  { %v2920_v61 = vmax.f32 %v2688_v62, 0.0 }
 0x6ec   :  { %5416 = vmatprep.mubr.msk.f32.mxu0 %vm466_vm3, %v2920_v61 }
 0x6ed   :  { %5417 = vmatmul.mubr.msk.f32.gmra.mrb[82].mxu0 %vm466_vm3, %v2921_v12 }
 0x6ee   :  { %v5338_v63 = vpop.f32.mrb[38].mxu1 }
 0x6ef   :  { %v2703_v24 = vadd.f32 %v5338_v63, %v7539_v48  ;;  %v2697_v33 = vpop.f32.mrb[39].mxu1 }
 0x6f0   :  { %v2698_v55 = vadd.f32 %v7539_v48, %v2697_v33 }
 0x6f1   :  { %v2923_v22 = vmax.f32 %v2703_v24, 0.0 }
 0x6f2   :  { %v2922_v29 = vmax.f32 %v2698_v55, 0.0 }
 0x6f4   :  { %5419 = vmatprep.mubr.msk.f32.mxu0 %vm466_vm3, %v2922_v29 }
 0x6f5   :  { %5420 = vmatmul.mubr.msk.f32.gmra.mrb[84].mxu0 %vm466_vm3, %v2923_v22 }
 0x6f6   :  { %v5341_v39 = vpop.f32.mrb[40].mxu1 }
 0x6f7   :  { %v2713_v31 = vadd.f32 %v5341_v39, %v7539_v48  ;;  %v2707_v50 = vpop.f32.mrb[41].mxu1 }
 0x6f8   :  { %v2708_v28 = vadd.f32 %v7539_v48, %v2707_v50 }
 0x6f9   :  { %v2925_v42 = vmax.f32 %v2713_v31, 0.0 }
 0x6fa   :  { %v2924_v20 = vmax.f32 %v2708_v28, 0.0 }
 0x6fc   :  { %5422 = vmatprep.mubr.msk.f32.mxu0 %vm466_vm3, %v2924_v20 }
 0x6fd   :  { %5423 = vmatmul.mubr.msk.f32.gmra.mrb[86].mxu0 %vm466_vm3, %v2925_v42 }
 0x6fe   :  { %v5344_v14 = vpop.f32.mrb[42].mxu1 }
 0x6ff   :  { %v2723_v40 = vadd.f32 %v5344_v14, %v7539_v48  ;;  %v2717_v51 = vpop.f32.mrb[43].mxu1 }
 0x700   :  { %v2718_v27 = vadd.f32 %v7539_v48, %v2717_v51 }
 0x701   :  { %v2927_v2 = vmax.f32 %v2723_v40, 0.0 }
 0x702   :  { %v2926_v3 = vmax.f32 %v2718_v27, 0.0 }
 0x704   :  { %5425 = vmatprep.mubr.msk.f32.mxu0 %vm466_vm3, %v2926_v3 }
 0x705   :  { %5426 = vmatmul.mubr.msk.f32.gmra.mrb[88].mxu0 %vm466_vm3, %v2927_v2 }
 0x706   :  { %v5347_v57 = vpop.f32.mrb[44].mxu1 }
 0x707   :  { %v2733_v38 = vadd.f32 %v5347_v57, %v7539_v48  ;;  %v2727_v0 = vpop.f32.mrb[45].mxu1 }
 0x708   :  { %v2728_v5 = vadd.f32 %v7539_v48, %v2727_v0 }
 0x709   :  { %v2929_v16 = vmax.f32 %v2733_v38, 0.0 }
 0x70a   :  { %v2928_v53 = vmax.f32 %v2728_v5, 0.0 }
 0x70c   :  { %5428 = vmatprep.mubr.msk.f32.mxu0 %vm466_vm3, %v2928_v53 }
 0x70d   :  { %5429 = vmatmul.mubr.msk.f32.gmra.mrb[90].mxu0 %vm466_vm3, %v2929_v16 }
 0x70e   :  { %v5350_v9 = vpop.f32.mrb[46].mxu1 }
 0x70f   :  { %v2743_v6 = vadd.f32 %v5350_v9, %v7539_v48  ;;  %v2737_v11 = vpop.f32.mrb[47].mxu1 }
 0x710   :  { %v2738_v56 = vadd.f32 %v7539_v48, %v2737_v11 }
 0x711   :  { %v2931_v43 = vmax.f32 %v2743_v6, 0.0 }
 0x712   :  { %v2930_v35 = vmax.f32 %v2738_v56, 0.0 }
 0x714   :  { %5431 = vmatprep.mubr.msk.f32.mxu0 %vm466_vm3, %v2930_v35 }
 0x715   :  { %5432 = vmatmul.mubr.msk.f32.gmra.mrb[92].mxu0 %vm466_vm3, %v2931_v43 }
 0x716   :  { %v5353_v54 = vpop.f32.mrb[48].mxu1 }
 0x717   :  { %v2753_v15 = vadd.f32 %v5353_v54, %v7539_v48  ;;  %v2747_v32 = vpop.f32.mrb[49].mxu1 }
 0x718   :  { %v2748_v34 = vadd.f32 %v7539_v48, %v2747_v32 }
 0x719   :  { %v2933_v21 = vmax.f32 %v2753_v15, 0.0 }
 0x71a   :  { %v2932_v58 = vmax.f32 %v2748_v34, 0.0 }
 0x71c   :  { %5434 = vmatprep.mubr.msk.f32.mxu0 %vm466_vm3, %v2932_v58 }
 0x71d   :  { %v5356_v60 = vpop.f32.mrb[50].mxu1  ;;  %5435 = vmatmul.mubr.msk.f32.gmra.mrb[94].mxu0 %vm466_vm3, %v2933_v21 }
 0x71e   :  { %v2763_v45 = vadd.f32 %v5356_v60, %v7539_v48  ;;  %v2757_v25 = vpop.f32.mrb[51].mxu1 }
 0x71f   :  { %v2758_v30 = vadd.f32 %v7539_v48, %v2757_v25 }
 0x720   :  { %v2935_v19 = vmax.f32 %v2763_v45, 0.0 }
 0x721   :  { %v2934_v47 = vmax.f32 %v2758_v30, 0.0  ;;  %v5359_v52 = vpop.f32.mrb[52].mxu1 }
 0x722   :  { %v2773_v41 = vadd.f32 %v5359_v52, %v7539_v48  ;;  %v2767_v49 = vpop.f32.mrb[53].mxu1 }
 0x723   :  { %v2768_v23 = vadd.f32 %v7539_v48, %v2767_v49  ;;  %5437 = vmatprep.mubr.msk.f32.mxu0 %vm466_vm3, %v2934_v47 }
 0x724   :  { %5438 = vmatmul.mubr.msk.f32.gmra.mrb[96].mxu0 %vm466_vm3, %v2935_v19  ;;  %v2937_v59 = vmax.f32 %v2773_v41, 0.0 }
 0x725   :  { %v2936_v44 = vmax.f32 %v2768_v23, 0.0  ;;  %v5362_v36 = vpop.f32.mrb[54].mxu1 }
 0x726   :  { %v2783_v7 = vadd.f32 %v5362_v36, %v7539_v48  ;;  %v2777_v17 = vpop.f32.mrb[55].mxu1 }
 0x727   :  { %v2778_v37 = vadd.f32 %v7539_v48, %v2777_v17  ;;  %5440 = vmatprep.mubr.msk.f32.mxu0 %vm466_vm3, %v2936_v44 }
 0x728   :  { %5441 = vmatmul.mubr.msk.f32.gmra.mrb[98].mxu0 %vm466_vm3, %v2937_v59  ;;  %v2939_v4 = vmax.f32 %v2783_v7, 0.0 }
 0x729   :  { %v2938_v18 = vmax.f32 %v2778_v37, 0.0  ;;  %v5365_v1 = vpop.f32.mrb[56].mxu1 }
 0x72a   :  { %v2793_v8 = vadd.f32 %v5365_v1, %v7539_v48  ;;  %v2787_v46 = vpop.f32.mrb[57].mxu1 }
 0x72b   :  { %v2788_v10 = vadd.f32 %v7539_v48, %v2787_v46  ;;  %5443 = vmatprep.mubr.msk.f32.mxu0 %vm466_vm3, %v2938_v18 }
 0x72c   :  { %5444 = vmatmul.mubr.msk.f32.gmra.mrb[100].mxu0 %vm466_vm3, %v2939_v4  ;;  %v2941_v62 = vmax.f32 %v2793_v8, 0.0 }
 0x72d   :  { %v2940_v26 = vmax.f32 %v2788_v10, 0.0  ;;  %v5368_v13 = vpop.f32.mrb[58].mxu1 }
 0x72e   :  { %v2803_v61 = vadd.f32 %v5368_v13, %v7539_v48  ;;  %v2797_v12 = vpop.f32.mrb[59].mxu1 }
 0x72f   :  { %v2798_v63 = vadd.f32 %v7539_v48, %v2797_v12  ;;  %5446 = vmatprep.mubr.msk.f32.mxu0 %vm466_vm3, %v2940_v26 }
 0x730   :  { %5447 = vmatmul.mubr.msk.f32.gmra.mrb[102].mxu0 %vm466_vm3, %v2941_v62  ;;  %v2943_v55 = vmax.f32 %v2803_v61, 0.0 }
 0x731   :  { %v2942_v24 = vmax.f32 %v2798_v63, 0.0  ;;  %v5371_v33 = vpop.f32.mrb[60].mxu1 }
 0x732   :  { %v2813_v29 = vadd.f32 %v5371_v33, %v7539_v48  ;;  %v2807_v22 = vpop.f32.mrb[61].mxu1 }
 0x733   :  { %v2808_v39 = vadd.f32 %v7539_v48, %v2807_v22  ;;  %5449 = vmatprep.mubr.msk.f32.mxu0 %vm466_vm3, %v2942_v24 }
 0x734   :  { %5450 = vmatmul.mubr.msk.f32.gmra.mrb[104].mxu0 %vm466_vm3, %v2943_v55  ;;  %v2945_v28 = vmax.f32 %v2813_v29, 0.0 }
 0x735   :  { %v2944_v31 = vmax.f32 %v2808_v39, 0.0  ;;  %v5374_v50 = vpop.f32.mrb[62].mxu1  ;;  %v7644_v39 = vld [vmem:[%s8340_s11] ss:$0 sm:$0xff] }
 0x736   :  { %v2823_v20 = vadd.f32 %v5374_v50, %v7539_v48  ;;  %v2817_v42 = vpop.f32.mrb[63].mxu1 }
 0x737   :  { %v2818_v14 = vadd.f32 %v7539_v48, %v2817_v42  ;;  %5452 = vmatprep.mubr.msk.f32.mxu0 %vm466_vm3, %v2944_v31 }
 0x738   :  { %5453 = vmatmul.mubr.msk.f32.gmra.mrb[106].mxu0 %vm466_vm3, %v2945_v28  ;;  %v2947_v27 = vmax.f32 %v2823_v20, 0.0 }
 0x739   :  { %v2946_v40 = vmax.f32 %v2818_v14, 0.0  ;;  %v5377_v51 = vpop.f32.mrb[64].mxu1 }
 0x73a   :  { %v2833_v3 = vadd.f32 %v5377_v51, %v7539_v48  ;;  %v2827_v2 = vpop.f32.mrb[65].mxu1 }
 0x73b   :  { %v2828_v57 = vadd.f32 %v7539_v48, %v2827_v2  ;;  %5455 = vmatprep.mubr.msk.f32.mxu0 %vm466_vm3, %v2946_v40 }
 0x73c   :  { %5456 = vmatmul.mubr.msk.f32.gmra.mrb[108].mxu0 %vm466_vm3, %v2947_v27  ;;  %v2949_v5 = vmax.f32 %v2833_v3, 0.0 }
 0x73d   :  { %v2948_v38 = vmax.f32 %v2828_v57, 0.0  ;;  %v5380_v0 = vpop.f32.mrb[66].mxu1 }
 0x73e   :  { %v2843_v53 = vadd.f32 %v5380_v0, %v7539_v48  ;;  %v2837_v16 = vpop.f32.mrb[67].mxu1 }
 0x73f   :  { %v2838_v9 = vadd.f32 %v7539_v48, %v2837_v16  ;;  %5458 = vmatprep.mubr.msk.f32.mxu0 %vm466_vm3, %v2948_v38 }
 0x740   :  { %5459 = vmatmul.mubr.msk.f32.gmra.mrb[110].mxu0 %vm466_vm3, %v2949_v5  ;;  %v2951_v56 = vmax.f32 %v2843_v53, 0.0 }
 0x741   :  { %v2950_v6 = vmax.f32 %v2838_v9, 0.0  ;;  %v5383_v11 = vpop.f32.mrb[68].mxu1 }
 0x742   :  { %v2853_v35 = vadd.f32 %v5383_v11, %v7539_v48  ;;  %v2847_v43 = vpop.f32.mrb[69].mxu1 }
 0x743   :  { %v2848_v54 = vadd.f32 %v7539_v48, %v2847_v43  ;;  %5461 = vmatprep.mubr.msk.f32.mxu0 %vm466_vm3, %v2950_v6 }
 0x744   :  { %5462 = vmatmul.mubr.msk.f32.gmra.mrb[112].mxu0 %vm466_vm3, %v2951_v56  ;;  %v2953_v34 = vmax.f32 %v2853_v35, 0.0 }
 0x745   :  { %v2952_v15 = vmax.f32 %v2848_v54, 0.0  ;;  %v5386_v32 = vpop.f32.mrb[70].mxu1 }
 0x746   :  { %v2863_v58 = vadd.f32 %v5386_v32, %v7539_v48  ;;  %v2857_v21 = vpop.f32.mrb[71].mxu1 }
 0x747   :  { %v2858_v60 = vadd.f32 %v7539_v48, %v2857_v21  ;;  %5464 = vmatprep.mubr.msk.f32.mxu0 %vm466_vm3, %v2952_v15 }
 0x748   :  { %5465 = vmatmul.mubr.msk.f32.gmra.mrb[114].mxu0 %vm466_vm3, %v2953_v34  ;;  %v2955_v30 = vmax.f32 %v2863_v58, 0.0 }
 0x749   :  { %v2954_v45 = vmax.f32 %v2858_v60, 0.0  ;;  %v5389_v25 = vpop.f32.mrb[72].mxu1 }
 0x74a   :  { %v2873_v47 = vadd.f32 %v5389_v25, %v7539_v48  ;;  %v2867_v52 = vpop.f32.mrb[73].mxu1 }
 0x74b   :  { %v2868_v19 = vadd.f32 %v7539_v48, %v2867_v52  ;;  %5467 = vmatprep.mubr.msk.f32.mxu0 %vm466_vm3, %v2954_v45 }
 0x74c   :  { %5468 = vmatmul.mubr.msk.f32.gmra.mrb[116].mxu0 %vm466_vm3, %v2955_v30  ;;  %v2957_v23 = vmax.f32 %v2873_v47, 0.0 }
 0x74d   :  { %v2956_v41 = vmax.f32 %v2868_v19, 0.0  ;;  %v5392_v49 = vpop.f32.mrb[74].mxu1 }
 0x74e   :  { %v2883_v44 = vadd.f32 %v5392_v49, %v7539_v48  ;;  %v2877_v36 = vpop.f32.mrb[75].mxu1 }
 0x74f   :  { %v2878_v59 = vadd.f32 %v7539_v48, %v2877_v36  ;;  %5470 = vmatprep.mubr.msk.f32.mxu0 %vm466_vm3, %v2956_v41 }
 0x750   :  { %5471 = vmatmul.mubr.msk.f32.gmra.mrb[118].mxu0 %vm466_vm3, %v2957_v23  ;;  %v2959_v37 = vmax.f32 %v2883_v44, 0.0 }
 0x751   :  { %v2958_v7 = vmax.f32 %v2878_v59, 0.0  ;;  %v5395_v17 = vpop.f32.mrb[76].mxu1 }
 0x752   :  { %v2893_v18 = vadd.f32 %v5395_v17, %v7539_v48  ;;  %v2887_v1 = vpop.f32.mrb[77].mxu1 }
 0x753   :  { %v2888_v4 = vadd.f32 %v7539_v48, %v2887_v1  ;;  %5473 = vmatprep.mubr.msk.f32.mxu0 %vm466_vm3, %v2958_v7 }
 0x754   :  { %5474 = vmatmul.mubr.msk.f32.gmra.mrb[120].mxu0 %vm466_vm3, %v2959_v37  ;;  %v2961_v10 = vmax.f32 %v2893_v18, 0.0 }
 0x755   :  { %v2960_v8 = vmax.f32 %v2888_v4, 0.0  ;;  %v5398_v46 = vpop.f32.mrb[78].mxu1 }
 0x756   :  { %v2903_v26 = vadd.f32 %v5398_v46, %v7539_v48  ;;  %v2897_v13 = vpop.f32.mrb[79].mxu1 }
 0x757   :  { %v2898_v62 = vadd.f32 %v7539_v48, %v2897_v13  ;;  %5476 = vmatprep.mubr.msk.f32.mxu0 %vm466_vm3, %v2960_v8 }
 0x758   :  { %5477 = vmatmul.mubr.msk.f32.gmra.mrb[122].mxu0 %vm466_vm3, %v2961_v10  ;;  %v2963_v63 = vmax.f32 %v2903_v26, 0.0 }
 0x759   :  { %v2962_v61 = vmax.f32 %v2898_v62, 0.0  ;;  %v5401_v12 = vpop.f32.mrb[80].mxu1 }
 0x75a   :  { %v2913_v24 = vadd.f32 %v5401_v12, %v7539_v48  ;;  %v2907_v33 = vpop.f32.mrb[81].mxu1 }
 0x75b   :  { %v2908_v55 = vadd.f32 %v7539_v48, %v2907_v33  ;;  %5479 = vmatprep.mubr.msk.f32.mxu0 %vm466_vm3, %v2962_v61 }
 0x75c   :  { %5480 = vmatmul.mubr.msk.f32.gmra.mrb[124].mxu0 %vm466_vm3, %v2963_v63  ;;  %v2965_v22 = vmax.f32 %v2913_v24, 0.0 }
 0x75d   :  { %v2964_v29 = vmax.f32 %v2908_v55, 0.0 }
 0x75f   :  { %5482 = vmatprep.mubr.msk.f32.mxu0 %vm466_vm3, %v2964_v29 }
 0x760   :  { %5483 = vmatmul.mubr.msk.f32.gmra.mrb[126].mxu0 %vm466_vm3, %v2965_v22 }
 0x7b0   :  { %v5412_v31 = vpop.f32.mrb[78].mxu0 }
 0x7b1   :  { %v3199_v50 = vadd.f32 %v5412_v31, %v7644_v39  ;;  %v3193_v28 = vpop.f32.mrb[79].mxu0 }
 0x7b2   :  { %v3194_v48 = vadd.f32 %v7644_v39, %v3193_v28 }
 0x7b3   :  { %v4736_v20 = vmul.f32 -1.442695, %v3199_v50 }
 0x7b4   :  { %v4735_v42 = vmul.f32 -1.442695, %v3194_v48 }
 0x7b5   :  { %5635 = vpow2.f32 %v4736_v20 }
 0x7b6   :  { %5637 = vpow2.f32 %v4735_v42 }
 0x7b8   :  { %v5415_v14 = vpop.f32.mrb[80].mxu0 }
 0x7b9   :  { %v3209_v40 = vadd.f32 %v5415_v14, %v7644_v39  ;;  %v3203_v51 = vpop.f32.mrb[81].mxu0 }
 0x7ba   :  { %v3204_v27 = vadd.f32 %v7644_v39, %v3203_v51 }
 0x7bb   :  { %v4738_v3 = vmul.f32 -1.442695, %v3209_v40 }
 0x7bc   :  { %v4737_v2 = vmul.f32 -1.442695, %v3204_v27 }
 0x7bd   :  { %5639 = vpow2.f32 %v4738_v3 }
 0x7be   :  { %5641 = vpow2.f32 %v4737_v2 }
 0x7bf   :  { %v5636_v57 = vpop.eup %5635 }
 0x7c0   :  { %v5638_v38 = vpop.eup %5637  ;;  %v3593_v0 = vadd.f32 1.0, %v5636_v57  ;;  %v5418_v5 = vpop.f32.mrb[82].mxu0 }
 0x7c1   :  { %v3592_v53 = vadd.f32 1.0, %v5638_v38  ;;  %v3219_v16 = vadd.f32 %v5418_v5, %v7644_v39  ;;  %v3213_v9 = vpop.f32.mrb[83].mxu0 }
 0x7c2   :  { %v3214_v6 = vadd.f32 %v7644_v39, %v3213_v9 }
 0x7c3   :  { %5643 = vrcp.f32 %v3592_v53  ;;  %v4740_v11 = vmul.f32 -1.442695, %v3219_v16 }
 0x7c4   :  { %5645 = vrcp.f32 %v3593_v0  ;;  %v4739_v56 = vmul.f32 -1.442695, %v3214_v6 }
 0x7c5   :  { %5647 = vpow2.f32 %v4740_v11 }
 0x7c6   :  { %5649 = vpow2.f32 %v4739_v56 }
 0x7c7   :  { %v5640_v35 = vpop.eup %5639 }
 0x7c8   :  { %v5642_v43 = vpop.eup %5641  ;;  %v3595_v54 = vadd.f32 1.0, %v5640_v35  ;;  %v5421_v15 = vpop.f32.mrb[84].mxu0 }
 0x7c9   :  { %v3594_v32 = vadd.f32 1.0, %v5642_v43  ;;  %v3229_v34 = vadd.f32 %v5421_v15, %v7644_v39  ;;  %v3223_v58 = vpop.f32.mrb[85].mxu0 }
 0x7ca   :  { %v3224_v21 = vadd.f32 %v7644_v39, %v3223_v58 }
 0x7cb   :  { %5651 = vrcp.f32 %v3594_v32  ;;  %v4742_v60 = vmul.f32 -1.442695, %v3229_v34 }
 0x7cc   :  { %5653 = vrcp.f32 %v3595_v54  ;;  %v4741_v45 = vmul.f32 -1.442695, %v3224_v21 }
 0x7cd   :  { %v7654_v25 = vpop.eup %5643  ;;  %5655 = vpow2.f32 %v4742_v60 }
 0x7ce   :  { %v7656_v30 = vpop.eup %5645  ;;  %5657 = vpow2.f32 %v4741_v45  ;;  %5489 = vmatprep.mubr.msk.f32.mxu1 %vm197_vm1, %v7654_v25 }
 0x7cf   :  { %v5648_v47 = vpop.eup %5647  ;;  %5490 = vmatmul.mubr.msk.f32.vlgmr.msra.gmra.mrb[82].mxu1 %vm197_vm1, %v7656_v30 }
 0x7d0   :  { %v5650_v52 = vpop.eup %5649  ;;  %v3597_v19 = vadd.f32 1.0, %v5648_v47  ;;  %v5424_v41 = vpop.f32.mrb[86].mxu0 }
 0x7d1   :  { %v3596_v49 = vadd.f32 1.0, %v5650_v52  ;;  %v3239_v23 = vadd.f32 %v5424_v41, %v7644_v39  ;;  %v3233_v44 = vpop.f32.mrb[87].mxu0 }
 0x7d2   :  { %v3234_v36 = vadd.f32 %v7644_v39, %v3233_v44 }
 0x7d3   :  { %5659 = vrcp.f32 %v3596_v49  ;;  %v4744_v59 = vmul.f32 -1.442695, %v3239_v23 }
 0x7d4   :  { %5661 = vrcp.f32 %v3597_v19  ;;  %v4743_v7 = vmul.f32 -1.442695, %v3234_v36 }
 0x7d5   :  { %v7664_v17 = vpop.eup %5651  ;;  %5663 = vpow2.f32 %v4744_v59 }
 0x7d6   :  { %v7666_v37 = vpop.eup %5653  ;;  %5665 = vpow2.f32 %v4743_v7  ;;  %5492 = vmatprep.mubr.msk.f32.mxu1 %vm197_vm1, %v7664_v17 }
 0x7d7   :  { %v5656_v18 = vpop.eup %5655  ;;  %5493 = vmatmul.mubr.msk.f32.gmra.mrb[84].mxu1 %vm197_vm1, %v7666_v37 }
 0x7d8   :  { %v5658_v1 = vpop.eup %5657  ;;  %v3599_v4 = vadd.f32 1.0, %v5656_v18  ;;  %v5427_v8 = vpop.f32.mrb[88].mxu0 }
 0x7d9   :  { %v3598_v46 = vadd.f32 1.0, %v5658_v1  ;;  %v3249_v10 = vadd.f32 %v5427_v8, %v7644_v39  ;;  %v3243_v26 = vpop.f32.mrb[89].mxu0 }
 0x7da   :  { %v3244_v13 = vadd.f32 %v7644_v39, %v3243_v26 }
 0x7db   :  { %5667 = vrcp.f32 %v3598_v46  ;;  %v4746_v62 = vmul.f32 -1.442695, %v3249_v10 }
 0x7dc   :  { %5669 = vrcp.f32 %v3599_v4  ;;  %v4745_v61 = vmul.f32 -1.442695, %v3244_v13 }
 0x7dd   :  { %v7674_v12 = vpop.eup %5659  ;;  %5671 = vpow2.f32 %v4746_v62 }
 0x7de   :  { %v7676_v63 = vpop.eup %5661  ;;  %5673 = vpow2.f32 %v4745_v61  ;;  %5495 = vmatprep.mubr.msk.f32.mxu1 %vm197_vm1, %v7674_v12 }
 0x7df   :  { %v5664_v24 = vpop.eup %5663  ;;  %5496 = vmatmul.mubr.msk.f32.gmra.mrb[86].mxu1 %vm197_vm1, %v7676_v63 }
 0x7e0   :  { %v5666_v33 = vpop.eup %5665  ;;  %v3601_v55 = vadd.f32 1.0, %v5664_v24  ;;  %v5430_v29 = vpop.f32.mrb[90].mxu0 }
 0x7e1   :  { %v3600_v22 = vadd.f32 1.0, %v5666_v33  ;;  %v3259_v31 = vadd.f32 %v5430_v29, %v7644_v39  ;;  %v3253_v50 = vpop.f32.mrb[91].mxu0 }
 0x7e2   :  { %v3254_v28 = vadd.f32 %v7644_v39, %v3253_v50 }
 0x7e3   :  { %5675 = vrcp.f32 %v3600_v22  ;;  %v4748_v48 = vmul.f32 -1.442695, %v3259_v31 }
 0x7e4   :  { %5677 = vrcp.f32 %v3601_v55  ;;  %v4747_v20 = vmul.f32 -1.442695, %v3254_v28 }
 0x7e5   :  { %v7684_v42 = vpop.eup %5667  ;;  %5679 = vpow2.f32 %v4748_v48 }
 0x7e6   :  { %v7686_v14 = vpop.eup %5669  ;;  %5681 = vpow2.f32 %v4747_v20  ;;  %5498 = vmatprep.mubr.msk.f32.mxu1 %vm197_vm1, %v7684_v42 }
 0x7e7   :  { %v5672_v40 = vpop.eup %5671  ;;  %5499 = vmatmul.mubr.msk.f32.gmra.mrb[88].mxu1 %vm197_vm1, %v7686_v14 }
 0x7e8   :  { %v5674_v51 = vpop.eup %5673  ;;  %v3603_v27 = vadd.f32 1.0, %v5672_v40  ;;  %v5433_v3 = vpop.f32.mrb[92].mxu0 }
 0x7e9   :  { %v3602_v2 = vadd.f32 1.0, %v5674_v51  ;;  %v3269_v57 = vadd.f32 %v5433_v3, %v7644_v39  ;;  %v3263_v38 = vpop.f32.mrb[93].mxu0 }
 0x7ea   :  { %v3264_v0 = vadd.f32 %v7644_v39, %v3263_v38 }
 0x7eb   :  { %5683 = vrcp.f32 %v3602_v2  ;;  %v4750_v5 = vmul.f32 -1.442695, %v3269_v57 }
 0x7ec   :  { %5685 = vrcp.f32 %v3603_v27  ;;  %v4749_v53 = vmul.f32 -1.442695, %v3264_v0 }
 0x7ed   :  { %v7694_v16 = vpop.eup %5675  ;;  %5687 = vpow2.f32 %v4750_v5 }
 0x7ee   :  { %v7696_v9 = vpop.eup %5677  ;;  %5689 = vpow2.f32 %v4749_v53  ;;  %5501 = vmatprep.mubr.msk.f32.mxu1 %vm197_vm1, %v7694_v16 }
 0x7ef   :  { %v5680_v6 = vpop.eup %5679  ;;  %5502 = vmatmul.mubr.msk.f32.gmra.mrb[90].mxu1 %vm197_vm1, %v7696_v9 }
 0x7f0   :  { %v5682_v11 = vpop.eup %5681  ;;  %v3605_v56 = vadd.f32 1.0, %v5680_v6  ;;  %v5436_v35 = vpop.f32.mrb[94].mxu0 }
 0x7f1   :  { %v3604_v43 = vadd.f32 1.0, %v5682_v11  ;;  %v3279_v54 = vadd.f32 %v5436_v35, %v7644_v39  ;;  %v3273_v15 = vpop.f32.mrb[95].mxu0 }
 0x7f2   :  { %v3274_v32 = vadd.f32 %v7644_v39, %v3273_v15 }
 0x7f3   :  { %5691 = vrcp.f32 %v3604_v43  ;;  %v4752_v34 = vmul.f32 -1.442695, %v3279_v54 }
 0x7f4   :  { %5693 = vrcp.f32 %v3605_v56  ;;  %v4751_v58 = vmul.f32 -1.442695, %v3274_v32 }
 0x7f5   :  { %v7704_v21 = vpop.eup %5683  ;;  %5695 = vpow2.f32 %v4752_v34 }
 0x7f6   :  { %v7706_v60 = vpop.eup %5685  ;;  %5697 = vpow2.f32 %v4751_v58  ;;  %5504 = vmatprep.mubr.msk.f32.mxu1 %vm197_vm1, %v7704_v21 }
 0x7f7   :  { %v5688_v45 = vpop.eup %5687  ;;  %v5439_v47 = vpop.f32.mrb[96].mxu0  ;;  %5505 = vmatmul.mubr.msk.f32.gmra.mrb[92].mxu1 %vm197_vm1, %v7706_v60 }
 0x7f8   :  { %v5690_v52 = vpop.eup %5689  ;;  %v3607_v19 = vadd.f32 1.0, %v5688_v45  ;;  %v3289_v41 = vadd.f32 %v5439_v47, %v7644_v39  ;;  %v3283_v49 = vpop.f32.mrb[97].mxu0 }
 0x7f9   :  { %v3606_v23 = vadd.f32 1.0, %v5690_v52  ;;  %v3284_v44 = vadd.f32 %v7644_v39, %v3283_v49 }
 0x7fa   :  { %5699 = vrcp.f32 %v3607_v19  ;;  %v4754_v36 = vmul.f32 -1.442695, %v3289_v41 }
 0x7fb   :  { %5701 = vrcp.f32 %v3606_v23  ;;  %v4753_v59 = vmul.f32 -1.442695, %v3284_v44  ;;  %v5442_v7 = vpop.f32.mrb[98].mxu0 }
 0x7fc   :  { %5703 = vpow2.f32 %v4754_v36  ;;  %v3299_v18 = vadd.f32 %v5442_v7, %v7644_v39  ;;  %v3293_v1 = vpop.f32.mrb[99].mxu0 }
 0x7fd   :  { %v7715_v4 = vpop.eup %5691  ;;  %5705 = vpow2.f32 %v4753_v59  ;;  %v3294_v8 = vadd.f32 %v7644_v39, %v3293_v1 }
 0x7fe   :  { %v7718_v46 = vpop.eup %5693  ;;  %v4756_v10 = vmul.f32 -1.442695, %v3299_v18  ;;  %5507 = vmatprep.mubr.msk.f32.mxu1 %vm197_vm1, %v7715_v4 }
 0x7ff   :  { %v5696_v26 = vpop.eup %5695  ;;  %v4755_v13 = vmul.f32 -1.442695, %v3294_v8  ;;  %v5445_v62 = vpop.f32.mrb[100].mxu0  ;;  %5508 = vmatmul.mubr.msk.f32.gmra.mrb[94].mxu1 %vm197_vm1, %v7718_v46 }
 0x800   :  { %v5698_v61 = vpop.eup %5697  ;;  %v3609_v24 = vadd.f32 1.0, %v5696_v26  ;;  %5707 = vpow2.f32 %v4756_v10  ;;  %v3309_v33 = vadd.f32 %v5445_v62, %v7644_v39  ;;  %v3303_v55 = vpop.f32.mrb[101].mxu0 }
 0x801   :  { %v3608_v29 = vadd.f32 1.0, %v5698_v61  ;;  %5709 = vpow2.f32 %v4755_v13  ;;  %v3304_v22 = vadd.f32 %v7644_v39, %v3303_v55 }
 0x802   :  { %5711 = vrcp.f32 %v3609_v24  ;;  %v4758_v31 = vmul.f32 -1.442695, %v3309_v33 }
 0x803   :  { %5713 = vrcp.f32 %v3608_v29  ;;  %v4757_v50 = vmul.f32 -1.442695, %v3304_v22  ;;  %v5448_v28 = vpop.f32.mrb[102].mxu0 }
 0x804   :  { %v7726_v48 = vpop.eup %5699  ;;  %5715 = vpow2.f32 %v4758_v31  ;;  %v3319_v20 = vadd.f32 %v5448_v28, %v7644_v39  ;;  %v3313_v40 = vpop.f32.mrb[103].mxu0 }
 0x805   :  { %v7729_v51 = vpop.eup %5701  ;;  %5717 = vpow2.f32 %v4757_v50  ;;  %v3314_v27 = vadd.f32 %v7644_v39, %v3313_v40 }
 0x806   :  { %v5704_v3 = vpop.eup %5703  ;;  %v4760_v2 = vmul.f32 -1.442695, %v3319_v20  ;;  %5510 = vmatprep.mubr.msk.f32.mxu1 %vm197_vm1, %v7729_v51 }
 0x807   :  { %v5706_v57 = vpop.eup %5705  ;;  %v3611_v38 = vadd.f32 1.0, %v5704_v3  ;;  %v4759_v0 = vmul.f32 -1.442695, %v3314_v27  ;;  %v5451_v5 = vpop.f32.mrb[104].mxu0  ;;  %5511 = vmatmul.mubr.msk.f32.gmra.mrb[96].mxu1 %vm197_vm1, %v7726_v48 }
 0x808   :  { %v3610_v53 = vadd.f32 1.0, %v5706_v57  ;;  %5719 = vpow2.f32 %v4760_v2  ;;  %v3329_v6 = vadd.f32 %v5451_v5, %v7644_v39  ;;  %v3323_v11 = vpop.f32.mrb[105].mxu0 }
 0x809   :  { %5721 = vrcp.f32 %v3611_v38  ;;  %v3324_v56 = vadd.f32 %v7644_v39, %v3323_v11 }
 0x80a   :  { %v5708_v35 = vpop.eup %5707  ;;  %5723 = vrcp.f32 %v3610_v53  ;;  %v4762_v43 = vmul.f32 -1.442695, %v3329_v6 }
 0x80b   :  { %v5710_v54 = vpop.eup %5709  ;;  %v3613_v15 = vadd.f32 1.0, %v5708_v35  ;;  %5725 = vpow2.f32 %v4759_v0  ;;  %v4761_v32 = vmul.f32 -1.442695, %v3324_v56  ;;  %v5454_v34 = vpop.f32.mrb[106].mxu0 }
 0x80c   :  { %v7738_v58 = vpop.eup %5711  ;;  %v3612_v45 = vadd.f32 1.0, %v5710_v54  ;;  %5727 = vpow2.f32 %v4762_v43  ;;  %v3339_v47 = vadd.f32 %v5454_v34, %v7644_v39  ;;  %v3333_v52 = vpop.f32.mrb[107].mxu0 }
 0x80d   :  { %v7741_v19 = vpop.eup %5713  ;;  %5729 = vrcp.f32 %v3613_v15  ;;  %v3334_v41 = vadd.f32 %v7644_v39, %v3333_v52 }
 0x80e   :  { %v5716_v49 = vpop.eup %5715  ;;  %5731 = vrcp.f32 %v3612_v45  ;;  %v4764_v23 = vmul.f32 -1.442695, %v3339_v47  ;;  %5513 = vmatprep.mubr.msk.f32.mxu1 %vm197_vm1, %v7741_v19 }
 0x80f   :  { %v5718_v44 = vpop.eup %5717  ;;  %v3615_v36 = vadd.f32 1.0, %v5716_v49  ;;  %5733 = vpow2.f32 %v4761_v32  ;;  %v4763_v59 = vmul.f32 -1.442695, %v3334_v41  ;;  %v5457_v7 = vpop.f32.mrb[108].mxu0  ;;  %5514 = vmatmul.mubr.msk.f32.gmra.mrb[98].mxu1 %vm197_vm1, %v7738_v58 }
 0x810   :  { %v3614_v18 = vadd.f32 1.0, %v5718_v44  ;;  %5735 = vpow2.f32 %v4764_v23  ;;  %v3349_v1 = vadd.f32 %v5457_v7, %v7644_v39  ;;  %v3343_v8 = vpop.f32.mrb[109].mxu0 }
 0x811   :  { %5737 = vrcp.f32 %v3615_v36  ;;  %v3344_v10 = vadd.f32 %v7644_v39, %v3343_v8 }
 0x812   :  { %v5720_v26 = vpop.eup %5719  ;;  %5739 = vrcp.f32 %v3614_v18  ;;  %v4766_v13 = vmul.f32 -1.442695, %v3349_v1 }
 0x813   :  { %v7750_v62 = vpop.eup %5721  ;;  %v3617_v61 = vadd.f32 1.0, %v5720_v26  ;;  %5741 = vpow2.f32 %v4763_v59  ;;  %v4765_v24 = vmul.f32 -1.442695, %v3344_v10  ;;  %v5460_v33 = vpop.f32.mrb[110].mxu0 }
 0x814   :  { %v7752_v55 = vpop.eup %5723  ;;  %5743 = vpow2.f32 %v4766_v13  ;;  %v3359_v29 = vadd.f32 %v5460_v33, %v7644_v39  ;;  %v3353_v22 = vpop.f32.mrb[111].mxu0 }
 0x815   :  { %v5726_v31 = vpop.eup %5725  ;;  %v3354_v50 = vadd.f32 %v7644_v39, %v3353_v22  ;;  %5516 = vmatprep.mubr.msk.f32.mxu1 %vm197_vm1, %v7752_v55  ;;  %5745 = vpow2.f32 %v4765_v24 }
 0x816   :  { %v5728_v28 = vpop.eup %5727  ;;  %v3616_v20 = vadd.f32 1.0, %v5726_v31  ;;  %v4768_v40 = vmul.f32 -1.442695, %v3359_v29  ;;  %5517 = vmatmul.mubr.msk.f32.gmra.mrb[100].mxu1 %vm197_vm1, %v7750_v62  ;;  %5747 = vrcp.f32 %v3617_v61 }
 0x817   :  { %v7760_v27 = vpop.eup %5729  ;;  %v3619_v3 = vadd.f32 1.0, %v5728_v28  ;;  %v4767_v2 = vmul.f32 -1.442695, %v3354_v50  ;;  %v5463_v57 = vpop.f32.mrb[112].mxu0 }
 0x818   :  { %v7762_v38 = vpop.eup %5731  ;;  %5749 = vrcp.f32 %v3616_v20  ;;  %v3369_v0 = vadd.f32 %v5463_v57, %v7644_v39  ;;  %v3363_v5 = vpop.f32.mrb[113].mxu0 }
 0x819   :  { %v5734_v53 = vpop.eup %5733  ;;  %5751 = vrcp.f32 %v3619_v3  ;;  %v3364_v6 = vadd.f32 %v7644_v39, %v3363_v5  ;;  %5519 = vmatprep.mubr.msk.f32.mxu1 %vm197_vm1, %v7762_v38 }
 0x81a   :  { %v5736_v11 = vpop.eup %5735  ;;  %v3618_v56 = vadd.f32 1.0, %v5734_v53  ;;  %5753 = vpow2.f32 %v4768_v40  ;;  %v4770_v35 = vmul.f32 -1.442695, %v3369_v0  ;;  %5520 = vmatmul.mubr.msk.f32.gmra.mrb[102].mxu1 %vm197_vm1, %v7760_v27 }
 0x81b   :  { %v7770_v43 = vpop.eup %5737  ;;  %v3621_v54 = vadd.f32 1.0, %v5736_v11  ;;  %5755 = vpow2.f32 %v4767_v2  ;;  %v4769_v15 = vmul.f32 -1.442695, %v3364_v6  ;;  %v5466_v32 = vpop.f32.mrb[114].mxu0 }
 0x81c   :  { %v7772_v34 = vpop.eup %5739  ;;  %5757 = vrcp.f32 %v3618_v56  ;;  %v3379_v45 = vadd.f32 %v5466_v32, %v7644_v39  ;;  %v3373_v47 = vpop.f32.mrb[115].mxu0 }
 0x81d   :  { %v5742_v52 = vpop.eup %5741  ;;  %5759 = vrcp.f32 %v3621_v54  ;;  %v3374_v41 = vadd.f32 %v7644_v39, %v3373_v47  ;;  %5522 = vmatprep.mubr.msk.f32.mxu1 %vm197_vm1, %v7772_v34 }
 0x81e   :  { %v5744_v49 = vpop.eup %5743  ;;  %v3620_v23 = vadd.f32 1.0, %v5742_v52  ;;  %5761 = vpow2.f32 %v4770_v35  ;;  %v4772_v44 = vmul.f32 -1.442695, %v3379_v45  ;;  %5523 = vmatmul.mubr.msk.f32.gmra.mrb[104].mxu1 %vm197_vm1, %v7770_v43 }
 0x81f   :  { %v3623_v36 = vadd.f32 1.0, %v5744_v49  ;;  %5763 = vpow2.f32 %v4769_v15  ;;  %v5469_v59 = vpop.f32.mrb[116].mxu0  ;;  %v5746_v7 = vpop.eup %5745  ;;  %v4771_v18 = vmul.f32 -1.442695, %v3374_v41 }
 0x820   :  { %5765 = vrcp.f32 %v3620_v23  ;;  %v3389_v1 = vadd.f32 %v5469_v59, %v7644_v39  ;;  %v3383_v8 = vpop.f32.mrb[117].mxu0  ;;  %v7781_v10 = vpop.eup %5747  ;;  %v3622_v26 = vadd.f32 1.0, %v5746_v7 }
 0x821   :  { %5767 = vrcp.f32 %v3623_v36  ;;  %v3384_v13 = vadd.f32 %v7644_v39, %v3383_v8 }
 0x822   :  { %v7784_v61 = vpop.eup %5749  ;;  %5769 = vpow2.f32 %v4772_v44  ;;  %v4774_v24 = vmul.f32 -1.442695, %v3389_v1 }
 0x823   :  { %v7786_v33 = vpop.eup %5751  ;;  %5771 = vrcp.f32 %v3622_v26  ;;  %v4773_v29 = vmul.f32 -1.442695, %v3384_v13  ;;  %5525 = vmatprep.mubr.msk.f32.mxu1 %vm197_vm1, %v7784_v61  ;;  %v5472_v22 = vpop.f32.mrb[118].mxu0 }
 0x824   :  { %v5754_v31 = vpop.eup %5753  ;;  %5773 = vpow2.f32 %v4771_v18  ;;  %5526 = vmatmul.mubr.msk.f32.gmra.mrb[106].mxu1 %vm197_vm1, %v7781_v10  ;;  %v3399_v50 = vadd.f32 %v5472_v22, %v7644_v39  ;;  %v3393_v28 = vpop.f32.mrb[119].mxu0 }
 0x825   :  { %v5756_v20 = vpop.eup %5755  ;;  %v3625_v40 = vadd.f32 1.0, %v5754_v31  ;;  %5775 = vpow2.f32 %v4774_v24  ;;  %v3394_v3 = vadd.f32 %v7644_v39, %v3393_v28 }
 0x826   :  { %v7794_v2 = vpop.eup %5757  ;;  %v3624_v57 = vadd.f32 1.0, %v5756_v20  ;;  %5777 = vpow2.f32 %v4773_v29  ;;  %v4776_v0 = vmul.f32 -1.442695, %v3399_v50 }
 0x827   :  { %v7796_v5 = vpop.eup %5759  ;;  %5779 = vrcp.f32 %v3625_v40  ;;  %v4775_v53 = vmul.f32 -1.442695, %v3394_v3  ;;  %5528 = vmatprep.mubr.msk.f32.mxu1 %vm197_vm1, %v7794_v2  ;;  %v5475_v6 = vpop.f32.mrb[120].mxu0 }
 0x828   :  { %v5762_v11 = vpop.eup %5761  ;;  %5781 = vrcp.f32 %v3624_v57  ;;  %5529 = vmatmul.mubr.msk.f32.gmra.mrb[108].mxu1 %vm197_vm1, %v7786_v33  ;;  %v3409_v56 = vadd.f32 %v5475_v6, %v7644_v39  ;;  %v3403_v35 = vpop.f32.mrb[121].mxu0 }
 0x829   :  { %v5764_v54 = vpop.eup %5763  ;;  %v3627_v15 = vadd.f32 1.0, %v5762_v11  ;;  %5783 = vpow2.f32 %v4776_v0  ;;  %v3404_v32 = vadd.f32 %v7644_v39, %v3403_v35 }
 0x82a   :  { %v7804_v45 = vpop.eup %5765  ;;  %v3626_v47 = vadd.f32 1.0, %v5764_v54  ;;  %5785 = vpow2.f32 %v4775_v53  ;;  %v4778_v52 = vmul.f32 -1.442695, %v3409_v56 }
 0x82b   :  { %v7806_v41 = vpop.eup %5767  ;;  %5787 = vrcp.f32 %v3627_v15  ;;  %v4777_v49 = vmul.f32 -1.442695, %v3404_v32  ;;  %5531 = vmatprep.mubr.msk.f32.mxu1 %vm197_vm1, %v7804_v45  ;;  %v5478_v23 = vpop.f32.mrb[122].mxu0 }
 0x82c   :  { %v5770_v44 = vpop.eup %5769  ;;  %5789 = vrcp.f32 %v3626_v47  ;;  %5532 = vmatmul.mubr.msk.f32.gmra.mrb[110].mxu1 %vm197_vm1, %v7796_v5  ;;  %v3419_v36 = vadd.f32 %v5478_v23, %v7644_v39  ;;  %v3413_v59 = vpop.f32.mrb[123].mxu0 }
 0x82d   :  { %v7813_v7 = vpop.eup %5771  ;;  %5791 = vpow2.f32 %v4778_v52  ;;  %v3414_v18 = vadd.f32 %v7644_v39, %v3413_v59  ;;  %v3629_v8 = vadd.f32 1.0, %v5770_v44 }
 0x82e   :  { %v5774_v1 = vpop.eup %5773  ;;  %5793 = vpow2.f32 %v4777_v49  ;;  %v4780_v26 = vmul.f32 -1.442695, %v3419_v36  ;;  %5534 = vmatprep.mubr.msk.f32.mxu1 %vm197_vm1, %v7813_v7 }
 0x82f   :  { %v5776_v13 = vpop.eup %5775  ;;  %v3628_v24 = vadd.f32 1.0, %v5774_v1  ;;  %v5481_v29 = vpop.f32.mrb[124].mxu0  ;;  %v4779_v31 = vmul.f32 -1.442695, %v3414_v18 }
 0x830   :  { %v5778_v22 = vpop.eup %5777  ;;  %5795 = vpow2.f32 %v4780_v26  ;;  %5535 = vmatmul.mubr.msk.f32.gmra.mrb[112].mxu1 %vm197_vm1, %v7806_v41  ;;  %v3429_v50 = vadd.f32 %v5481_v29, %v7644_v39  ;;  %v3423_v28 = vpop.f32.mrb[125].mxu0  ;;  %v3631_v0 = vadd.f32 1.0, %v5776_v13 }
 0x831   :  { %v7821_v20 = vpop.eup %5779  ;;  %5797 = vrcp.f32 %v3628_v24  ;;  %v3630_v40 = vadd.f32 1.0, %v5778_v22  ;;  %v3424_v3 = vadd.f32 %v7644_v39, %v3423_v28 }
 0x832   :  { %v7824_v57 = vpop.eup %5781  ;;  %5799 = vrcp.f32 %v3629_v8  ;;  %v4782_v53 = vmul.f32 -1.442695, %v3429_v50 }
 0x833   :  { %v5784_v6 = vpop.eup %5783  ;;  %5801 = vrcp.f32 %v3630_v40  ;;  %5537 = vmatprep.mubr.msk.f32.mxu1 %vm197_vm1, %v7824_v57  ;;  %v5484_v11 = vpop.f32.mrb[126].mxu0  ;;  %v4781_v35 = vmul.f32 -1.442695, %v3424_v3 }
 0x834   :  { %v5786_v56 = vpop.eup %5785  ;;  %5803 = vpow2.f32 %v4779_v31  ;;  %5538 = vmatmul.mubr.msk.f32.gmra.mrb[114].mxu1 %vm197_vm1, %v7821_v20  ;;  %v3439_v54 = vadd.f32 %v5484_v11, %v7644_v39  ;;  %v3433_v15 = vpop.f32.mrb[127].mxu0  ;;  %v3633_v23 = vadd.f32 1.0, %v5784_v6 }
 0x835   :  { %v7831_v32 = vpop.eup %5787  ;;  %v3632_v47 = vadd.f32 1.0, %v5786_v56  ;;  %5805 = vpow2.f32 %v4782_v53  ;;  %v3434_v52 = vadd.f32 %v7644_v39, %v3433_v15 }
 0x836   :  { %v7834_v49 = vpop.eup %5789  ;;  %5807 = vrcp.f32 %v3631_v0  ;;  %v4784_v44 = vmul.f32 -1.442695, %v3439_v54 }
 0x837   :  { %v5792_v36 = vpop.eup %5791  ;;  %5809 = vrcp.f32 %v3632_v47  ;;  %5540 = vmatprep.mubr.msk.f32.mxu1 %vm197_vm1, %v7834_v49  ;;  %v4783_v18 = vmul.f32 -1.442695, %v3434_v52 }
 0x838   :  { %v5794_v59 = vpop.eup %5793  ;;  %5811 = vpow2.f32 %v4781_v35  ;;  %5541 = vmatmul.mubr.msk.f32.gmra.mrb[116].mxu1 %vm197_vm1, %v7831_v32  ;;  %v3635_v39 = vadd.f32 1.0, %v5792_v36 }
 0x839   :  { %v3634_v1 = vadd.f32 1.0, %v5794_v59  ;;  %5813 = vpow2.f32 %v4784_v44 }
 0x83a   :  { %v5796_v8 = vpop.eup %5795  ;;  %5815 = vrcp.f32 %v3633_v23 }
 0x83b   :  { %v7840_v26 = vpop.eup %5797  ;;  %5817 = vrcp.f32 %v3634_v1  ;;  %v3637_v22 = vadd.f32 1.0, %v5796_v8 }
 0x83c   :  { %v7842_v13 = vpop.eup %5799  ;;  %5819 = vpow2.f32 %v4783_v18  ;;  %5543 = vmatprep.mubr.msk.f32.mxu1 %vm197_vm1, %v7840_v26 }
 0x83d   :  { %v7846_v24 = vpop.eup %5801  ;;  %5544 = vmatmul.mubr.msk.f32.gmra.mrb[118].mxu1 %vm197_vm1, %v7842_v13  ;;  %5821 = vrcp.f32 %v3635_v39 }
 0x83e   :  { %v5804_v29 = vpop.eup %5803  ;;  %5546 = vmatprep.mubr.msk.f32.mxu1 %vm197_vm1, %v7846_v24 }
 0x83f   :  { %v5806_v31 = vpop.eup %5805  ;;  %v3636_v50 = vadd.f32 1.0, %v5804_v29 }
 0x840   :  { %v7852_v28 = vpop.eup %5807  ;;  %v3639_v0 = vadd.f32 1.0, %v5806_v31 }
 0x841   :  { %v7854_v40 = vpop.eup %5809  ;;  %5823 = vrcp.f32 %v3636_v50  ;;  %5547 = vmatmul.mubr.msk.f32.gmra.mrb[120].mxu1 %vm197_vm1, %v7852_v28 }
 0x842   :  { %v5812_v3 = vpop.eup %5811  ;;  %5825 = vrcp.f32 %v3637_v22  ;;  %5549 = vmatprep.mubr.msk.f32.mxu1 %vm197_vm1, %v7854_v40 }
 0x843   :  { %v5814_v53 = vpop.eup %5813  ;;  %v3638_v6 = vadd.f32 1.0, %v5812_v3 }
 0x844   :  { %v7860_v11 = vpop.eup %5815  ;;  %v3641_v54 = vadd.f32 1.0, %v5814_v53 }
 0x845   :  { %v7862_v56 = vpop.eup %5817  ;;  %5827 = vrcp.f32 %v3638_v6  ;;  %5550 = vmatmul.mubr.msk.f32.gmra.mrb[122].mxu1 %vm197_vm1, %v7860_v11 }
 0x846   :  { %v5820_v35 = vpop.eup %5819  ;;  %5829 = vrcp.f32 %v3639_v0  ;;  %5552 = vmatprep.mubr.msk.f32.mxu1 %vm197_vm1, %v7862_v56 }
 0x847   :  { %v3640_v15 = vadd.f32 1.0, %v5820_v35  ;;  %v7868_v47 = vpop.eup %5821 }
 0x849   :  { %5831 = vrcp.f32 %v3640_v15  ;;  %5553 = vmatmul.mubr.msk.f32.gmra.mrb[124].mxu1 %vm197_vm1, %v7868_v47 }
 0x84a   :  { %5833 = vrcp.f32 %v3641_v54 }
 0x84b   :  { %v7872_v52 = vpop.eup %5823 }
 0x84c   :  { %v7874_v23 = vpop.eup %5825  ;;  %5555 = vmatprep.mubr.msk.f32.mxu1 %vm197_vm1, %v7872_v52 }
 0x84d   :  { %5556 = vmatmul.mubr.msk.f32.gmra.mrb[126].mxu1 %vm197_vm1, %v7874_v23 }
 0x84f   :  { %v7880_v44 = vpop.eup %5827 }
 0x850   :  { %v7882_v36 = vpop.eup %5829  ;;  %5558 = vmatprep.mubr.msk.f32.mxu1 %vm197_vm1, %v7880_v44 }
 0x851   :  { %5559 = vmatmul.mubr.msk.f32.gmra.mrb[128].mxu1 %vm197_vm1, %v7882_v36 }
 0x853   :  { %v7888_v59 = vpop.eup %5831 }
 0x854   :  { %v7890_v18 = vpop.eup %5833  ;;  %5561 = vmatprep.mubr.msk.f32.mxu1 %vm197_vm1, %v7888_v59 }
 0x855   :  { %5562 = vmatmul.mubr.msk.f32.gmra.mrb[130].mxu1 %vm197_vm1, %v7890_v18 }
 0x8a2   :  { %v5491_v1 = vpop.f32.mrb[82].mxu1 }
 0x8a3   :  { %4259 = vrot.lane.b32.xlu1 %v5491_v1, %s6083_s6  ;;  %v3958_v8 = vpop.f32.mrb[83].mxu1 }
 0x8a4   :  { %4257 = vrot.lane.b32.xlu0 %v3958_v8, %s6083_s6 }
 0x8aa   :  { %v5494_v39 = vpop.f32.mrb[84].mxu1 }
 0x8ab   :  { %4263 = vrot.lane.b32.xlu1 %v5494_v39, %s6083_s6  ;;  %v3968_v29 = vpop.f32.mrb[85].mxu1 }
 0x8ac   :  { %4261 = vrot.lane.b32.xlu0 %v3968_v29, %s6083_s6 }
 0x8b2   :  { %v5497_v22 = vpop.f32.mrb[86].mxu1 }
 0x8b3   :  { %4267 = vrot.lane.b32.xlu1 %v5497_v22, %s6083_s6  ;;  %v3978_v31 = vpop.f32.mrb[87].mxu1 }
 0x8b4   :  { %4265 = vrot.lane.b32.xlu0 %v3978_v31, %s6083_s6 }
 0x8ba   :  { %v5500_v50 = vpop.f32.mrb[88].mxu1 }
 0x8bb   :  { %4271 = vrot.lane.b32.xlu1 %v5500_v50, %s6083_s6  ;;  %v3988_v3 = vpop.f32.mrb[89].mxu1 }
 0x8bc   :  { %4269 = vrot.lane.b32.xlu0 %v3988_v3, %s6083_s6 }
 0x8c2   :  { %v5503_v0 = vpop.f32.mrb[90].mxu1 }
 0x8c3   :  { %4275 = vrot.lane.b32.xlu1 %v5503_v0, %s6083_s6  ;;  %v3998_v53 = vpop.f32.mrb[91].mxu1 }
 0x8c4   :  { %4273 = vrot.lane.b32.xlu0 %v3998_v53, %s6083_s6 }
 0x8ca   :  { %v5506_v6 = vpop.f32.mrb[92].mxu1 }
 0x8cb   :  { %4279 = vrot.lane.b32.xlu1 %v5506_v6, %s6083_s6  ;;  %v4008_v35 = vpop.f32.mrb[93].mxu1 }
 0x8cc   :  { %4277 = vrot.lane.b32.xlu0 %v4008_v35, %s6083_s6 }
 0x8d2   :  { %v5509_v54 = vpop.f32.mrb[94].mxu1 }
 0x8d3   :  { %4283 = vrot.lane.b32.xlu1 %v5509_v54, %s6083_s6  ;;  %v4018_v15 = vpop.f32.mrb[95].mxu1 }
 0x8d4   :  { %4281 = vrot.lane.b32.xlu0 %v4018_v15, %s6083_s6 }
 0x8da   :  { %v5512_v1 = vpop.f32.mrb[96].mxu1 }
 0x8db   :  { %4287 = vrot.lane.b32.xlu1 %v5512_v1, %s6083_s6  ;;  %v4028_v8 = vpop.f32.mrb[97].mxu1 }
 0x8dc   :  { %4285 = vrot.lane.b32.xlu0 %v4028_v8, %s6083_s6 }
 0x8e2   :  { %v5515_v39 = vpop.f32.mrb[98].mxu1 }
 0x8e3   :  { %4291 = vrot.lane.b32.xlu1 %v5515_v39, %s6083_s6  ;;  %v4038_v29 = vpop.f32.mrb[99].mxu1 }
 0x8e4   :  { %4289 = vrot.lane.b32.xlu0 %v4038_v29, %s6083_s6 }
 0x8e9   :  { %v5518_v22 = vpop.f32.mrb[100].mxu1 }
 0x8ea   :  { %4295 = vrot.lane.b32.xlu1 %v5518_v22, %s6083_s6  ;;  %v4048_v31 = vpop.f32.mrb[101].mxu1 }
 0x8eb   :  { %4293 = vrot.lane.b32.xlu0 %v4048_v31, %s6083_s6 }
 0x8ed   :  { %v5521_v50 = vpop.f32.mrb[102].mxu1 }
 0x8ee   :  { %4299 = vrot.lane.b32.xlu1 %v5521_v50, %s6083_s6  ;;  %v4058_v3 = vpop.f32.mrb[103].mxu1 }
 0x8ef   :  { %4297 = vrot.lane.b32.xlu0 %v4058_v3, %s6083_s6 }
 0x8f1   :  { %v5524_v0 = vpop.f32.mrb[104].mxu1 }
 0x8f2   :  { %4303 = vrot.lane.b32.xlu1 %v5524_v0, %s6083_s6  ;;  %v4068_v53 = vpop.f32.mrb[105].mxu1 }
 0x8f3   :  { %4301 = vrot.lane.b32.xlu0 %v4068_v53, %s6083_s6 }
 0x8f7   :  { %v5527_v6 = vpop.f32.mrb[106].mxu1 }
 0x8f8   :  { %4307 = vrot.lane.b32.xlu1 %v5527_v6, %s6083_s6  ;;  %v4078_v35 = vpop.f32.mrb[107].mxu1 }
 0x8f9   :  { %4305 = vrot.lane.b32.xlu0 %v4078_v35, %s6083_s6 }
 0x8fb   :  { %v5530_v54 = vpop.f32.mrb[108].mxu1 }
 0x8fc   :  { %4311 = vrot.lane.b32.xlu1 %v5530_v54, %s6083_s6  ;;  %v4088_v15 = vpop.f32.mrb[109].mxu1 }
 0x8fd   :  { %4309 = vrot.lane.b32.xlu0 %v4088_v15, %s6083_s6 }
 0x8ff   :  { %v5533_v1 = vpop.f32.mrb[110].mxu1 }
 0x900   :  { %4315 = vrot.lane.b32.xlu1 %v5533_v1, %s6083_s6  ;;  %v4098_v8 = vpop.f32.mrb[111].mxu1 }
 0x901   :  { %4313 = vrot.lane.b32.xlu0 %v4098_v8, %s6083_s6 }
 0x903   :  { %v5536_v39 = vpop.f32.mrb[112].mxu1 }
 0x904   :  { %4319 = vrot.lane.b32.xlu1 %v5536_v39, %s6083_s6  ;;  %v4108_v29 = vpop.f32.mrb[113].mxu1 }
 0x905   :  { %4317 = vrot.lane.b32.xlu0 %v4108_v29, %s6083_s6 }
 0x907   :  { %v5539_v22 = vpop.f32.mrb[114].mxu1 }
 0x908   :  { %4323 = vrot.lane.b32.xlu1 %v5539_v22, %s6083_s6  ;;  %v4118_v31 = vpop.f32.mrb[115].mxu1 }
 0x909   :  { %4321 = vrot.lane.b32.xlu0 %v4118_v31, %s6083_s6 }
 0x90b   :  { %v5542_v50 = vpop.f32.mrb[116].mxu1 }
 0x90c   :  { %4327 = vrot.lane.b32.xlu1 %v5542_v50, %s6083_s6  ;;  %v4128_v3 = vpop.f32.mrb[117].mxu1 }
 0x90d   :  { %4325 = vrot.lane.b32.xlu0 %v4128_v3, %s6083_s6 }
 0x910   :  { %v5545_v0 = vpop.f32.mrb[118].mxu1 }
 0x911   :  { %4331 = vrot.lane.b32.xlu1 %v5545_v0, %s6083_s6  ;;  %v4138_v53 = vpop.f32.mrb[119].mxu1 }
 0x912   :  { %4329 = vrot.lane.b32.xlu0 %v4138_v53, %s6083_s6 }
 0x914   :  { %v5548_v6 = vpop.f32.mrb[120].mxu1 }
 0x915   :  { %4335 = vrot.lane.b32.xlu1 %v5548_v6, %s6083_s6  ;;  %v4148_v35 = vpop.f32.mrb[121].mxu1  ;;  %v4260_v54 = vpop.permute.xlu1 %4259 }
 0x916   :  { %4333 = vrot.lane.b32.xlu0 %v4148_v35, %s6083_s6  ;;  %v4408_v15 = vsel %vm197_vm1, %v7656_v30, %v4260_v54  ;;  %v4258_v1 = vpop.permute.xlu0 %4257 }
 0x917   :  { %4458 = vst.msk [vmem:[%s8341_s24 + $0x8] sm:$0xff] %vm466_vm3, %v4408_v15  ;;  %v4407_v8 = vsel %vm197_vm1, %v7654_v25, %v4258_v1 }
 0x918   :  { %v5551_v39 = vpop.f32.mrb[122].mxu1  ;;  %4457 = vst.msk [vmem:[%s8341_s24] sm:$0xff] %vm466_vm3, %v4407_v8 }
 0x919   :  { %4339 = vrot.lane.b32.xlu1 %v5551_v39, %s6083_s6  ;;  %v4158_v29 = vpop.f32.mrb[123].mxu1 }
 0x91a   :  { %4337 = vrot.lane.b32.xlu0 %v4158_v29, %s6083_s6 }
 0x91c   :  { %v5554_v30 = vpop.f32.mrb[124].mxu1 }
 0x91d   :  { %4343 = vrot.lane.b32.xlu1 %v5554_v30, %s6083_s6  ;;  %v4168_v22 = vpop.f32.mrb[125].mxu1  ;;  %v4264_v31 = vpop.permute.xlu1 %4263 }
 0x91e   :  { %4341 = vrot.lane.b32.xlu0 %v4168_v22, %s6083_s6  ;;  %v4410_v25 = vsel %vm197_vm1, %v7666_v37, %v4264_v31  ;;  %v4262_v50 = vpop.permute.xlu0 %4261 }
 0x91f   :  { %4460 = vst.msk [vmem:[%s8341_s24 + $0x18] sm:$0xff] %vm466_vm3, %v4410_v25  ;;  %v4409_v3 = vsel %vm197_vm1, %v7664_v17, %v4262_v50 }
 0x920   :  { %v5557_v0 = vpop.f32.mrb[126].mxu1  ;;  %4459 = vst.msk [vmem:[%s8341_s24 + $0x10] sm:$0xff] %vm466_vm3, %v4409_v3 }
 0x921   :  { %4347 = vrot.lane.b32.xlu1 %v5557_v0, %s6083_s6  ;;  %v4178_v53 = vpop.f32.mrb[127].mxu1 }
 0x922   :  { %4345 = vrot.lane.b32.xlu0 %v4178_v53, %s6083_s6 }
 0x924   :  { %v5560_v37 = vpop.f32.mrb[128].mxu1 }
 0x925   :  { %4351 = vrot.lane.b32.xlu1 %v5560_v37, %s6083_s6  ;;  %v4188_v6 = vpop.f32.mrb[129].mxu1  ;;  %v4268_v35 = vpop.permute.xlu1 %4267 }
 0x926   :  { %4349 = vrot.lane.b32.xlu0 %v4188_v6, %s6083_s6  ;;  %v4412_v17 = vsel %vm197_vm1, %v7676_v63, %v4268_v35  ;;  %v4266_v54 = vpop.permute.xlu0 %4265 }
 0x927   :  { %4462 = vst.msk [vmem:[%s8341_s24 + $0x28] sm:$0xff] %vm466_vm3, %v4412_v17  ;;  %v4411_v15 = vsel %vm197_vm1, %v7674_v12, %v4266_v54 }
 0x928   :  { %v5563_v1 = vpop.f32.mrb[130].mxu1  ;;  %4461 = vst.msk [vmem:[%s8341_s24 + $0x20] sm:$0xff] %vm466_vm3, %v4411_v15 }
 0x929   :  { %4355 = vrot.lane.b32.xlu1 %v5563_v1, %s6083_s6  ;;  %v4198_v8 = vpop.f32.mrb[131].mxu1 }
 0x92a   :  { %4353 = vrot.lane.b32.xlu0 %v4198_v8, %s6083_s6 }
 0x92d   :  { %v4272_v63 = vpop.permute.xlu1 %4271 }
 0x92e   :  { %v4414_v39 = vsel %vm197_vm1, %v7686_v14, %v4272_v63  ;;  %v4270_v29 = vpop.permute.xlu0 %4269 }
 0x92f   :  { %4464 = vst.msk [vmem:[%s8341_s24 + $0x38] sm:$0xff] %vm466_vm3, %v4414_v39  ;;  %v4413_v12 = vsel %vm197_vm1, %v7684_v42, %v4270_v29 }
 0x930   :  { %4463 = vst.msk [vmem:[%s8341_s24 + $0x30] sm:$0xff] %vm466_vm3, %v4413_v12 }
 0x935   :  { %v4276_v30 = vpop.permute.xlu1 %4275 }
 0x936   :  { %v4416_v22 = vsel %vm197_vm1, %v7696_v9, %v4276_v30  ;;  %v4274_v31 = vpop.permute.xlu0 %4273 }
 0x937   :  { %4466 = vst.msk [vmem:[%s8341_s24 + $0x48] sm:$0xff] %vm466_vm3, %v4416_v22  ;;  %v4415_v14 = vsel %vm197_vm1, %v7694_v16, %v4274_v31 }
 0x938   :  { %4465 = vst.msk [vmem:[%s8341_s24 + $0x40] sm:$0xff] %vm466_vm3, %v4415_v14 }
 0x93d   :  { %v4280_v42 = vpop.permute.xlu1 %4279 }
 0x93e   :  { %v4418_v25 = vsel %vm197_vm1, %v7706_v60, %v4280_v42  ;;  %v4278_v50 = vpop.permute.xlu0 %4277 }
 0x93f   :  { %4468 = vst.msk [vmem:[%s8341_s24 + $0x58] sm:$0xff] %vm466_vm3, %v4418_v25  ;;  %v4417_v9 = vsel %vm197_vm1, %v7704_v21, %v4278_v50 }
 0x940   :  { %4467 = vst.msk [vmem:[%s8341_s24 + $0x50] sm:$0xff] %vm466_vm3, %v4417_v9 }
 0x945   :  { %v4284_v16 = vpop.permute.xlu1 %4283 }
 0x946   :  { %v4420_v3 = vsel %vm197_vm1, %v7718_v46, %v4284_v16  ;;  %v4282_v0 = vpop.permute.xlu0 %4281 }
 0x947   :  { %4470 = vst.msk [vmem:[%s8341_s24 + $0x68] sm:$0xff] %vm466_vm3, %v4420_v3  ;;  %v4419_v60 = vsel %vm197_vm1, %v7715_v4, %v4282_v0 }
 0x948   :  { %4469 = vst.msk [vmem:[%s8341_s24 + $0x60] sm:$0xff] %vm466_vm3, %v4419_v60 }
 0x94d   :  { %v4288_v21 = vpop.permute.xlu1 %4287 }
 0x94e   :  { %v4422_v53 = vsel %vm197_vm1, %v7726_v48, %v4288_v21  ;;  %v4286_v37 = vpop.permute.xlu0 %4285 }
 0x94f   :  { %4472 = vst.msk [vmem:[%s8341_s24 + $0x78] sm:$0xff] %vm466_vm3, %v4422_v53  ;;  %v4421_v46 = vsel %vm197_vm1, %v7729_v51, %v4286_v37 }
 0x950   :  { %4471 = vst.msk [vmem:[%s8341_s24 + $0x70] sm:$0xff] %vm466_vm3, %v4421_v46 }
 0x955   :  { %v4292_v4 = vpop.permute.xlu1 %4291 }
 0x956   :  { %v4424_v6 = vsel %vm197_vm1, %v7738_v58, %v4292_v4  ;;  %v4290_v35 = vpop.permute.xlu0 %4289 }
 0x957   :  { %4474 = vst.msk [vmem:[%s8341_s24 + $0x88] sm:$0xff] %vm466_vm3, %v4424_v6  ;;  %v4423_v48 = vsel %vm197_vm1, %v7741_v19, %v4290_v35 }
 0x958   :  { %4473 = vst.msk [vmem:[%s8341_s24 + $0x80] sm:$0xff] %vm466_vm3, %v4423_v48 }
 0x95c   :  { %v4296_v51 = vpop.permute.xlu1 %4295 }
 0x95d   :  { %v4426_v17 = vsel %vm197_vm1, %v7750_v62, %v4296_v51  ;;  %v4294_v54 = vpop.permute.xlu0 %4293 }
 0x95e   :  { %4476 = vst.msk [vmem:[%s8341_s24 + $0x98] sm:$0xff] %vm466_vm3, %v4426_v17  ;;  %v4425_v58 = vsel %vm197_vm1, %v7752_v55, %v4294_v54 }
 0x95f   :  { %4475 = vst.msk [vmem:[%s8341_s24 + $0x90] sm:$0xff] %vm466_vm3, %v4425_v58 }
 0x960   :  { %v4300_v19 = vpop.permute.xlu1 %4299 }
 0x961   :  { %v4428_v15 = vsel %vm197_vm1, %v7760_v27, %v4300_v19  ;;  %v4298_v1 = vpop.permute.xlu0 %4297 }
 0x962   :  { %4478 = vst.msk [vmem:[%s8341_s24 + $0xa8] sm:$0xff] %vm466_vm3, %v4428_v15  ;;  %v4427_v62 = vsel %vm197_vm1, %v7762_v38, %v4298_v1 }
 0x963   :  { %4477 = vst.msk [vmem:[%s8341_s24 + $0xa0] sm:$0xff] %vm466_vm3, %v4427_v62 }
 0x964   :  { %v4304_v55 = vpop.permute.xlu1 %4303 }
 0x965   :  { %v4430_v8 = vsel %vm197_vm1, %v7770_v43, %v4304_v55  ;;  %v4302_v63 = vpop.permute.xlu0 %4301 }
 0x966   :  { %4480 = vst.msk [vmem:[%s8341_s24 + $0xb8] sm:$0xff] %vm466_vm3, %v4430_v8  ;;  %v4429_v27 = vsel %vm197_vm1, %v7772_v34, %v4302_v63 }
 0x967   :  { %4479 = vst.msk [vmem:[%s8341_s24 + $0xb0] sm:$0xff] %vm466_vm3, %v4429_v27 }
 0x96a   :  { %v4308_v38 = vpop.permute.xlu1 %4307 }
 0x96b   :  { %v4432_v39 = vsel %vm197_vm1, %v7781_v10, %v4308_v38  ;;  %v4306_v29 = vpop.permute.xlu0 %4305 }
 0x96c   :  { %4482 = vst.msk [vmem:[%s8341_s24 + $0xc8] sm:$0xff] %vm466_vm3, %v4432_v39  ;;  %v4431_v43 = vsel %vm197_vm1, %v7784_v61, %v4306_v29 }
 0x96d   :  { %4481 = vst.msk [vmem:[%s8341_s24 + $0xc0] sm:$0xff] %vm466_vm3, %v4431_v43 }
 0x96e   :  { %v4312_v34 = vpop.permute.xlu1 %4311 }
 0x96f   :  { %v4434_v12 = vsel %vm197_vm1, %v7786_v33, %v4312_v34  ;;  %v4310_v30 = vpop.permute.xlu0 %4309 }
 0x970   :  { %4484 = vst.msk [vmem:[%s8341_s24 + $0xd8] sm:$0xff] %vm466_vm3, %v4434_v12  ;;  %v4433_v10 = vsel %vm197_vm1, %v7794_v2, %v4310_v30 }
 0x971   :  { %4483 = vst.msk [vmem:[%s8341_s24 + $0xd0] sm:$0xff] %vm466_vm3, %v4433_v10 }
 0x972   :  { %v4316_v61 = vpop.permute.xlu1 %4315 }
 0x973   :  { %v4436_v22 = vsel %vm197_vm1, %v7796_v5, %v4316_v61  ;;  %v4314_v31 = vpop.permute.xlu0 %4313 }
 0x974   :  { %4486 = vst.msk [vmem:[%s8341_s24 + $0xe8] sm:$0xff] %vm466_vm3, %v4436_v22  ;;  %v4435_v33 = vsel %vm197_vm1, %v7804_v45, %v4314_v31 }
 0x975   :  { %4485 = vst.msk [vmem:[%s8341_s24 + $0xe0] sm:$0xff] %vm466_vm3, %v4435_v33 }
 0x976   :  { %v4320_v2 = vpop.permute.xlu1 %4319 }
 0x977   :  { %v4438_v14 = vsel %vm197_vm1, %v7806_v41, %v4320_v2  ;;  %v4318_v42 = vpop.permute.xlu0 %4317 }
 0x978   :  { %4488 = vst.msk [vmem:[%s8341_s24 + $0xf8] sm:$0xff] %vm466_vm3, %v4438_v14  ;;  %v4437_v5 = vsel %vm197_vm1, %v7813_v7, %v4318_v42 }
 0x979   :  { %4487 = vst.msk [vmem:[%s8341_s24 + $0xf0] sm:$0xff] %vm466_vm3, %v4437_v5 }
 0x97a   :  { %v4324_v45 = vpop.permute.xlu1 %4323 }
 0x97b   :  { %v4440_v25 = vsel %vm197_vm1, %v7821_v20, %v4324_v45  ;;  %v4322_v50 = vpop.permute.xlu0 %4321 }
 0x97c   :  { %4490 = vst.msk [vmem:[%s8341_s24 + $0x108] sm:$0xff] %vm466_vm3, %v4440_v25  ;;  %v4439_v41 = vsel %vm197_vm1, %v7824_v57, %v4322_v50 }
 0x97d   :  { %4489 = vst.msk [vmem:[%s8341_s24 + $0x100] sm:$0xff] %vm466_vm3, %v4439_v41 }
 0x97e   :  { %v4328_v7 = vpop.permute.xlu1 %4327 }
 0x97f   :  { %v4442_v9 = vsel %vm197_vm1, %v7831_v32, %v4328_v7  ;;  %v4326_v16 = vpop.permute.xlu0 %4325 }
 0x980   :  { %4492 = vst.msk [vmem:[%s8341_s24 + $0x118] sm:$0xff] %vm466_vm3, %v4442_v9  ;;  %v4441_v20 = vsel %vm197_vm1, %v7834_v49, %v4326_v16 }
 0x981   :  { %4491 = vst.msk [vmem:[%s8341_s24 + $0x110] sm:$0xff] %vm466_vm3, %v4441_v20 }
 0x983   :  { %v4332_v57 = vpop.permute.xlu1 %4331 }
 0x984   :  { %v4444_v3 = vsel %vm197_vm1, %v7842_v13, %v4332_v57  ;;  %v4330_v0 = vpop.permute.xlu0 %4329 }
 0x985   :  { %4494 = vst.msk [vmem:[%s8341_s24 + $0x128] sm:$0xff] %vm466_vm3, %v4444_v3  ;;  %v4443_v32 = vsel %vm197_vm1, %v7840_v26, %v4330_v0 }
 0x986   :  { %4493 = vst.msk [vmem:[%s8341_s24 + $0x120] sm:$0xff] %vm466_vm3, %v4443_v32 }
 0x987   :  { %v4336_v49 = vpop.permute.xlu1 %4335 }
 0x988   :  { %v4446_v60 = vsel %vm197_vm1, %v7852_v28, %v4336_v49  ;;  %v4334_v21 = vpop.permute.xlu0 %4333 }
 0x989   :  { %4496 = vst.msk [vmem:[%s8341_s24 + $0x138] sm:$0xff] %vm466_vm3, %v4446_v60  ;;  %v4445_v13 = vsel %vm197_vm1, %v7846_v24, %v4334_v21 }
 0x98a   :  { %4495 = vst.msk [vmem:[%s8341_s24 + $0x130] sm:$0xff] %vm466_vm3, %v4445_v13 }
 0x98b   :  { %v4340_v26 = vpop.permute.xlu1 %4339 }
 0x98c   :  { %v4448_v53 = vsel %vm197_vm1, %v7860_v11, %v4340_v26  ;;  %v4338_v37 = vpop.permute.xlu0 %4337 }
 0x98d   :  { %4498 = vst.msk [vmem:[%s8341_s24 + $0x148] sm:$0xff] %vm466_vm3, %v4448_v53  ;;  %v4447_v28 = vsel %vm197_vm1, %v7854_v40, %v4338_v37 }
 0x98e   :  { %4497 = vst.msk [vmem:[%s8341_s24 + $0x140] sm:$0xff] %vm466_vm3, %v4447_v28 }
 0x98f   :  { %v4344_v24 = vpop.permute.xlu1 %4343 }
 0x990   :  { %v4450_v46 = vsel %vm197_vm1, %v7868_v47, %v4344_v24  ;;  %v4342_v4 = vpop.permute.xlu0 %4341 }
 0x991   :  { %4500 = vst.msk [vmem:[%s8341_s24 + $0x158] sm:$0xff] %vm466_vm3, %v4450_v46  ;;  %v4449_v11 = vsel %vm197_vm1, %v7862_v56, %v4342_v4 }
 0x992   :  { %4499 = vst.msk [vmem:[%s8341_s24 + $0x150] sm:$0xff] %vm466_vm3, %v4449_v11 }
 0x993   :  { %v4348_v40 = vpop.permute.xlu1 %4347 }
 0x994   :  { %v4452_v6 = vsel %vm197_vm1, %v7874_v23, %v4348_v40  ;;  %v4346_v35 = vpop.permute.xlu0 %4345 }
 0x995   :  { %4502 = vst.msk [vmem:[%s8341_s24 + $0x168] sm:$0xff] %vm466_vm3, %v4452_v6  ;;  %v4451_v47 = vsel %vm197_vm1, %v7872_v52, %v4346_v35 }
 0x996   :  { %4501 = vst.msk [vmem:[%s8341_s24 + $0x160] sm:$0xff] %vm466_vm3, %v4451_v47 }
 0x997   :  { %v4352_v56 = vpop.permute.xlu1 %4351 }
 0x998   :  { %v4454_v48 = vsel %vm197_vm1, %v7882_v36, %v4352_v56  ;;  %v4350_v51 = vpop.permute.xlu0 %4349 }
 0x999   :  { %4504 = vst.msk [vmem:[%s8341_s24 + $0x178] sm:$0xff] %vm466_vm3, %v4454_v48  ;;  %v4453_v23 = vsel %vm197_vm1, %v7880_v44, %v4350_v51 }
 0x99a   :  { %4503 = vst.msk [vmem:[%s8341_s24 + $0x170] sm:$0xff] %vm466_vm3, %v4453_v23 }
 0x99b   :  { %v4356_v52 = vpop.permute.xlu1 %4355 }
 0x99c   :  { %v4456_v17 = vsel %vm197_vm1, %v7890_v18, %v4356_v52  ;;  %v4354_v54 = vpop.permute.xlu0 %4353 }
 0x99d   :  { %4506 = vst.msk [vmem:[%s8341_s24 + $0x188] sm:$0xff] %vm466_vm3, %v4456_v17  ;;  %v4455_v36 = vsel %vm197_vm1, %v7888_v59, %v4354_v54 }
 0x99e   :  { %4505 = vst.msk [vmem:[%s8341_s24 + $0x180] sm:$0xff] %vm466_vm3, %v4455_v36 }
 0x99f   :  { %4515 = vsyncpa [#allocation3], 1 }
 0x9a0   :  { %4516 = vsyncpa [#allocation5], 1 }
 0x9a1   :  { %4517 = vsyncpa [#allocation8], 1 }
 0x9a2   :  { %4518 = vsyncpa [#allocation11], 1 }
 0x9a3   :  { %4519 = vsyncpa [#allocation14], 1 }
 0x9a4   :  { %4520 = vsyncpa [#allocation17], 1 }

</bundles_post_ra>
